<compile_context>
chip_gen: v6e
topology: v6e:2x2x1
jax: 0.10.0
libtpu: 0.0.40
codegen_flags: <defaults>
</compile_context>

<pallas_src>
import functools

import jax
import jax.numpy as jnp
from jax.experimental import pallas as pl
from jax.experimental.pallas import tpu as pltpu

LOG_SIG_MIN = -20.0
LOG_SIG_MAX = 2.0
EPS = 1e-6

VMEM_SPEC = pl.BlockSpec(memory_space=pltpu.MemorySpace.VMEM)


# ----------------------------------------------------------------------------
# Pallas kernels
# ----------------------------------------------------------------------------
def _encoder_kernel(patch_ref, wc_ref, bc_ref, out_ref):
    """conv (as im2col matmul) + ReLU + 2x2 maxpool.

    Patch rows are ordered (sh, sw, img, h', w'), so pooling over the 2x2
    window (sh, sw) is a max over four contiguous row blocks of size
    n = N_imgs * (H/2) * (W/2).
    """
    y = jnp.dot(patch_ref[...], wc_ref[...],
                preferred_element_type=jnp.float32) + bc_ref[...]
    y = jnp.maximum(y, 0.0)                                   # (4n, HC)
    n = out_ref.shape[0]
    out_ref[...] = jnp.maximum(jnp.maximum(y[0 * n:1 * n], y[1 * n:2 * n]),
                               jnp.maximum(y[2 * n:3 * n], y[3 * n:4 * n]))


def _sac_kernel(gamma, alpha, target_entropy, log_alpha, loss_factor,
                feat_ref, act_ref, noise_ref, rew_ref, mask_ref,
                scale_ref, bias_ref,
                wp1_ref, bp1_ref, wp2_ref, bp2_ref, wpo_ref, bpo_ref,
                wq1s_ref, wq1a_ref, bq1_ref, wq2_ref, bq2_ref, wq3_ref, bq3_ref,
                loss_ref):
    bsz = rew_ref.shape[0]
    adim = act_ref.shape[1]
    inv_b = 1.0 / float(bsz)

    feat = feat_ref[...]           # (2B, F): rows [0:B]=state, [B:2B]=next_state

    # ---- Gaussian policy: state and next_state rows in one pass ------------
    x = jnp.maximum(
        jnp.dot(feat, wp1_ref[...], preferred_element_type=jnp.float32)
        + bp1_ref[...], 0.0)
    x = jnp.maximum(
        jnp.dot(x, wp2_ref[...], preferred_element_type=jnp.float32)
        + bp2_ref[...], 0.0)
    # mean / log_std heads packed into one (h, 2A) matmul
    mo = jnp.dot(x, wpo_ref[...], preferred_element_type=jnp.float32) + bpo_ref[...]
    mean = mo[:, :adim]
    log_std = jnp.clip(mo[:, adim:], LOG_SIG_MIN, LOG_SIG_MAX)
    std = jnp.exp(log_std)

    noise = noise_ref[...]
    x_t = mean + std * noise                        # Normal(mean, std).rsample()
    y_t = jnp.tanh(x_t)
    scale = scale_ref[...]
    bias = bias_ref[...]
    action = y_t * scale + bias
    # Normal(mean, std).log_prob(x_t) = -0.5*noise^2 - log_std - 0.5*log(2*pi)
    log_prob = (-0.5 * noise * noise - log_std - 0.5 * jnp.log(2.0 * jnp.pi)
                - jnp.log(scale * (1.0 - y_t * y_t) + EPS))
    log_pi_all = jnp.sum(log_prob, axis=1, keepdims=True)       # (2B, 1)

    pi = action[:bsz]
    log_pi = log_pi_all[:bsz]
    next_action = action[bsz:]
    next_log_pi = log_pi_all[bsz:]

    state_feat = feat[:bsz]
    next_feat = feat[bsz:]

    # ---- twin-Q critic + twin-Q target critic (packed column-wise) ---------
    # Output columns: 0 = Q1, 1 = Q2 (live critic), 2 = Q1', 3 = Q2' (target).
    wq1s = wq1s_ref[...]
    wq1a = wq1a_ref[...]
    bq1 = bq1_ref[...]
    wq2 = wq2_ref[...]
    bq2 = bq2_ref[...]
    wq3 = wq3_ref[...]
    bq3 = bq3_ref[...]

    def q_heads(f, a):
        # state/action concat folded into split first-layer weights
        h = jnp.maximum(
            jnp.dot(f, wq1s, preferred_element_type=jnp.float32)
            + jnp.dot(a, wq1a, preferred_element_type=jnp.float32) + bq1, 0.0)
        h = jnp.maximum(
            jnp.dot(h, wq2, preferred_element_type=jnp.float32) + bq2, 0.0)
        return jnp.dot(h, wq3, preferred_element_type=jnp.float32) + bq3  # (B, 4)

    q_sa = q_heads(state_feat, act_ref[...])    # live critic (cols 0, 1)
    q_spi = q_heads(state_feat, pi)             # live critic (cols 0, 1)
    q_nt = q_heads(next_feat, next_action)      # target critic (cols 2, 3)

    qf1, qf2 = q_sa[:, 0:1], q_sa[:, 1:2]
    qf1_pi, qf2_pi = q_spi[:, 0:1], q_spi[:, 1:2]
    q1_nt, q2_nt = q_nt[:, 2:3], q_nt[:, 3:4]

    # ---- losses, packed into one (1, 4) output ------------------------------
    min_q_nt = jnp.minimum(q1_nt, q2_nt) - alpha * next_log_pi
    next_q = rew_ref[...] + mask_ref[...] * gamma * min_q_nt
    d1 = qf1 - next_q
    d2 = qf2 - next_q
    min_q_pi = jnp.minimum(qf1_pi, qf2_pi)

    loss_ref[:, 0:1] = jnp.sum(d1 * d1, axis=0, keepdims=True) * (inv_b * loss_factor)
    loss_ref[:, 1:2] = jnp.sum(d2 * d2, axis=0, keepdims=True) * (inv_b * loss_factor)
    loss_ref[:, 2:3] = jnp.sum(alpha * log_pi - min_q_pi,
                               axis=0, keepdims=True) * (inv_b * loss_factor)
    loss_ref[:, 3:4] = -jnp.sum(log_alpha * (log_pi + target_entropy),
                                axis=0, keepdims=True) * inv_b


# ----------------------------------------------------------------------------
# pallas_call wrappers (no grid: everything fits in VMEM at these shapes; a
# batch grid axis with dimension_semantics=("parallel",) would only be needed
# on v7x if the training batch is scaled far beyond this toy size)
# ----------------------------------------------------------------------------
def encode_pooled(patches, conv_w, conv_b, pooled_rows, hidden_channels):
    return pl.pallas_call(
        _encoder_kernel,
        out_shape=jax.ShapeDtypeStruct((pooled_rows, hidden_channels), jnp.float32),
        in_specs=[VMEM_SPEC] * 3,
        out_specs=VMEM_SPEC,
    )(patches, conv_w, conv_b)


def sac_forward_losses(consts, tensors, policy, critic):
    kern = functools.partial(_sac_kernel, *consts)
    args = (tensors["feat"], tensors["action"], tensors["noise"],
            tensors["reward"], tensors["mask"], tensors["scale"], tensors["bias"],
            policy["w1"], policy["b1"], policy["w2"], policy["b2"],
            policy["wo"], policy["bo"],
            critic["w1s"], critic["w1a"], critic["b1"],
            critic["w2"], critic["b2"], critic["w3"], critic["b3"])
    return pl.pallas_call(
        kern,
        out_shape=jax.ShapeDtypeStruct((1, 4), jnp.float32),
        in_specs=[VMEM_SPEC] * len(args),
        out_specs=VMEM_SPEC,
    )(*args)


# ----------------------------------------------------------------------------
# SAC module (forward pass only)
# ----------------------------------------------------------------------------
def _linear_init(key, fan_in, fan_out):
    k1, k2 = jax.random.split(key)
    bound = 1.0 / float(fan_in) ** 0.5
    w = jax.random.uniform(k1, (fan_in, fan_out), jnp.float32, -bound, bound)
    b = jax.random.uniform(k2, (1, fan_out), jnp.float32, -bound, bound)
    return w, b


def _block_diag(a, b):
    ra, ca = a.shape
    rb, cb = b.shape
    out = jnp.zeros((ra + rb, ca + cb), jnp.float32)
    out = out.at[:ra, :ca].set(a)
    out = out.at[ra:, ca:].set(b)
    return out


class SACPallas:
    def __init__(self, key, *, in_channels=4, height=16, width=16,
                 hidden_channels=8, action_dim=2, hidden_size=32,
                 gamma=0.99, alpha=0.2):
        self.gamma = float(gamma)
        self.alpha = float(alpha)
        self.loss_factor = 100.0
        self.target_entropy = -float(action_dim)
        self.log_alpha = 0.0  # torch.zeros(1)
        self.kh, self.kw = 7, 3
        self.ph, self.pw = 3, 1
        self.C, self.H, self.W = in_channels, height, width
        self.HC = hidden_channels
        self.A = action_dim
        self.Hp, self.Wp = height // 2, width // 2
        self.feat = hidden_channels * self.Hp * self.Wp

        keys = jax.random.split(key, 16)
        cin = in_channels * self.kh * self.kw
        # encoder conv stored im2col-shaped: (C*KH*KW, HC), rows = (ic, kh, kw)
        self.conv_w, self.conv_b = _linear_init(keys[0], cin, hidden_channels)

        # The encoder kernel emits features flattened in (h', w', c) order; the
        # reference flattens NCHW, i.e. (c, h', w').  Absorb the difference by
        # permuting (once, at init) the rows of every weight that consumes
        # the features -- mathematically identical forward.
        j = jnp.arange(self.feat)
        oc = j % hidden_channels
        w2i = (j // hidden_channels) % self.Wp
        h2i = j // (hidden_channels * self.Wp)
        self._perm = oc * (self.Hp * self.Wp) + h2i * self.Wp + w2i

        f, h, a = self.feat, hidden_size, action_dim

        # ---- Gaussian policy (mean / log_std heads packed into one matmul) --
        w1, b1 = _linear_init(keys[1], f, h)
        w2_, b2_ = _linear_init(keys[2], h, h)
        wm, bm = _linear_init(keys[3], h, a)
        ws, bs = _linear_init(keys[4], h, a)
        self.policy = {
            "w1": w1[self._perm], "b1": b1,
            "w2": w2_, "b2": b2_,
            "wo": jnp.concatenate([wm, ws], axis=1),
            "bo": jnp.concatenate([bm, bs], axis=1),
        }

        # ---- twin-Q critic + (hard_update) twin-Q target critic -------------
        q = {}
        for name, kk in (("l1", 5), ("l2", 6), ("l3", 7),
                         ("l4", 8), ("l5", 9), ("l6", 10)):
            fan_in = f + a if name in ("l1", "l4") else h
            fan_out = 1 if name in ("l3", "l6") else h
            q[name] = _linear_init(keys[kk], fan_in, fan_out)

        def pack(qd):
            # columns [0:h] = Q1, [h:2h] = Q2
            w1s = jnp.concatenate([qd["l1"][0][:f][self._perm],
                                   qd["l4"][0][:f][self._perm]], axis=1)
            w1a = jnp.concatenate([qd["l1"][0][f:], qd["l4"][0][f:]], axis=1)
            b1c = jnp.concatenate([qd["l1"][1], qd["l4"][1]], axis=1)
            w2c = _block_diag(qd["l2"][0], qd["l5"][0])
            b2c = jnp.concatenate([qd["l2"][1], qd["l5"][1]], axis=1)
            w3c = _block_diag(qd["l3"][0], qd["l6"][0])
            b3c = jnp.concatenate([qd["l3"][1], qd["l6"][1]], axis=1)
            return w1s, w1a, b1c, w2c, b2c, w3c, b3c

        live = pack(q)
        target = pack(q)  # hard_update(critic_target, critic): identical values
        # big packed weights: columns [0:2h] = live twin-Q, [2h:4h] = target twin-Q
        self.critic = {
            "w1s": jnp.concatenate([live[0], target[0]], axis=1),   # (f, 4h)
            "w1a": jnp.concatenate([live[1], target[1]], axis=1),   # (a, 4h)
            "b1":  jnp.concatenate([live[2], target[2]], axis=1),   # (1, 4h)
            "w2":  _block_diag(live[3], target[3]),                 # (4h, 4h)
            "b2":  jnp.concatenate([live[4], target[4]], axis=1),   # (1, 4h)
            "w3":  _block_diag(live[5], target[5]),                 # (4h, 4)
            "b3":  jnp.concatenate([live[6], target[6]], axis=1),   # (1, 4)
        }

        # action_space scale/bias (default Box(-1, 1))
        self.action_scale = jnp.ones((1, a), jnp.float32)
        self.action_bias = jnp.zeros((1, a), jnp.float32)

    # ---- host-side im2col: rows ordered (pool_sh, pool_sw, img, h', w') -----
    def _conv_patches(self, x):
        n, c, h, w = x.shape
        kh, kw = self.kh, self.kw
        xp = jnp.pad(x, ((0, 0), (0, 0), (self.ph, self.ph), (self.pw, self.pw)))
        cols = [xp[:, :, i:i + h, j:j + w] for i in range(kh) for j in range(kw)]
        pat = jnp.stack(cols, axis=-1)                        # (N, C, H, W, KH*KW)
        pat = pat.reshape(n, c, h // 2, 2, w // 2, 2, kh * kw)
        pat = pat.transpose(3, 5, 0, 2, 4, 1, 6)              # (2,2,N,H/2,W/2,C,KH*KW)
        return pat.reshape(4 * n * (h // 2) * (w // 2), c * kh * kw)

    # encoder: conv -> ReLU -> maxpool 2x2 -> flatten, batched over images
    def encode(self, x):
        n = x.shape[0]
        patches = self._conv_patches(x)
        pooled = encode_pooled(patches, self.conv_w, self.conv_b,
                               n * self.Hp * self.Wp, self.HC)  # (N*Hp*Wp, HC)
        return pooled.reshape(n, self.feat)   # free row-major reshape (no copy)

    def forward(self, key, state_batch, action_batch, reward_batch,
                next_state_batch, mask_batch):
        bsz = state_batch.shape[0]
        reward = reward_batch.reshape(bsz, 1)
        mask = mask_batch.reshape(bsz, 1)

        # encode state and next_state with one batched encoder call
        feat_all = self.encode(
            jnp.concatenate([state_batch, next_state_batch], axis=0))  # (2B, F)

        # one noise draw for both policy evaluations (rows 0:B -> pi, B:2B -> next)
        noise = jax.random.normal(key, (2 * bsz, self.A), jnp.float32)

        consts = (self.gamma, self.alpha, self.target_entropy,
                  self.log_alpha, self.loss_factor)
        tensors = {"feat": feat_all, "action": action_batch, "noise": noise,
                   "reward": reward, "mask": mask,
                   "scale": self.action_scale, "bias": self.action_bias}
        losses = sac_forward_losses(consts, tensors, self.policy, self.critic)

        # TODO(synk): backward() + Adam steps + soft_update of targets are not
        # replicated; alpha_tlogs reflects the pre-step log_alpha.
        alpha_tlogs = jnp.exp(jnp.float32(self.log_alpha))

        return (losses[0, 0], losses[0, 1], losses[0, 2], losses[0, 3],
                alpha_tlogs)


if __name__ == "__main__":
    key = jax.random.PRNGKey(0)
    k_param, k_state, k_next, k_act, k_rew, k_fwd = jax.random.split(key, 6)

    B, C, H, W, A = 2, 4, 16, 16, 2
    sac = SACPallas(k_param, in_channels=C, height=H, width=W,
                    hidden_channels=8, action_dim=A, hidden_size=32)

    state = jax.random.normal(k_state, (B, C, H, W), jnp.float32)
    next_state = jax.random.normal(k_next, (B, C, H, W), jnp.float32)
    action = jax.random.uniform(k_act, (B, A), jnp.float32, -1.0, 1.0)
    reward = jax.random.normal(k_rew, (B,), jnp.float32)
    mask = jnp.ones((B,), jnp.float32)

    fwd = jax.jit(sac.forward)
    outs = fwd(k_fwd, state, action, reward, next_state, mask)
    outs = jax.block_until_ready(outs)
    assert all(bool(jnp.isfinite(o)) for o in outs)
    print("KERNEL_OK")
</pallas_src>

<mosaic_0001>
module attributes {stable_mosaic.version = 11 : i64} {
  func.func @_encoder_kernel(%arg0: memref<1024x84xf32, #tpu.memory_space<vmem>>, %arg1: memref<84x8xf32, #tpu.memory_space<vmem>>, %arg2: memref<1x8xf32, #tpu.memory_space<vmem>>, %arg3: memref<256x8xf32, #tpu.memory_space<vmem>>) attributes {dimension_semantics = [], scalar_prefetch = 0 : i64, scratch_operands = 0 : i64, tpu.core_type = #tpu.core_type<tc>} {
    %c0 = arith.constant 0 : index
    %c0_0 = arith.constant 0 : index
    %0 = vector.load %arg0[%c0, %c0_0] : memref<1024x84xf32, #tpu.memory_space<vmem>>, vector<1024x84xf32>
    %c0_1 = arith.constant 0 : index
    %c0_2 = arith.constant 0 : index
    %1 = vector.load %arg1[%c0_1, %c0_2] : memref<84x8xf32, #tpu.memory_space<vmem>>, vector<84x8xf32>
    %cst = arith.constant dense<0.000000e+00> : vector<1024x8xf32>
    %2 = tpu.matmul %0, %1, %cst {dimension_numbers = #tpu.dot_dimension_numbers<[1], [0], [0], [1], [0, 0, 1, 1], [], []>} : vector<1024x84xf32>, vector<84x8xf32>, vector<1024x8xf32> -> vector<1024x8xf32>
    %c0_3 = arith.constant 0 : index
    %c0_4 = arith.constant 0 : index
    %3 = vector.load %arg2[%c0_3, %c0_4] : memref<1x8xf32, #tpu.memory_space<vmem>>, vector<1x8xf32>
    %4 = vector.broadcast %3 : vector<1x8xf32> to vector<1024x8xf32>
    %5 = arith.addf %2, %4 : vector<1024x8xf32>
    %cst_5 = arith.constant 0.000000e+00 : f32
    %6 = vector.broadcast %cst_5 : f32 to vector<1024x8xf32>
    %7 = arith.maximumf %5, %6 : vector<1024x8xf32>
    %8 = vector.extract_strided_slice %7 {offsets = [0, 0], sizes = [256, 8], strides = [1, 1]} : vector<1024x8xf32> to vector<256x8xf32>
    %9 = vector.extract_strided_slice %7 {offsets = [256, 0], sizes = [256, 8], strides = [1, 1]} : vector<1024x8xf32> to vector<256x8xf32>
    %10 = arith.maximumf %8, %9 : vector<256x8xf32>
    %11 = vector.extract_strided_slice %7 {offsets = [512, 0], sizes = [256, 8], strides = [1, 1]} : vector<1024x8xf32> to vector<256x8xf32>
    %12 = vector.extract_strided_slice %7 {offsets = [768, 0], sizes = [256, 8], strides = [1, 1]} : vector<1024x8xf32> to vector<256x8xf32>
    %13 = arith.maximumf %11, %12 : vector<256x8xf32>
    %14 = arith.maximumf %10, %13 : vector<256x8xf32>
    %c0_6 = arith.constant 0 : index
    %c0_7 = arith.constant 0 : index
    %15 = vector.load %arg3[%c0_6, %c0_7] : memref<256x8xf32, #tpu.memory_space<vmem>>, vector<256x8xf32>
    tpu.vector_store %arg3[%c0_6, %c0_7], %14 {strides = array<i32>} : memref<256x8xf32, #tpu.memory_space<vmem>>, vector<256x8xf32>,
    return
  }
}

module attributes {stable_mosaic.version = 11 : i64} {
  func.func @_sac_kernel(%arg0: memref<4x512xf32, #tpu.memory_space<vmem>>, %arg1: memref<2x2xf32, #tpu.memory_space<vmem>>, %arg2: memref<4x2xf32, #tpu.memory_space<vmem>>, %arg3: memref<2x1xf32, #tpu.memory_space<vmem>>, %arg4: memref<2x1xf32, #tpu.memory_space<vmem>>, %arg5: memref<1x2xf32, #tpu.memory_space<vmem>>, %arg6: memref<1x2xf32, #tpu.memory_space<vmem>>, %arg7: memref<512x32xf32, #tpu.memory_space<vmem>>, %arg8: memref<1x32xf32, #tpu.memory_space<vmem>>, %arg9: memref<32x32xf32, #tpu.memory_space<vmem>>, %arg10: memref<1x32xf32, #tpu.memory_space<vmem>>, %arg11: memref<32x4xf32, #tpu.memory_space<vmem>>, %arg12: memref<1x4xf32, #tpu.memory_space<vmem>>, %arg13: memref<512x128xf32, #tpu.memory_space<vmem>>, %arg14: memref<2x128xf32, #tpu.memory_space<vmem>>, %arg15: memref<1x128xf32, #tpu.memory_space<vmem>>, %arg16: memref<128x128xf32, #tpu.memory_space<vmem>>, %arg17: memref<1x128xf32, #tpu.memory_space<vmem>>, %arg18: memref<128x4xf32, #tpu.memory_space<vmem>>, %arg19: memref<1x4xf32, #tpu.memory_space<vmem>>, %arg20: memref<1x4xf32, #tpu.memory_space<vmem>>) attributes {dimension_semantics = [], scalar_prefetch = 0 : i64, scratch_operands = 0 : i64, tpu.core_type = #tpu.core_type<tc>} {
    %c0 = arith.constant 0 : index
    %c0_0 = arith.constant 0 : index
    %0 = vector.load %arg0[%c0, %c0_0] : memref<4x512xf32, #tpu.memory_space<vmem>>, vector<4x512xf32>
    %c0_1 = arith.constant 0 : index
    %c0_2 = arith.constant 0 : index
    %1 = vector.load %arg7[%c0_1, %c0_2] : memref<512x32xf32, #tpu.memory_space<vmem>>, vector<512x32xf32>
    %cst = arith.constant dense<0.000000e+00> : vector<4x32xf32>
    %2 = tpu.matmul %0, %1, %cst {dimension_numbers = #tpu.dot_dimension_numbers<[1], [0], [0], [1], [0, 0, 1, 1], [], []>} : vector<4x512xf32>, vector<512x32xf32>, vector<4x32xf32> -> vector<4x32xf32>
    %c0_3 = arith.constant 0 : index
    %c0_4 = arith.constant 0 : index
    %3 = vector.load %arg8[%c0_3, %c0_4] : memref<1x32xf32, #tpu.memory_space<vmem>>, vector<1x32xf32>
    %4 = vector.broadcast %3 : vector<1x32xf32> to vector<4x32xf32>
    %5 = arith.addf %2, %4 : vector<4x32xf32>
    %cst_5 = arith.constant 0.000000e+00 : f32
    %6 = vector.broadcast %cst_5 : f32 to vector<4x32xf32>
    %7 = arith.maximumf %5, %6 : vector<4x32xf32>
    %c0_6 = arith.constant 0 : index
    %c0_7 = arith.constant 0 : index
    %8 = vector.load %arg9[%c0_6, %c0_7] : memref<32x32xf32, #tpu.memory_space<vmem>>, vector<32x32xf32>
    %cst_8 = arith.constant dense<0.000000e+00> : vector<4x32xf32>
    %9 = tpu.matmul %7, %8, %cst_8 {dimension_numbers = #tpu.dot_dimension_numbers<[1], [0], [0], [1], [0, 0, 1, 1], [], []>} : vector<4x32xf32>, vector<32x32xf32>, vector<4x32xf32> -> vector<4x32xf32>
    %c0_9 = arith.constant 0 : index
    %c0_10 = arith.constant 0 : index
    %10 = vector.load %arg10[%c0_9, %c0_10] : memref<1x32xf32, #tpu.memory_space<vmem>>, vector<1x32xf32>
    %11 = vector.broadcast %10 : vector<1x32xf32> to vector<4x32xf32>
    %12 = arith.addf %9, %11 : vector<4x32xf32>
    %cst_11 = arith.constant 0.000000e+00 : f32
    %13 = vector.broadcast %cst_11 : f32 to vector<4x32xf32>
    %14 = arith.maximumf %12, %13 : vector<4x32xf32>
    %c0_12 = arith.constant 0 : index
    %c0_13 = arith.constant 0 : index
    %15 = vector.load %arg11[%c0_12, %c0_13] : memref<32x4xf32, #tpu.memory_space<vmem>>, vector<32x4xf32>
    %cst_14 = arith.constant dense<0.000000e+00> : vector<4x4xf32>
    %16 = tpu.matmul %14, %15, %cst_14 {dimension_numbers = #tpu.dot_dimension_numbers<[1], [0], [0], [1], [0, 0, 1, 1], [], []>} : vector<4x32xf32>, vector<32x4xf32>, vector<4x4xf32> -> vector<4x4xf32>
    %c0_15 = arith.constant 0 : index
    %c0_16 = arith.constant 0 : index
    %17 = vector.load %arg12[%c0_15, %c0_16] : memref<1x4xf32, #tpu.memory_space<vmem>>, vector<1x4xf32>
    %18 = vector.broadcast %17 : vector<1x4xf32> to vector<4x4xf32>
    %19 = arith.addf %16, %18 : vector<4x4xf32>
    %20 = vector.extract_strided_slice %19 {offsets = [0, 0], sizes = [4, 2], strides = [1, 1]} : vector<4x4xf32> to vector<4x2xf32>
    %21 = vector.extract_strided_slice %19 {offsets = [0, 2], sizes = [4, 2], strides = [1, 1]} : vector<4x4xf32> to vector<4x2xf32>
    %cst_17 = arith.constant -2.000000e+01 : f32
    %cst_18 = arith.constant 2.000000e+00 : f32
    %22 = vector.broadcast %cst_17 : f32 to vector<4x2xf32>
    %23 = arith.maximumf %22, %21 : vector<4x2xf32>
    %24 = vector.broadcast %cst_18 : f32 to vector<4x2xf32>
    %25 = arith.minimumf %24, %23 : vector<4x2xf32>
    %26 = math.exp %25 : vector<4x2xf32>
    %c0_19 = arith.constant 0 : index
    %c0_20 = arith.constant 0 : index
    %27 = vector.load %arg2[%c0_19, %c0_20] : memref<4x2xf32, #tpu.memory_space<vmem>>, vector<4x2xf32>
    %28 = arith.mulf %26, %27 : vector<4x2xf32>
    %29 = arith.addf %20, %28 : vector<4x2xf32>
    %30 = math.tanh %29 : vector<4x2xf32>
    %c0_21 = arith.constant 0 : index
    %c0_22 = arith.constant 0 : index
    %31 = vector.load %arg5[%c0_21, %c0_22] : memref<1x2xf32, #tpu.memory_space<vmem>>, vector<1x2xf32>
    %c0_23 = arith.constant 0 : index
    %c0_24 = arith.constant 0 : index
    %32 = vector.load %arg6[%c0_23, %c0_24] : memref<1x2xf32, #tpu.memory_space<vmem>>, vector<1x2xf32>
    %33 = vector.broadcast %31 : vector<1x2xf32> to vector<4x2xf32>
    %34 = arith.mulf %30, %33 : vector<4x2xf32>
    %35 = vector.broadcast %32 : vector<1x2xf32> to vector<4x2xf32>
    %36 = arith.addf %34, %35 : vector<4x2xf32>
    %cst_25 = arith.constant -5.000000e-01 : f32
    %37 = vector.broadcast %cst_25 : f32 to vector<4x2xf32>
    %38 = arith.mulf %37, %27 : vector<4x2xf32>
    %39 = arith.mulf %38, %27 : vector<4x2xf32>
    %40 = arith.subf %39, %25 : vector<4x2xf32>
    %cst_26 = arith.constant 6.28318548 : f32
    %41 = math.log %cst_26 : f32
    %cst_27 = arith.constant 5.000000e-01 : f32
    %42 = arith.mulf %cst_27, %41 : f32
    %43 = vector.broadcast %42 : f32 to vector<4x2xf32>
    %44 = arith.subf %40, %43 : vector<4x2xf32>
    %45 = arith.mulf %30, %30 : vector<4x2xf32>
    %cst_28 = arith.constant 1.000000e+00 : f32
    %46 = vector.broadcast %cst_28 : f32 to vector<4x2xf32>
    %47 = arith.subf %46, %45 : vector<4x2xf32>
    %48 = vector.broadcast %31 : vector<1x2xf32> to vector<4x2xf32>
    %49 = arith.mulf %48, %47 : vector<4x2xf32>
    %cst_29 = arith.constant 9.99999997E-7 : f32
    %50 = vector.broadcast %cst_29 : f32 to vector<4x2xf32>
    %51 = arith.addf %49, %50 : vector<4x2xf32>
    %52 = math.log %51 : vector<4x2xf32>
    %53 = arith.subf %44, %52 : vector<4x2xf32>
    %cst_30 = arith.constant dense<0.000000e+00> : vector<4xf32>
    %54 = vector.multi_reduction <add>, %53, %cst_30 [1] : vector<4x2xf32> to vector<4xf32>
    %55 = vector.shape_cast %54 : vector<4xf32> to vector<4x1xf32>
    %56 = vector.extract_strided_slice %36 {offsets = [0, 0], sizes = [2, 2], strides = [1, 1]} : vector<4x2xf32> to vector<2x2xf32>
    %57 = vector.extract_strided_slice %55 {offsets = [0, 0], sizes = [2, 1], strides = [1, 1]} : vector<4x1xf32> to vector<2x1xf32>
    %58 = vector.extract_strided_slice %36 {offsets = [2, 0], sizes = [2, 2], strides = [1, 1]} : vector<4x2xf32> to vector<2x2xf32>
    %59 = vector.extract_strided_slice %55 {offsets = [2, 0], sizes = [2, 1], strides = [1, 1]} : vector<4x1xf32> to vector<2x1xf32>
    %60 = vector.extract_strided_slice %0 {offsets = [0, 0], sizes = [2, 512], strides = [1, 1]} : vector<4x512xf32> to vector<2x512xf32>
    %61 = vector.extract_strided_slice %0 {offsets = [2, 0], sizes = [2, 512], strides = [1, 1]} : vector<4x512xf32> to vector<2x512xf32>
    %c0_31 = arith.constant 0 : index
    %c0_32 = arith.constant 0 : index
    %62 = vector.load %arg13[%c0_31, %c0_32] : memref<512x128xf32, #tpu.memory_space<vmem>>, vector<512x128xf32>
    %c0_33 = arith.constant 0 : index
    %c0_34 = arith.constant 0 : index
    %63 = vector.load %arg14[%c0_33, %c0_34] : memref<2x128xf32, #tpu.memory_space<vmem>>, vector<2x128xf32>
    %c0_35 = arith.constant 0 : index
    %c0_36 = arith.constant 0 : index
    %64 = vector.load %arg15[%c0_35, %c0_36] : memref<1x128xf32, #tpu.memory_space<vmem>>, vector<1x128xf32>
    %c0_37 = arith.constant 0 : index
    %c0_38 = arith.constant 0 : index
    %65 = vector.load %arg16[%c0_37, %c0_38] : memref<128x128xf32, #tpu.memory_space<vmem>>, vector<128x128xf32>
    %c0_39 = arith.constant 0 : index
    %c0_40 = arith.constant 0 : index
    %66 = vector.load %arg17[%c0_39, %c0_40] : memref<1x128xf32, #tpu.memory_space<vmem>>, vector<1x128xf32>
    %c0_41 = arith.constant 0 : index
    %c0_42 = arith.constant 0 : index
    %67 = vector.load %arg18[%c0_41, %c0_42] : memref<128x4xf32, #tpu.memory_space<vmem>>, vector<128x4xf32>
    %c0_43 = arith.constant 0 : index
    %c0_44 = arith.constant 0 : index
    %68 = vector.load %arg19[%c0_43, %c0_44] : memref<1x4xf32, #tpu.memory_space<vmem>>, vector<1x4xf32>
    %c0_45 = arith.constant 0 : index
    %c0_46 = arith.constant 0 : index
    %69 = vector.load %arg1[%c0_45, %c0_46] : memref<2x2xf32, #tpu.memory_space<vmem>>, vector<2x2xf32>
    %cst_47 = arith.constant dense<0.000000e+00> : vector<2x128xf32>
    %70 = tpu.matmul %60, %62, %cst_47 {dimension_numbers = #tpu.dot_dimension_numbers<[1], [0], [0], [1], [0, 0, 1, 1], [], []>} : vector<2x512xf32>, vector<512x128xf32>, vector<2x128xf32> -> vector<2x128xf32>
    %cst_48 = arith.constant dense<0.000000e+00> : vector<2x128xf32>
    %71 = tpu.matmul %69, %63, %cst_48 {dimension_numbers = #tpu.dot_dimension_numbers<[1], [0], [0], [1], [0, 0, 1, 1], [], []>} : vector<2x2xf32>, vector<2x128xf32>, vector<2x128xf32> -> vector<2x128xf32>
    %72 = arith.addf %70, %71 : vector<2x128xf32>
    %73 = vector.broadcast %64 : vector<1x128xf32> to vector<2x128xf32>
    %74 = arith.addf %72, %73 : vector<2x128xf32>
    %cst_49 = arith.constant 0.000000e+00 : f32
    %75 = vector.broadcast %cst_49 : f32 to vector<2x128xf32>
    %76 = arith.maximumf %74, %75 : vector<2x128xf32>
    %cst_50 = arith.constant dense<0.000000e+00> : vector<2x128xf32>
    %77 = tpu.matmul %76, %65, %cst_50 {dimension_numbers = #tpu.dot_dimension_numbers<[1], [0], [0], [1], [0, 0, 1, 1], [], []>} : vector<2x128xf32>, vector<128x128xf32>, vector<2x128xf32> -> vector<2x128xf32>
    %78 = vector.broadcast %66 : vector<1x128xf32> to vector<2x128xf32>
    %79 = arith.addf %77, %78 : vector<2x128xf32>
    %cst_51 = arith.constant 0.000000e+00 : f32
    %80 = vector.broadcast %cst_51 : f32 to vector<2x128xf32>
    %81 = arith.maximumf %79, %80 : vector<2x128xf32>
    %cst_52 = arith.constant dense<0.000000e+00> : vector<2x4xf32>
    %82 = tpu.matmul %81, %67, %cst_52 {dimension_numbers = #tpu.dot_dimension_numbers<[1], [0], [0], [1], [0, 0, 1, 1], [], []>} : vector<2x128xf32>, vector<128x4xf32>, vector<2x4xf32> -> vector<2x4xf32>
    %83 = vector.broadcast %68 : vector<1x4xf32> to vector<2x4xf32>
    %84 = arith.addf %82, %83 : vector<2x4xf32>
    %cst_53 = arith.constant dense<0.000000e+00> : vector<2x128xf32>
    %85 = tpu.matmul %60, %62, %cst_53 {dimension_numbers = #tpu.dot_dimension_numbers<[1], [0], [0], [1], [0, 0, 1, 1], [], []>} : vector<2x512xf32>, vector<512x128xf32>, vector<2x128xf32> -> vector<2x128xf32>
    %cst_54 = arith.constant dense<0.000000e+00> : vector<2x128xf32>
    %86 = tpu.matmul %56, %63, %cst_54 {dimension_numbers = #tpu.dot_dimension_numbers<[1], [0], [0], [1], [0, 0, 1, 1], [], []>} : vector<2x2xf32>, vector<2x128xf32>, vector<2x128xf32> -> vector<2x128xf32>
    %87 = arith.addf %85, %86 : vector<2x128xf32>
    %88 = vector.broadcast %64 : vector<1x128xf32> to vector<2x128xf32>
    %89 = arith.addf %87, %88 : vector<2x128xf32>
    %cst_55 = arith.constant 0.000000e+00 : f32
    %90 = vector.broadcast %cst_55 : f32 to vector<2x128xf32>
    %91 = arith.maximumf %89, %90 : vector<2x128xf32>
    %cst_56 = arith.constant dense<0.000000e+00> : vector<2x128xf32>
    %92 = tpu.matmul %91, %65, %cst_56 {dimension_numbers = #tpu.dot_dimension_numbers<[1], [0], [0], [1], [0, 0, 1, 1], [], []>} : vector<2x128xf32>, vector<128x128xf32>, vector<2x128xf32> -> vector<2x128xf32>
    %93 = vector.broadcast %66 : vector<1x128xf32> to vector<2x128xf32>
    %94 = arith.addf %92, %93 : vector<2x128xf32>
    %cst_57 = arith.constant 0.000000e+00 : f32
    %95 = vector.broadcast %cst_57 : f32 to vector<2x128xf32>
    %96 = arith.maximumf %94, %95 : vector<2x128xf32>
    %cst_58 = arith.constant dense<0.000000e+00> : vector<2x4xf32>
    %97 = tpu.matmul %96, %67, %cst_58 {dimension_numbers = #tpu.dot_dimension_numbers<[1], [0], [0], [1], [0, 0, 1, 1], [], []>} : vector<2x128xf32>, vector<128x4xf32>, vector<2x4xf32> -> vector<2x4xf32>
    %98 = vector.broadcast %68 : vector<1x4xf32> to vector<2x4xf32>
    %99 = arith.addf %97, %98 : vector<2x4xf32>
    %cst_59 = arith.constant dense<0.000000e+00> : vector<2x128xf32>
    %100 = tpu.matmul %61, %62, %cst_59 {dimension_numbers = #tpu.dot_dimension_numbers<[1], [0], [0], [1], [0, 0, 1, 1], [], []>} : vector<2x512xf32>, vector<512x128xf32>, vector<2x128xf32> -> vector<2x128xf32>
    %cst_60 = arith.constant dense<0.000000e+00> : vector<2x128xf32>
    %101 = tpu.matmul %58, %63, %cst_60 {dimension_numbers = #tpu.dot_dimension_numbers<[1], [0], [0], [1], [0, 0, 1, 1], [], []>} : vector<2x2xf32>, vector<2x128xf32>, vector<2x128xf32> -> vector<2x128xf32>
    %102 = arith.addf %100, %101 : vector<2x128xf32>
    %103 = vector.broadcast %64 : vector<1x128xf32> to vector<2x128xf32>
    %104 = arith.addf %102, %103 : vector<2x128xf32>
    %cst_61 = arith.constant 0.000000e+00 : f32
    %105 = vector.broadcast %cst_61 : f32 to vector<2x128xf32>
    %106 = arith.maximumf %104, %105 : vector<2x128xf32>
    %cst_62 = arith.constant dense<0.000000e+00> : vector<2x128xf32>
    %107 = tpu.matmul %106, %65, %cst_62 {dimension_numbers = #tpu.dot_dimension_numbers<[1], [0], [0], [1], [0, 0, 1, 1], [], []>} : vector<2x128xf32>, vector<128x128xf32>, vector<2x128xf32> -> vector<2x128xf32>
    %108 = vector.broadcast %66 : vector<1x128xf32> to vector<2x128xf32>
    %109 = arith.addf %107, %108 : vector<2x128xf32>
    %cst_63 = arith.constant 0.000000e+00 : f32
    %110 = vector.broadcast %cst_63 : f32 to vector<2x128xf32>
    %111 = arith.maximumf %109, %110 : vector<2x128xf32>
    %cst_64 = arith.constant dense<0.000000e+00> : vector<2x4xf32>
    %112 = tpu.matmul %111, %67, %cst_64 {dimension_numbers = #tpu.dot_dimension_numbers<[1], [0], [0], [1], [0, 0, 1, 1], [], []>} : vector<2x128xf32>, vector<128x4xf32>, vector<2x4xf32> -> vector<2x4xf32>
    %113 = vector.broadcast %68 : vector<1x4xf32> to vector<2x4xf32>
    %114 = arith.addf %112, %113 : vector<2x4xf32>
    %115 = vector.extract_strided_slice %84 {offsets = [0, 0], sizes = [2, 1], strides = [1, 1]} : vector<2x4xf32> to vector<2x1xf32>
    %116 = vector.extract_strided_slice %84 {offsets = [0, 1], sizes = [2, 1], strides = [1, 1]} : vector<2x4xf32> to vector<2x1xf32>
    %117 = vector.extract_strided_slice %99 {offsets = [0, 0], sizes = [2, 1], strides = [1, 1]} : vector<2x4xf32> to vector<2x1xf32>
    %118 = vector.extract_strided_slice %99 {offsets = [0, 1], sizes = [2, 1], strides = [1, 1]} : vector<2x4xf32> to vector<2x1xf32>
    %119 = vector.extract_strided_slice %114 {offsets = [0, 2], sizes = [2, 1], strides = [1, 1]} : vector<2x4xf32> to vector<2x1xf32>
    %120 = vector.extract_strided_slice %114 {offsets = [0, 3], sizes = [2, 1], strides = [1, 1]} : vector<2x4xf32> to vector<2x1xf32>
    %121 = arith.minimumf %119, %120 : vector<2x1xf32>
    %cst_65 = arith.constant 2.000000e-01 : f32
    %122 = vector.broadcast %cst_65 : f32 to vector<2x1xf32>
    %123 = arith.mulf %122, %59 : vector<2x1xf32>
    %124 = arith.subf %121, %123 : vector<2x1xf32>
    %c0_66 = arith.constant 0 : index
    %c0_67 = arith.constant 0 : index
    %125 = vector.load %arg3[%c0_66, %c0_67] : memref<2x1xf32, #tpu.memory_space<vmem>>, vector<2x1xf32>
    %c0_68 = arith.constant 0 : index
    %c0_69 = arith.constant 0 : index
    %126 = vector.load %arg4[%c0_68, %c0_69] : memref<2x1xf32, #tpu.memory_space<vmem>>, vector<2x1xf32>
    %cst_70 = arith.constant 9.900000e-01 : f32
    %127 = vector.broadcast %cst_70 : f32 to vector<2x1xf32>
    %128 = arith.mulf %126, %127 : vector<2x1xf32>
    %129 = arith.mulf %128, %124 : vector<2x1xf32>
    %130 = arith.addf %125, %129 : vector<2x1xf32>
    %131 = arith.subf %115, %130 : vector<2x1xf32>
    %132 = arith.subf %116, %130 : vector<2x1xf32>
    %133 = arith.minimumf %117, %118 : vector<2x1xf32>
    %134 = arith.mulf %131, %131 : vector<2x1xf32>
    %cst_71 = arith.constant dense<0.000000e+00> : vector<1xf32>
    %135 = vector.multi_reduction <add>, %134, %cst_71 [0] : vector<2x1xf32> to vector<1xf32>
    %136 = vector.shape_cast %135 : vector<1xf32> to vector<1x1xf32>
    %cst_72 = arith.constant 5.000000e+01 : f32
    %137 = vector.broadcast %cst_72 : f32 to vector<1x1xf32>
    %138 = arith.mulf %136, %137 : vector<1x1xf32>
    %c0_73 = arith.constant 0 : index
    %c0_74 = arith.constant 0 : index
    %139 = vector.load %arg20[%c0_73, %c0_74] : memref<1x4xf32, #tpu.memory_space<vmem>>, vector<1x1xf32>
    tpu.vector_store %arg20[%c0_73, %c0_74], %138 {strides = array<i32>} : memref<1x4xf32, #tpu.memory_space<vmem>>, vector<1x1xf32>,
    %140 = arith.mulf %132, %132 : vector<2x1xf32>
    %cst_75 = arith.constant dense<0.000000e+00> : vector<1xf32>
    %141 = vector.multi_reduction <add>, %140, %cst_75 [0] : vector<2x1xf32> to vector<1xf32>
    %142 = vector.shape_cast %141 : vector<1xf32> to vector<1x1xf32>
    %cst_76 = arith.constant 5.000000e+01 : f32
    %143 = vector.broadcast %cst_76 : f32 to vector<1x1xf32>
    %144 = arith.mulf %142, %143 : vector<1x1xf32>
    %c0_77 = arith.constant 0 : index
    %c1 = arith.constant 1 : index
    %145 = vector.load %arg20[%c0_77, %c1] : memref<1x4xf32, #tpu.memory_space<vmem>>, vector<1x1xf32>
    tpu.vector_store %arg20[%c0_77, %c1], %144 {strides = array<i32>} : memref<1x4xf32, #tpu.memory_space<vmem>>, vector<1x1xf32>,
    %cst_78 = arith.constant 2.000000e-01 : f32
    %146 = vector.broadcast %cst_78 : f32 to vector<2x1xf32>
    %147 = arith.mulf %146, %57 : vector<2x1xf32>
    %148 = arith.subf %147, %133 : vector<2x1xf32>
    %cst_79 = arith.constant dense<0.000000e+00> : vector<1xf32>
    %149 = vector.multi_reduction <add>, %148, %cst_79 [0] : vector<2x1xf32> to vector<1xf32>
    %150 = vector.shape_cast %149 : vector<1xf32> to vector<1x1xf32>
    %cst_80 = arith.constant 5.000000e+01 : f32
    %151 = vector.broadcast %cst_80 : f32 to vector<1x1xf32>
    %152 = arith.mulf %150, %151 : vector<1x1xf32>
    %c0_81 = arith.constant 0 : index
    %c2 = arith.constant 2 : index
    %153 = vector.load %arg20[%c0_81, %c2] : memref<1x4xf32, #tpu.memory_space<vmem>>, vector<1x1xf32>
    tpu.vector_store %arg20[%c0_81, %c2], %152 {strides = array<i32>} : memref<1x4xf32, #tpu.memory_space<vmem>>, vector<1x1xf32>,
    %cst_82 = arith.constant -2.000000e+00 : f32
    %154 = vector.broadcast %cst_82 : f32 to vector<2x1xf32>
    %155 = arith.addf %57, %154 : vector<2x1xf32>
    %cst_83 = arith.constant 0.000000e+00 : f32
    %156 = vector.broadcast %cst_83 : f32 to vector<2x1xf32>
    %157 = arith.mulf %156, %155 : vector<2x1xf32>
    %cst_84 = arith.constant dense<0.000000e+00> : vector<1xf32>
    %158 = vector.multi_reduction <add>, %157, %cst_84 [0] : vector<2x1xf32> to vector<1xf32>
    %159 = vector.shape_cast %158 : vector<1xf32> to vector<1x1xf32>
    %cst_85 = arith.constant 0.000000e+00 : f32
    %160 = vector.broadcast %cst_85 : f32 to vector<1x1xf32>
    %161 = arith.subf %160, %159 : vector<1x1xf32>
    %cst_86 = arith.constant 5.000000e-01 : f32
    %162 = vector.broadcast %cst_86 : f32 to vector<1x1xf32>
    %163 = arith.mulf %161, %162 : vector<1x1xf32>
    %c0_87 = arith.constant 0 : index
    %c3 = arith.constant 3 : index
    %164 = vector.load %arg20[%c0_87, %c3] : memref<1x4xf32, #tpu.memory_space<vmem>>, vector<1x1xf32>
    tpu.vector_store %arg20[%c0_87, %c3], %163 {strides = array<i32>} : memref<1x4xf32, #tpu.memory_space<vmem>>, vector<1x1xf32>,
    return
  }
}

</mosaic_0001>

<bundles_post_ra>
// kernel: forward.2
= control target key start
LH: loop header
LB: loop body
LE: loop exit
PB: predicated region body
PF: predicated region fallthrough
CT: control target
= control target key end

     0   :  { %vm545_vm0 = vcmask 1043456   ;;  %vm160_vm1 = vcmask 687104   ;;  %vm1478_vm2 = vcmask 64512   ;;  %s3290_s1 = inlined_call_operand.vmem [shape: f32[84,8], index: 1, kind: input, shape index: {}]   ;;  %s3291_s0 = inlined_call_operand.vmem [shape: f32[1024,84], index: 0, kind: input, shape index: {}]   ;;  %s3292_s2 = inlined_call_operand.vmem [shape: f32[1,8], index: 2, kind: input, shape index: {}]   ;;  %s3293_s3 = inlined_call_operand.vmem [shape: f32[256,8], index: 3, kind: output, shape index: {}]  }
   0x1   :  { %v152_v0 = vld [vmem:[%s3290_s1 + $0x50] sm:$0xf]  ;;  %v151_v1 = vld [vmem:[%s3290_s1 + $0x48] sm:$0xff]  ;;  %v150_v2 = vld [vmem:[%s3290_s1 + $0x40] sm:$0xff] }
   0x2   :  { %1784 = vmatprep.subr.msk.mxu0 %vm545_vm0, %v152_v0  ;;  %1998 = vmatprep.subr.msk.mxu1 %vm545_vm0, %v152_v0  ;;  %v149_v3 = vld [vmem:[%s3290_s1 + $0x38] sm:$0xff]  ;;  %v148_v4 = vld [vmem:[%s3290_s1 + $0x30] sm:$0xff]  ;;  %v147_v5 = vld [vmem:[%s3290_s1 + $0x28] sm:$0xff] }
   0x3   :  { %1785 = vmatpush3.msk.msra.mxu0 %vm545_vm0, %v152_v0  ;;  %2009 = vmatpush3.msk.msra.mxu1 %vm545_vm0, %v152_v0  ;;  %v146_v6 = vld [vmem:[%s3290_s1 + $0x20] sm:$0xff]  ;;  %v145_v7 = vld [vmem:[%s3290_s1 + $0x18] sm:$0xff]  ;;  %v144_v8 = vld [vmem:[%s3290_s1 + $0x10] sm:$0xff] }
   0x4   :  { %1786 = vmatprep.subr.mxu0 %v151_v1  ;;  %1999 = vmatprep.subr.mxu1 %v151_v1  ;;  %v143_v9 = vld [vmem:[%s3290_s1 + $0x8] sm:$0xff]  ;;  %v142_v10 = vld [vmem:[%s3290_s1] sm:$0xff]  ;;  %v16_v15 = vld [vmem:[%s3291_s0 + $0x10] sm:$0xff] }
   0x5   :  { %1787 = vmatpush3.msra.mxu0 %v151_v1  ;;  %2010 = vmatpush3.msra.mxu1 %v151_v1  ;;  %v14_v11 = vld [vmem:[%s3291_s0] sm:$0xff]  ;;  %v15_v13 = vld [vmem:[%s3291_s0 + $0x8] sm:$0xff]  ;;  %v80_v16 = vld [vmem:[%s3291_s0 + $0x210] sm:$0xff] }
   0x6   :  { %1788 = vmatprep.subr.mxu0 %v150_v2  ;;  %2000 = vmatprep.subr.mxu1 %v150_v2  ;;  %v78_v12 = vld [vmem:[%s3291_s0 + $0x200] sm:$0xff]  ;;  %v79_v14 = vld [vmem:[%s3291_s0 + $0x208] sm:$0xff]  ;;  %v17_v17 = vld [vmem:[%s3291_s0 + $0x18] sm:$0xff] }
   0x7   :  { %1789 = vmatpush3.msra.mxu0 %v150_v2  ;;  %2011 = vmatpush3.msra.mxu1 %v150_v2  ;;  %v81_v18 = vld [vmem:[%s3291_s0 + $0x218] sm:$0xff]  ;;  %v18_v19 = vld [vmem:[%s3291_s0 + $0x20] sm:$0xff]  ;;  %v19_v21 = vld [vmem:[%s3291_s0 + $0x28] sm:$0xff] }
   0x8   :  { %1790 = vmatprep.subr.mxu0 %v149_v3  ;;  %2001 = vmatprep.subr.mxu1 %v149_v3  ;;  %v82_v20 = vld [vmem:[%s3291_s0 + $0x220] sm:$0xff]  ;;  %v83_v22 = vld [vmem:[%s3291_s0 + $0x228] sm:$0xff]  ;;  %v20_v23 = vld [vmem:[%s3291_s0 + $0x30] sm:$0xff] }
   0x9   :  { %1791 = vmatpush3.msra.mxu0 %v149_v3  ;;  %2012 = vmatpush3.msra.mxu1 %v149_v3  ;;  %v84_v24 = vld [vmem:[%s3291_s0 + $0x230] sm:$0xff]  ;;  %v21_v25 = vld [vmem:[%s3291_s0 + $0x38] sm:$0xff]  ;;  %v22_v27 = vld [vmem:[%s3291_s0 + $0x40] sm:$0xff] }
   0xa   :  { %1792 = vmatprep.subr.mxu0 %v148_v4  ;;  %2002 = vmatprep.subr.mxu1 %v148_v4  ;;  %v85_v26 = vld [vmem:[%s3291_s0 + $0x238] sm:$0xff]  ;;  %v86_v28 = vld [vmem:[%s3291_s0 + $0x240] sm:$0xff]  ;;  %v23_v29 = vld [vmem:[%s3291_s0 + $0x48] sm:$0xff] }
   0xb   :  { %1793 = vmatpush3.msra.mxu0 %v148_v4  ;;  %2013 = vmatpush3.msra.mxu1 %v148_v4  ;;  %v87_v30 = vld [vmem:[%s3291_s0 + $0x248] sm:$0xff]  ;;  %v24_v31 = vld [vmem:[%s3291_s0 + $0x50] sm:$0xff]  ;;  %v25_v33 = vld [vmem:[%s3291_s0 + $0x58] sm:$0xff] }
   0xc   :  { %1794 = vmatprep.subr.mxu0 %v147_v5  ;;  %2003 = vmatprep.subr.mxu1 %v147_v5  ;;  %v88_v32 = vld [vmem:[%s3291_s0 + $0x250] sm:$0xff]  ;;  %v89_v34 = vld [vmem:[%s3291_s0 + $0x258] sm:$0xff]  ;;  %v26_v35 = vld [vmem:[%s3291_s0 + $0x60] sm:$0xff] }
   0xd   :  { %1795 = vmatpush3.msra.mxu0 %v147_v5  ;;  %2014 = vmatpush3.msra.mxu1 %v147_v5  ;;  %v90_v36 = vld [vmem:[%s3291_s0 + $0x260] sm:$0xff]  ;;  %v27_v37 = vld [vmem:[%s3291_s0 + $0x68] sm:$0xff]  ;;  %v28_v39 = vld [vmem:[%s3291_s0 + $0x70] sm:$0xff] }
   0xe   :  { %1796 = vmatprep.subr.mxu0 %v146_v6  ;;  %2004 = vmatprep.subr.mxu1 %v146_v6  ;;  %v91_v38 = vld [vmem:[%s3291_s0 + $0x268] sm:$0xff]  ;;  %v92_v40 = vld [vmem:[%s3291_s0 + $0x270] sm:$0xff]  ;;  %v29_v41 = vld [vmem:[%s3291_s0 + $0x78] sm:$0xff] }
   0xf   :  { %1797 = vmatpush3.msra.mxu0 %v146_v6  ;;  %2015 = vmatpush3.msra.mxu1 %v146_v6  ;;  %v93_v42 = vld [vmem:[%s3291_s0 + $0x278] sm:$0xff]  ;;  %v30_v43 = vld [vmem:[%s3291_s0 + $0x80] sm:$0xff]  ;;  %v31_v45 = vld [vmem:[%s3291_s0 + $0x88] sm:$0xff] }
  0x10   :  { %1798 = vmatprep.subr.mxu0 %v145_v7  ;;  %2005 = vmatprep.subr.mxu1 %v145_v7  ;;  %v94_v44 = vld [vmem:[%s3291_s0 + $0x280] sm:$0xff]  ;;  %v95_v46 = vld [vmem:[%s3291_s0 + $0x288] sm:$0xff]  ;;  %v32_v47 = vld [vmem:[%s3291_s0 + $0x90] sm:$0xff] }
  0x11   :  { %1799 = vmatpush3.msra.mxu0 %v145_v7  ;;  %2016 = vmatpush3.msra.mxu1 %v145_v7  ;;  %v96_v48 = vld [vmem:[%s3291_s0 + $0x290] sm:$0xff]  ;;  %v33_v49 = vld [vmem:[%s3291_s0 + $0x98] sm:$0xff]  ;;  %v34_v51 = vld [vmem:[%s3291_s0 + $0xa0] sm:$0xff] }
  0x12   :  { %1800 = vmatprep.subr.mxu0 %v144_v8  ;;  %2006 = vmatprep.subr.mxu1 %v144_v8  ;;  %v97_v50 = vld [vmem:[%s3291_s0 + $0x298] sm:$0xff]  ;;  %v98_v52 = vld [vmem:[%s3291_s0 + $0x2a0] sm:$0xff]  ;;  %v35_v53 = vld [vmem:[%s3291_s0 + $0xa8] sm:$0xff] }
  0x13   :  { %1801 = vmatpush3.msra.mxu0 %v144_v8  ;;  %2017 = vmatpush3.msra.mxu1 %v144_v8  ;;  %v99_v54 = vld [vmem:[%s3291_s0 + $0x2a8] sm:$0xff]  ;;  %v36_v55 = vld [vmem:[%s3291_s0 + $0xb0] sm:$0xff]  ;;  %v37_v57 = vld [vmem:[%s3291_s0 + $0xb8] sm:$0xff] }
  0x14   :  { %1802 = vmatprep.subr.mxu0 %v143_v9  ;;  %2007 = vmatprep.subr.mxu1 %v143_v9  ;;  %v100_v56 = vld [vmem:[%s3291_s0 + $0x2b0] sm:$0xff]  ;;  %v101_v58 = vld [vmem:[%s3291_s0 + $0x2b8] sm:$0xff]  ;;  %v38_v59 = vld [vmem:[%s3291_s0 + $0xc0] sm:$0xff] }
  0x15   :  { %1803 = vmatpush3.msra.mxu0 %v143_v9  ;;  %2018 = vmatpush3.msra.mxu1 %v143_v9  ;;  %v102_v60 = vld [vmem:[%s3291_s0 + $0x2c0] sm:$0xff]  ;;  %v39_v61 = vld [vmem:[%s3291_s0 + $0xc8] sm:$0xff]  ;;  %v40_v63 = vld [vmem:[%s3291_s0 + $0xd0] sm:$0xff] }
  0x16   :  { %1804 = vmatprep.subr.mxu0 %v142_v10  ;;  %2008 = vmatprep.subr.mxu1 %v142_v10  ;;  %v103_v62 = vld [vmem:[%s3291_s0 + $0x2c8] sm:$0xff]  ;;  %v104_v0 = vld [vmem:[%s3291_s0 + $0x2d0] sm:$0xff]  ;;  %v41_v1 = vld [vmem:[%s3291_s0 + $0xd8] sm:$0xff] }
  0x17   :  { %1805 = vmatpush3.msra.mxu0 %v142_v10  ;;  %2019 = vmatpush3.msra.mxu1 %v142_v10  ;;  %v105_v2 = vld [vmem:[%s3291_s0 + $0x2d8] sm:$0xff]  ;;  %v42_v3 = vld [vmem:[%s3291_s0 + $0xe0] sm:$0xff]  ;;  %v43_v5 = vld [vmem:[%s3291_s0 + $0xe8] sm:$0xff] }
  0x18   :  { %1806 = vmatprep.mubr.msk.f32.mxu0 %vm160_vm1, %v14_v11  ;;  %1902 = vmatprep.mubr.msk.f32.mxu1 %vm160_vm1, %v78_v12  ;;  %v106_v4 = vld [vmem:[%s3291_s0 + $0x2e0] sm:$0xff]  ;;  %v107_v6 = vld [vmem:[%s3291_s0 + $0x2e8] sm:$0xff]  ;;  %v44_v7 = vld [vmem:[%s3291_s0 + $0xf0] sm:$0xff] }
  0x19   :  { %1807 = vmatmul.mubr.msk.f32.vlgmr.msra.gmra.mxu0 %vm160_vm1, %v15_v13  ;;  %1903 = vmatmul.mubr.msk.f32.vlgmr.msra.gmra.mxu1 %vm160_vm1, %v79_v14  ;;  %v108_v8 = vld [vmem:[%s3291_s0 + $0x2f0] sm:$0xff]  ;;  %v45_v9 = vld [vmem:[%s3291_s0 + $0xf8] sm:$0xff]  ;;  %v46_v11 = vld [vmem:[%s3291_s0 + $0x100] sm:$0xff] }
  0x1a   :  { %1809 = vmatprep.mubr.msk.f32.mxu0 %vm160_vm1, %v16_v15  ;;  %1905 = vmatprep.mubr.msk.f32.mxu1 %vm160_vm1, %v80_v16  ;;  %v109_v10 = vld [vmem:[%s3291_s0 + $0x2f8] sm:$0xff]  ;;  %v110_v12 = vld [vmem:[%s3291_s0 + $0x300] sm:$0xff]  ;;  %v47_v13 = vld [vmem:[%s3291_s0 + $0x108] sm:$0xff] }
  0x1b   :  { %v111_v14 = vld [vmem:[%s3291_s0 + $0x308] sm:$0xff]  ;;  %v48_v15 = vld [vmem:[%s3291_s0 + $0x110] sm:$0xff] }
  0x1c   :  { %v112_v16 = vld [vmem:[%s3291_s0 + $0x310] sm:$0xff] }
  0x1d   :  { %1810 = vmatmul.mubr.msk.f32.gmra.mxu0 %vm160_vm1, %v17_v17  ;;  %1906 = vmatmul.mubr.msk.f32.gmra.mxu1 %vm160_vm1, %v81_v18  ;;  %v49_v17 = vld [vmem:[%s3291_s0 + $0x118] sm:$0xff] }
  0x1e   :  { %1812 = vmatprep.mubr.msk.f32.mxu0 %vm160_vm1, %v18_v19  ;;  %1908 = vmatprep.mubr.msk.f32.mxu1 %vm160_vm1, %v82_v20  ;;  %v113_v18 = vld [vmem:[%s3291_s0 + $0x318] sm:$0xff]  ;;  %v50_v19 = vld [vmem:[%s3291_s0 + $0x120] sm:$0xff] }
  0x1f   :  { %v114_v20 = vld [vmem:[%s3291_s0 + $0x320] sm:$0xff] }
  0x21   :  { %1813 = vmatmul.mubr.msk.f32.gmra.mxu0 %vm160_vm1, %v19_v21  ;;  %1909 = vmatmul.mubr.msk.f32.gmra.mxu1 %vm160_vm1, %v83_v22  ;;  %v51_v21 = vld [vmem:[%s3291_s0 + $0x128] sm:$0xff] }
  0x22   :  { %1815 = vmatprep.mubr.msk.f32.mxu0 %vm160_vm1, %v20_v23  ;;  %1911 = vmatprep.mubr.msk.f32.mxu1 %vm160_vm1, %v84_v24  ;;  %v115_v22 = vld [vmem:[%s3291_s0 + $0x328] sm:$0xff]  ;;  %v52_v23 = vld [vmem:[%s3291_s0 + $0x130] sm:$0xff] }
  0x23   :  { %v116_v24 = vld [vmem:[%s3291_s0 + $0x330] sm:$0xff] }
  0x25   :  { %1816 = vmatmul.mubr.msk.f32.gmra.mxu0 %vm160_vm1, %v21_v25  ;;  %1912 = vmatmul.mubr.msk.f32.gmra.mxu1 %vm160_vm1, %v85_v26  ;;  %v53_v25 = vld [vmem:[%s3291_s0 + $0x138] sm:$0xff] }
  0x26   :  { %1818 = vmatprep.mubr.msk.f32.mxu0 %vm160_vm1, %v22_v27  ;;  %1914 = vmatprep.mubr.msk.f32.mxu1 %vm160_vm1, %v86_v28  ;;  %v117_v26 = vld [vmem:[%s3291_s0 + $0x338] sm:$0xff]  ;;  %v54_v27 = vld [vmem:[%s3291_s0 + $0x140] sm:$0xff] }
  0x27   :  { %v118_v28 = vld [vmem:[%s3291_s0 + $0x340] sm:$0xff] }
  0x29   :  { %1819 = vmatmul.mubr.msk.f32.gmra.mxu0 %vm160_vm1, %v23_v29  ;;  %1915 = vmatmul.mubr.msk.f32.gmra.mxu1 %vm160_vm1, %v87_v30  ;;  %v55_v29 = vld [vmem:[%s3291_s0 + $0x148] sm:$0xff] }
  0x2a   :  { %1821 = vmatprep.mubr.msk.f32.mxu0 %vm160_vm1, %v24_v31  ;;  %1917 = vmatprep.mubr.msk.f32.mxu1 %vm160_vm1, %v88_v32  ;;  %v119_v30 = vld [vmem:[%s3291_s0 + $0x348] sm:$0xff]  ;;  %v56_v31 = vld [vmem:[%s3291_s0 + $0x150] sm:$0xff] }
  0x2b   :  { %v120_v32 = vld [vmem:[%s3291_s0 + $0x350] sm:$0xff] }
  0x2d   :  { %1822 = vmatmul.mubr.msk.f32.gmra.mxu0 %vm160_vm1, %v25_v33  ;;  %1918 = vmatmul.mubr.msk.f32.gmra.mxu1 %vm160_vm1, %v89_v34  ;;  %v57_v33 = vld [vmem:[%s3291_s0 + $0x158] sm:$0xff] }
  0x2e   :  { %1824 = vmatprep.mubr.msk.f32.mxu0 %vm160_vm1, %v26_v35  ;;  %1920 = vmatprep.mubr.msk.f32.mxu1 %vm160_vm1, %v90_v36  ;;  %v121_v34 = vld [vmem:[%s3291_s0 + $0x358] sm:$0xff]  ;;  %v58_v35 = vld [vmem:[%s3291_s0 + $0x160] sm:$0xff] }
  0x2f   :  { %v122_v36 = vld [vmem:[%s3291_s0 + $0x360] sm:$0xff] }
  0x31   :  { %1825 = vmatmul.mubr.msk.f32.gmra.mxu0 %vm160_vm1, %v27_v37  ;;  %1921 = vmatmul.mubr.msk.f32.gmra.mxu1 %vm160_vm1, %v91_v38  ;;  %v59_v37 = vld [vmem:[%s3291_s0 + $0x168] sm:$0xff] }
  0x32   :  { %1827 = vmatprep.mubr.msk.f32.mxu0 %vm160_vm1, %v28_v39  ;;  %1923 = vmatprep.mubr.msk.f32.mxu1 %vm160_vm1, %v92_v40  ;;  %v123_v38 = vld [vmem:[%s3291_s0 + $0x368] sm:$0xff]  ;;  %v60_v39 = vld [vmem:[%s3291_s0 + $0x170] sm:$0xff] }
  0x33   :  { %v124_v40 = vld [vmem:[%s3291_s0 + $0x370] sm:$0xff] }
  0x35   :  { %1828 = vmatmul.mubr.msk.f32.gmra.mxu0 %vm160_vm1, %v29_v41  ;;  %1924 = vmatmul.mubr.msk.f32.gmra.mxu1 %vm160_vm1, %v93_v42  ;;  %v61_v41 = vld [vmem:[%s3291_s0 + $0x178] sm:$0xff] }
  0x36   :  { %1830 = vmatprep.mubr.msk.f32.mxu0 %vm160_vm1, %v30_v43  ;;  %1926 = vmatprep.mubr.msk.f32.mxu1 %vm160_vm1, %v94_v44  ;;  %v125_v42 = vld [vmem:[%s3291_s0 + $0x378] sm:$0xff]  ;;  %v62_v43 = vld [vmem:[%s3291_s0 + $0x180] sm:$0xff] }
  0x37   :  { %v126_v44 = vld [vmem:[%s3291_s0 + $0x380] sm:$0xff] }
  0x39   :  { %1831 = vmatmul.mubr.msk.f32.gmra.mxu0 %vm160_vm1, %v31_v45  ;;  %1927 = vmatmul.mubr.msk.f32.gmra.mxu1 %vm160_vm1, %v95_v46  ;;  %v63_v45 = vld [vmem:[%s3291_s0 + $0x188] sm:$0xff] }
  0x3a   :  { %1833 = vmatprep.mubr.msk.f32.mxu0 %vm160_vm1, %v32_v47  ;;  %1929 = vmatprep.mubr.msk.f32.mxu1 %vm160_vm1, %v96_v48  ;;  %v127_v46 = vld [vmem:[%s3291_s0 + $0x388] sm:$0xff]  ;;  %v64_v47 = vld [vmem:[%s3291_s0 + $0x190] sm:$0xff] }
  0x3b   :  { %v128_v48 = vld [vmem:[%s3291_s0 + $0x390] sm:$0xff] }
  0x3d   :  { %1834 = vmatmul.mubr.msk.f32.gmra.mxu0 %vm160_vm1, %v33_v49  ;;  %1930 = vmatmul.mubr.msk.f32.gmra.mxu1 %vm160_vm1, %v97_v50  ;;  %v65_v49 = vld [vmem:[%s3291_s0 + $0x198] sm:$0xff] }
  0x3e   :  { %1836 = vmatprep.mubr.msk.f32.mxu0 %vm160_vm1, %v34_v51  ;;  %1932 = vmatprep.mubr.msk.f32.mxu1 %vm160_vm1, %v98_v52  ;;  %v129_v50 = vld [vmem:[%s3291_s0 + $0x398] sm:$0xff]  ;;  %v66_v51 = vld [vmem:[%s3291_s0 + $0x1a0] sm:$0xff] }
  0x3f   :  { %v130_v52 = vld [vmem:[%s3291_s0 + $0x3a0] sm:$0xff] }
  0x41   :  { %1837 = vmatmul.mubr.msk.f32.gmra.mxu0 %vm160_vm1, %v35_v53  ;;  %1933 = vmatmul.mubr.msk.f32.gmra.mxu1 %vm160_vm1, %v99_v54  ;;  %v67_v53 = vld [vmem:[%s3291_s0 + $0x1a8] sm:$0xff] }
  0x42   :  { %1839 = vmatprep.mubr.msk.f32.mxu0 %vm160_vm1, %v36_v55  ;;  %1935 = vmatprep.mubr.msk.f32.mxu1 %vm160_vm1, %v100_v56  ;;  %v131_v54 = vld [vmem:[%s3291_s0 + $0x3a8] sm:$0xff]  ;;  %v68_v55 = vld [vmem:[%s3291_s0 + $0x1b0] sm:$0xff] }
  0x43   :  { %v132_v56 = vld [vmem:[%s3291_s0 + $0x3b0] sm:$0xff] }
  0x45   :  { %1840 = vmatmul.mubr.msk.f32.gmra.mxu0 %vm160_vm1, %v37_v57  ;;  %1936 = vmatmul.mubr.msk.f32.gmra.mxu1 %vm160_vm1, %v101_v58  ;;  %v69_v57 = vld [vmem:[%s3291_s0 + $0x1b8] sm:$0xff] }
  0x46   :  { %1842 = vmatprep.mubr.msk.f32.mxu0 %vm160_vm1, %v38_v59  ;;  %1938 = vmatprep.mubr.msk.f32.mxu1 %vm160_vm1, %v102_v60  ;;  %v133_v58 = vld [vmem:[%s3291_s0 + $0x3b8] sm:$0xff]  ;;  %v70_v59 = vld [vmem:[%s3291_s0 + $0x1c0] sm:$0xff] }
  0x47   :  { %v134_v60 = vld [vmem:[%s3291_s0 + $0x3c0] sm:$0xff] }
  0x49   :  { %1843 = vmatmul.mubr.msk.f32.gmra.mxu0 %vm160_vm1, %v39_v61  ;;  %1939 = vmatmul.mubr.msk.f32.gmra.mxu1 %vm160_vm1, %v103_v62  ;;  %v71_v61 = vld [vmem:[%s3291_s0 + $0x1c8] sm:$0xff] }
  0x4a   :  { %1845 = vmatprep.mubr.msk.f32.mxu0 %vm160_vm1, %v40_v63  ;;  %1941 = vmatprep.mubr.msk.f32.mxu1 %vm160_vm1, %v104_v0  ;;  %v135_v62 = vld [vmem:[%s3291_s0 + $0x3c8] sm:$0xff]  ;;  %v72_v63 = vld [vmem:[%s3291_s0 + $0x1d0] sm:$0xff] }
  0x4b   :  { %v136_v0 = vld [vmem:[%s3291_s0 + $0x3d0] sm:$0xff] }
  0x4d   :  { %1846 = vmatmul.mubr.msk.f32.gmra.mxu0 %vm160_vm1, %v41_v1  ;;  %1942 = vmatmul.mubr.msk.f32.gmra.mxu1 %vm160_vm1, %v105_v2  ;;  %v73_v1 = vld [vmem:[%s3291_s0 + $0x1d8] sm:$0xff] }
  0x4e   :  { %1848 = vmatprep.mubr.msk.f32.mxu0 %vm160_vm1, %v42_v3  ;;  %1944 = vmatprep.mubr.msk.f32.mxu1 %vm160_vm1, %v106_v4  ;;  %v137_v2 = vld [vmem:[%s3291_s0 + $0x3d8] sm:$0xff]  ;;  %v74_v3 = vld [vmem:[%s3291_s0 + $0x1e0] sm:$0xff] }
  0x4f   :  { %v138_v4 = vld [vmem:[%s3291_s0 + $0x3e0] sm:$0xff] }
  0x51   :  { %1849 = vmatmul.mubr.msk.f32.gmra.mxu0 %vm160_vm1, %v43_v5  ;;  %1945 = vmatmul.mubr.msk.f32.gmra.mxu1 %vm160_vm1, %v107_v6  ;;  %v75_v5 = vld [vmem:[%s3291_s0 + $0x1e8] sm:$0xff] }
  0x52   :  { %1851 = vmatprep.mubr.msk.f32.mxu0 %vm160_vm1, %v44_v7  ;;  %1947 = vmatprep.mubr.msk.f32.mxu1 %vm160_vm1, %v108_v8  ;;  %v139_v6 = vld [vmem:[%s3291_s0 + $0x3e8] sm:$0xff]  ;;  %v76_v7 = vld [vmem:[%s3291_s0 + $0x1f0] sm:$0xff] }
  0x53   :  { %v140_v8 = vld [vmem:[%s3291_s0 + $0x3f0] sm:$0xff] }
  0x55   :  { %1852 = vmatmul.mubr.msk.f32.gmra.mxu0 %vm160_vm1, %v45_v9  ;;  %1948 = vmatmul.mubr.msk.f32.gmra.mxu1 %vm160_vm1, %v109_v10  ;;  %v77_v9 = vld [vmem:[%s3291_s0 + $0x1f8] sm:$0xff] }
  0x56   :  { %1854 = vmatprep.mubr.msk.f32.mxu0 %vm160_vm1, %v46_v11  ;;  %1950 = vmatprep.mubr.msk.f32.mxu1 %vm160_vm1, %v110_v12  ;;  %v141_v10 = vld [vmem:[%s3291_s0 + $0x3f8] sm:$0xff] }
  0x59   :  { %1855 = vmatmul.mubr.msk.f32.gmra.mxu0 %vm160_vm1, %v47_v13  ;;  %1951 = vmatmul.mubr.msk.f32.gmra.mxu1 %vm160_vm1, %v111_v14 }
  0x5a   :  { %1857 = vmatprep.mubr.msk.f32.mxu0 %vm160_vm1, %v48_v15  ;;  %1953 = vmatprep.mubr.msk.f32.mxu1 %vm160_vm1, %v112_v16 }
  0x5d   :  { %1858 = vmatmul.mubr.msk.f32.gmra.mxu0 %vm160_vm1, %v49_v17  ;;  %1954 = vmatmul.mubr.msk.f32.gmra.mxu1 %vm160_vm1, %v113_v18 }
  0x5e   :  { %1860 = vmatprep.mubr.msk.f32.mxu0 %vm160_vm1, %v50_v19  ;;  %1956 = vmatprep.mubr.msk.f32.mxu1 %vm160_vm1, %v114_v20 }
  0x61   :  { %1861 = vmatmul.mubr.msk.f32.gmra.mxu0 %vm160_vm1, %v51_v21  ;;  %1957 = vmatmul.mubr.msk.f32.gmra.mxu1 %vm160_vm1, %v115_v22 }
  0x62   :  { %1863 = vmatprep.mubr.msk.f32.mxu0 %vm160_vm1, %v52_v23  ;;  %1959 = vmatprep.mubr.msk.f32.mxu1 %vm160_vm1, %v116_v24 }
  0x65   :  { %1864 = vmatmul.mubr.msk.f32.gmra.mxu0 %vm160_vm1, %v53_v25  ;;  %1960 = vmatmul.mubr.msk.f32.gmra.mxu1 %vm160_vm1, %v117_v26 }
  0x66   :  { %1866 = vmatprep.mubr.msk.f32.mxu0 %vm160_vm1, %v54_v27  ;;  %1962 = vmatprep.mubr.msk.f32.mxu1 %vm160_vm1, %v118_v28 }
  0x69   :  { %1867 = vmatmul.mubr.msk.f32.gmra.mxu0 %vm160_vm1, %v55_v29  ;;  %1963 = vmatmul.mubr.msk.f32.gmra.mxu1 %vm160_vm1, %v119_v30 }
  0x6a   :  { %1869 = vmatprep.mubr.msk.f32.mxu0 %vm160_vm1, %v56_v31  ;;  %1965 = vmatprep.mubr.msk.f32.mxu1 %vm160_vm1, %v120_v32 }
  0x6d   :  { %1870 = vmatmul.mubr.msk.f32.gmra.mxu0 %vm160_vm1, %v57_v33  ;;  %1966 = vmatmul.mubr.msk.f32.gmra.mxu1 %vm160_vm1, %v121_v34 }
  0x6e   :  { %1872 = vmatprep.mubr.msk.f32.mxu0 %vm160_vm1, %v58_v35  ;;  %1968 = vmatprep.mubr.msk.f32.mxu1 %vm160_vm1, %v122_v36 }
  0x71   :  { %1873 = vmatmul.mubr.msk.f32.gmra.mxu0 %vm160_vm1, %v59_v37  ;;  %1969 = vmatmul.mubr.msk.f32.gmra.mxu1 %vm160_vm1, %v123_v38 }
  0x72   :  { %1875 = vmatprep.mubr.msk.f32.mxu0 %vm160_vm1, %v60_v39  ;;  %1971 = vmatprep.mubr.msk.f32.mxu1 %vm160_vm1, %v124_v40 }
  0x75   :  { %1876 = vmatmul.mubr.msk.f32.gmra.mxu0 %vm160_vm1, %v61_v41  ;;  %1972 = vmatmul.mubr.msk.f32.gmra.mxu1 %vm160_vm1, %v125_v42 }
  0x76   :  { %1878 = vmatprep.mubr.msk.f32.mxu0 %vm160_vm1, %v62_v43  ;;  %1974 = vmatprep.mubr.msk.f32.mxu1 %vm160_vm1, %v126_v44 }
  0x79   :  { %1879 = vmatmul.mubr.msk.f32.gmra.mxu0 %vm160_vm1, %v63_v45  ;;  %1975 = vmatmul.mubr.msk.f32.gmra.mxu1 %vm160_vm1, %v127_v46 }
  0x7a   :  { %1881 = vmatprep.mubr.msk.f32.mxu0 %vm160_vm1, %v64_v47  ;;  %1977 = vmatprep.mubr.msk.f32.mxu1 %vm160_vm1, %v128_v48 }
  0x7d   :  { %1882 = vmatmul.mubr.msk.f32.gmra.mxu0 %vm160_vm1, %v65_v49  ;;  %1978 = vmatmul.mubr.msk.f32.gmra.mxu1 %vm160_vm1, %v129_v50  ;;  %v2630_v49 = vld [vmem:[%s3292_s2] ss:$0 sm:$0xff] }
  0x7e   :  { %1884 = vmatprep.mubr.msk.f32.mxu0 %vm160_vm1, %v66_v51  ;;  %1980 = vmatprep.mubr.msk.f32.mxu1 %vm160_vm1, %v130_v52 }
  0x81   :  { %1885 = vmatmul.mubr.msk.f32.gmra.mxu0 %vm160_vm1, %v67_v53  ;;  %1981 = vmatmul.mubr.msk.f32.gmra.mxu1 %vm160_vm1, %v131_v54 }
  0x82   :  { %1887 = vmatprep.mubr.msk.f32.mxu0 %vm160_vm1, %v68_v55  ;;  %1983 = vmatprep.mubr.msk.f32.mxu1 %vm160_vm1, %v132_v56 }
  0x85   :  { %1888 = vmatmul.mubr.msk.f32.gmra.mxu0 %vm160_vm1, %v69_v57  ;;  %1984 = vmatmul.mubr.msk.f32.gmra.mxu1 %vm160_vm1, %v133_v58 }
  0x86   :  { %1890 = vmatprep.mubr.msk.f32.mxu0 %vm160_vm1, %v70_v59  ;;  %1986 = vmatprep.mubr.msk.f32.mxu1 %vm160_vm1, %v134_v60 }
  0x89   :  { %1891 = vmatmul.mubr.msk.f32.gmra.mxu0 %vm160_vm1, %v71_v61  ;;  %1987 = vmatmul.mubr.msk.f32.gmra.mxu1 %vm160_vm1, %v135_v62 }
  0x8a   :  { %1893 = vmatprep.mubr.msk.f32.mxu0 %vm160_vm1, %v72_v63  ;;  %1989 = vmatprep.mubr.msk.f32.mxu1 %vm160_vm1, %v136_v0 }
  0x8d   :  { %1894 = vmatmul.mubr.msk.f32.gmra.mxu0 %vm160_vm1, %v73_v1  ;;  %1990 = vmatmul.mubr.msk.f32.gmra.mxu1 %vm160_vm1, %v137_v2 }
  0x8e   :  { %1896 = vmatprep.mubr.msk.f32.mxu0 %vm160_vm1, %v74_v3  ;;  %1992 = vmatprep.mubr.msk.f32.mxu1 %vm160_vm1, %v138_v4 }
  0x91   :  { %1897 = vmatmul.mubr.msk.f32.gmra.mxu0 %vm160_vm1, %v75_v5  ;;  %1993 = vmatmul.mubr.msk.f32.gmra.mxu1 %vm160_vm1, %v139_v6 }
  0x92   :  { %1899 = vmatprep.mubr.msk.f32.mxu0 %vm160_vm1, %v76_v7  ;;  %1995 = vmatprep.mubr.msk.f32.mxu1 %vm160_vm1, %v140_v8 }
  0x95   :  { %1900 = vmatmul.mubr.msk.f32.gmra.mxu0 %vm160_vm1, %v77_v9  ;;  %1996 = vmatmul.mubr.msk.f32.gmra.mxu1 %vm160_vm1, %v141_v10 }
  0xd9   :  { %v1808_v11 = vpop.f32.mrf.mxu0  ;;  %v1904_v12 = vpop.f32.mrf.mxu1 }
  0xda   :  { %v2641_v54 = vadd.f32 %v1808_v11, %v2630_v49  ;;  %v2644_v55 = vadd.f32 %v1904_v12, %v2630_v49 }
  0xdb   :  { %v615_v13 = vpop.f32.mrf.mxu0  ;;  %v935_v14 = vpop.f32.mrf.mxu1 }
  0xdc   :  { %v2651_v58 = vadd.f32 %v2630_v49, %v615_v13  ;;  %v2654_v59 = vadd.f32 %v2630_v49, %v935_v14 }
  0xdd   :  { %v1811_v15 = vpop.f32.mrf.mxu0  ;;  %v1907_v16 = vpop.f32.mrf.mxu1 }
  0xde   :  { %v2657_v60 = vadd.f32 %v1811_v15, %v2630_v49  ;;  %v2660_v61 = vadd.f32 %v1907_v16, %v2630_v49 }
  0xdf   :  { %v625_v17 = vpop.f32.mrf.mxu0  ;;  %v945_v18 = vpop.f32.mrf.mxu1 }
  0xe0   :  { %v2668_v1 = vadd.f32 %v2630_v49, %v625_v17  ;;  %v2671_v2 = vadd.f32 %v2630_v49, %v945_v18 }
  0xe1   :  { %v1814_v19 = vpop.f32.mrf.mxu0  ;;  %v1910_v20 = vpop.f32.mrf.mxu1 }
  0xe2   :  { %v2675_v4 = vadd.f32 %v1814_v19, %v2630_v49  ;;  %v2678_v5 = vadd.f32 %v1910_v20, %v2630_v49 }
  0xe3   :  { %v635_v21 = vpop.f32.mrf.mxu0  ;;  %v955_v22 = vpop.f32.mrf.mxu1 }
  0xe4   :  { %v2681_v6 = vadd.f32 %v2630_v49, %v635_v21  ;;  %v2692_v13 = vadd.f32 %v2630_v49, %v955_v22 }
  0xe5   :  { %v1817_v23 = vpop.f32.mrf.mxu0  ;;  %v1913_v24 = vpop.f32.mrf.mxu1 }
  0xe6   :  { %v2695_v14 = vadd.f32 %v1817_v23, %v2630_v49  ;;  %v2698_v15 = vadd.f32 %v1913_v24, %v2630_v49 }
  0xe7   :  { %v645_v25 = vpop.f32.mrf.mxu0  ;;  %v965_v26 = vpop.f32.mrf.mxu1 }
  0xe8   :  { %v2701_v16 = vadd.f32 %v2630_v49, %v645_v25  ;;  %v2710_v21 = vadd.f32 %v2630_v49, %v965_v26 }
  0xe9   :  { %v1820_v27 = vpop.f32.mrf.mxu0  ;;  %v2585_v28 = vpop.f32.mrf.mxu1 }
  0xea   :  { %v2713_v22 = vadd.f32 %v1820_v27, %v2630_v49  ;;  %v2720_v12 = vadd.f32 %v2585_v28, %v2630_v49 }
  0xeb   :  { %v2587_v29 = vpop.f32.mrf.mxu0  ;;  %v2589_v30 = vpop.f32.mrf.mxu1 }
  0xec   :  { %v2728_v26 = vadd.f32 %v2630_v49, %v2587_v29  ;;  %v2732_v27 = vadd.f32 %v2630_v49, %v2589_v30 }
  0xed   :  { %v2591_v31 = vpop.f32.mrf.mxu0  ;;  %v2593_v32 = vpop.f32.mrf.mxu1 }
  0xee   :  { %v2736_v24 = vadd.f32 %v2591_v31, %v2630_v49  ;;  %v2740_v28 = vadd.f32 %v2593_v32, %v2630_v49 }
  0xef   :  { %v2595_v33 = vpop.f32.mrf.mxu0  ;;  %v2597_v34 = vpop.f32.mrf.mxu1 }
  0xf0   :  { %v2754_v32 = vadd.f32 %v2630_v49, %v2595_v33  ;;  %v2758_v25 = vadd.f32 %v2630_v49, %v2597_v34 }
  0xf1   :  { %v2599_v35 = vpop.f32.mrf.mxu0  ;;  %v2601_v36 = vpop.f32.mrf.mxu1 }
  0xf2   :  { %v2763_v29 = vadd.f32 %v2599_v35, %v2630_v49  ;;  %v2767_v23 = vadd.f32 %v2601_v36, %v2630_v49 }
  0xf3   :  { %v2603_v37 = vpop.f32.mrf.mxu0  ;;  %v2605_v38 = vpop.f32.mrf.mxu1 }
  0xf4   :  { %v2771_v31 = vadd.f32 %v2630_v49, %v2603_v37  ;;  %v2783_v36 = vadd.f32 %v2630_v49, %v2605_v38 }
  0xf5   :  { %v2607_v39 = vpop.f32.mrf.mxu0  ;;  %v2609_v40 = vpop.f32.mrf.mxu1 }
  0xf6   :  { %3305 = vst [vmem:[#allocation2_spill] sm:$0xff] %v2771_v31  ;;  %v2787_v37 = vadd.f32 %v2607_v39, %v2630_v49  ;;  %v2791_v0 = vadd.f32 %v2609_v40, %v2630_v49 }
  0xf7   :  { %v2611_v41 = vpop.f32.mrf.mxu0  ;;  %v2613_v42 = vpop.f32.mrf.mxu1 }
  0xf8   :  { %v2795_v34 = vadd.f32 %v2630_v49, %v2611_v41  ;;  %v2805_v39 = vadd.f32 %v2630_v49, %v2613_v42 }
  0xf9   :  { %v2615_v43 = vpop.f32.mrf.mxu0  ;;  %v2617_v44 = vpop.f32.mrf.mxu1 }
  0xfa   :  { %v2809_v40 = vadd.f32 %v2615_v43, %v2630_v49 }
  0xfb   :  { %v2619_v45 = vpop.f32.mrf.mxu0  ;;  %v2621_v46 = vpop.f32.mrf.mxu1 }
  0xfc   :  { %v2824_v42 = vadd.f32 %v2630_v49, %v2619_v45  ;;  %v2828_v43 = vadd.f32 %v2630_v49, %v2621_v46 }
  0xfd   :  { %v2623_v47 = vpop.f32.mrf.mxu0  ;;  %v2625_v48 = vpop.f32.mrf.mxu1 }
  0xfe   :  { %3311 = vst [vmem:[#allocation8_spill] sm:$0xff] %v2824_v42  ;;  %3312 = vst [vmem:[#allocation9_spill] sm:$0xff] %v2828_v43  ;;  %v2832_v41 = vadd.f32 %v2623_v47, %v2630_v49 }
  0xff   :  { %v2632_v50 = vpop.f32.mrf.mxu0  ;;  %v2634_v51 = vpop.f32.mrf.mxu1 }
 0x100   :  { %3313 = vst [vmem:[#allocation10_spill] sm:$0xff] %v2832_v41 }
 0x101   :  { %v2636_v52 = vpop.f32.mrf.mxu0  ;;  %v2638_v53 = vpop.f32.mrf.mxu1 }
 0x102   :  { %v2859_v45 = vadd.f32 %v2636_v52, %v2630_v49 }
 0x103   :  { %v2646_v56 = vpop.f32.mrf.mxu0  ;;  %v2648_v57 = vpop.f32.mrf.mxu1 }
 0x104   :  { %3318 = vst [vmem:[#allocation15_spill] sm:$0xff] %v2859_v45  ;;  %v2867_v47 = vadd.f32 %v2630_v49, %v2646_v56 }
 0x105   :  { %v2662_v62 = vpop.f32.mrf.mxu0  ;;  %v2664_v63 = vpop.f32.mrf.mxu1 }
 0x106   :  { %3320 = vst [vmem:[#allocation17_spill] sm:$0xff] %v2867_v47  ;;  %v2883_v56 = vadd.f32 %v2662_v62, %v2630_v49 }
 0x107   :  { %v2683_v7 = vpop.f32.mrf.mxu0  ;;  %v2685_v8 = vpop.f32.mrf.mxu1 }
 0x109   :  { %v2703_v17 = vpop.f32.mrf.mxu0  ;;  %v2705_v18 = vpop.f32.mrf.mxu1 }
 0x10b   :  { %v2722_v11 = vpop.f32.mrf.mxu0  ;;  %v2724_v19 = vpop.f32.mrf.mxu1 }
 0x10d   :  { %v2746_v10 = vpop.f32.mrf.mxu0  ;;  %v2748_v30 = vpop.f32.mrf.mxu1 }
 0x10f   :  { %v2773_v33 = vpop.f32.mrf.mxu0  ;;  %v2775_v9 = vpop.f32.mrf.mxu1 }
 0x110   :  { %3306 = vst [vmem:[#allocation3_spill] sm:$0xff] %v2775_v9  ;;  %v2863_v9 = vadd.f32 %v2638_v53, %v2630_v49  ;;  %v2879_v53 = vadd.f32 %v2630_v49, %v2648_v57 }
 0x111   :  { %v2797_v20 = vpop.f32.mrf.mxu0  ;;  %v2799_v3 = vpop.f32.mrf.mxu1 }
 0x112   :  { %3307 = vst [vmem:[#allocation4_spill] sm:$0xff] %v2797_v20  ;;  %3308 = vst [vmem:[#allocation5_spill] sm:$0xff] %v2799_v3  ;;  %v2816_v3 = vadd.f32 %v2617_v44, %v2630_v49  ;;  %v2836_v44 = vadd.f32 %v2625_v48, %v2630_v49  ;;  %v2850_v48 = vadd.f32 %v2630_v49, %v2632_v50 }
 0x113   :  { %v2818_v35 = vpop.f32.mrf.mxu0  ;;  %v2820_v38 = vpop.f32.mrf.mxu1  ;;  %v2854_v20 = vadd.f32 %v2630_v49, %v2634_v51  ;;  %3319 = vst [vmem:[#allocation16_spill] sm:$0xff] %v2863_v9  ;;  %v2891_v51 = vadd.f32 %v2630_v49, %v2683_v7  ;;  %v2902_v7 = vadd.f32 %v2630_v49, %v2685_v8  ;;  %v3325_v8 = vmax.f32 %v2641_v54, 0.0 }
 0x114   :  { %3309 = vst [vmem:[#allocation6_spill] sm:$0xff] %v2818_v35  ;;  %3310 = vst [vmem:[#allocation7_spill] sm:$0xff] %v2820_v38  ;;  %v3327_v54 = vmax.f32 %v2651_v58, 0.0 }
 0x115   :  { %3314 = vst [vmem:[#allocation11_spill] sm:$0xff] %v2836_v44  ;;  %v2842_v35 = vpop.f32.mrf.mxu0  ;;  %v2844_v46 = vpop.f32.mrf.mxu1  ;;  %3317 = vst [vmem:[#allocation14_spill] sm:$0xff] %v2854_v20 }
 0x116   :  { %3315 = vst [vmem:[#allocation12_spill] sm:$0xff] %v2842_v35  ;;  %3316 = vst [vmem:[#allocation13_spill] sm:$0xff] %v2844_v46 }
 0x117   :  { %v2869_v50 = vpop.f32.mrf.mxu0  ;;  %v2871_v31 = vpop.f32.mrf.mxu1  ;;  %3324 = vst [vmem:[#allocation21_spill] sm:$0xff] %v2891_v51 }
 0x118   :  { %3321 = vst [vmem:[#allocation18_spill] sm:$0xff] %v2869_v50  ;;  %3322 = vst [vmem:[#allocation19_spill] sm:$0xff] %v2871_v31  ;;  %v2887_v31 = vadd.f32 %v2664_v63, %v2630_v49 }
 0x119   :  { %v1856_v38 = vpop.f32.mrf.mxu0  ;;  %v1952_v52 = vpop.f32.mrf.mxu1 }
 0x11a   :  { %3323 = vst [vmem:[#allocation20_spill] sm:$0xff] %v2887_v31  ;;  %v781_v57 = vadd.f32 %v1856_v38, %v2630_v49  ;;  %v1101_v35 = vadd.f32 %v1952_v52, %v2630_v49  ;;  %v2917_v52 = vadd.f32 %v2703_v17, %v2630_v49 }
 0x11b   :  { %v775_v41 = vpop.f32.mrf.mxu0  ;;  %v1095_v43 = vpop.f32.mrf.mxu1 }
 0x11c   :  { %v1287_v42 = vmax.f32 %v781_v57, 0.0  ;;  %v1351_v46 = vmax.f32 %v1101_v35, 0.0  ;;  %v776_v50 = vadd.f32 %v2630_v49, %v775_v41  ;;  %v1096_v38 = vadd.f32 %v2630_v49, %v1095_v43 }
 0x11d   :  { %v1859_v47 = vpop.f32.mrf.mxu0  ;;  %v1955_v9 = vpop.f32.mrf.mxu1  ;;  %v3326_v57 = vmax.f32 %v2644_v55, 0.0  ;;  %v1340_v43 = vmax.f32 %v2902_v7, 0.0  ;;  %v3328_v55 = vmax.f32 %v2654_v59, 0.0 }
 0x11e   :  { %v1383_v45 = vmax.f32 %v3325_v8, %v1287_v42  ;;  %v1286_v20 = vmax.f32 %v776_v50, 0.0  ;;  %v1350_v41 = vmax.f32 %v1096_v38, 0.0  ;;  %v791_v44 = vadd.f32 %v1859_v47, %v2630_v49 }
 0x11f   :  { %v1415_v35 = vmax.f32 %v3326_v57, %v1351_v46  ;;  %v1111_v63 = vadd.f32 %v1955_v9, %v2630_v49  ;;  %v785_v62 = vpop.f32.mrf.mxu0  ;;  %v1105_v51 = vpop.f32.mrf.mxu1  ;;  %v2928_v38 = vadd.f32 %v2705_v18, %v2630_v49  ;;  %v1279_v18 = vmax.f32 %v2917_v52, 0.0 }
 0x120   :  { %v1382_v42 = vmax.f32 %v3327_v54, %v1286_v20  ;;  %v1414_v46 = vmax.f32 %v3328_v55, %v1350_v41  ;;  %v786_v50 = vadd.f32 %v2630_v49, %v785_v62  ;;  %v1289_v17 = vmax.f32 %v791_v44, 0.0 }
 0x121   :  { %v1447_v31 = vmax.f32 %v1383_v45, %v1415_v35  ;;  %v1353_v8 = vmax.f32 %v1111_v63, 0.0  ;;  %v1106_v47 = vadd.f32 %v2630_v49, %v1105_v51  ;;  %v1862_v9 = vpop.f32.mrf.mxu0  ;;  %v1958_v57 = vpop.f32.mrf.mxu1  ;;  %v3329_v44 = vmax.f32 %v2657_v60, 0.0 }
 0x122   :  { %v1446_v58 = vmax.f32 %v1382_v42, %v1414_v46  ;;  %v1288_v59 = vmax.f32 %v786_v50, 0.0  ;;  %v801_v20 = vadd.f32 %v1862_v9, %v2630_v49  ;;  %v1121_v45 = vadd.f32 %v1958_v57, %v2630_v49 }
 0x123   :  { %1480 = vst.msk [vmem:[%s3293_s3 + $0x8] sm:$0xff] %vm1478_vm2, %v1447_v31  ;;  %v1385_v62 = vmax.f32 %v3329_v44, %v1289_v17  ;;  %v3330_v51 = vmax.f32 %v2660_v61, 0.0  ;;  %v1352_v35 = vmax.f32 %v1106_v47, 0.0  ;;  %v795_v41 = vpop.f32.mrf.mxu0  ;;  %v1115_v54 = vpop.f32.mrf.mxu1  ;;  %v3331_v31 = vmax.f32 %v2668_v1, 0.0 }
 0x124   :  { %1479 = vst.msk [vmem:[%s3293_s3] sm:$0xff] %vm1478_vm2, %v1446_v58  ;;  %v1291_v55 = vmax.f32 %v801_v20, 0.0  ;;  %v1355_v46 = vmax.f32 %v1121_v45, 0.0  ;;  %v796_v50 = vadd.f32 %v2630_v49, %v795_v41  ;;  %v1343_v60 = vmax.f32 %v2928_v38, 0.0 }
 0x125   :  { %v1417_v63 = vmax.f32 %v3330_v51, %v1353_v8  ;;  %v1384_v42 = vmax.f32 %v3331_v31, %v1288_v59  ;;  %v3332_v61 = vmax.f32 %v2671_v2, 0.0  ;;  %v1116_v47 = vadd.f32 %v2630_v49, %v1115_v54  ;;  %v1865_v9 = vpop.f32.mrf.mxu0  ;;  %v1961_v57 = vpop.f32.mrf.mxu1 }
 0x126   :  { %v3333_v44 = vmax.f32 %v2675_v4, 0.0  ;;  %v3334_v1 = vmax.f32 %v2678_v5, 0.0  ;;  %v1290_v20 = vmax.f32 %v796_v50, 0.0  ;;  %v811_v45 = vadd.f32 %v1865_v9, %v2630_v49 }
 0x127   :  { %v1449_v17 = vmax.f32 %v1385_v62, %v1417_v63  ;;  %v1416_v8 = vmax.f32 %v3332_v61, %v1352_v35  ;;  %v2960_v51 = vadd.f32 %v2630_v49, %v2722_v11  ;;  %v1354_v62 = vmax.f32 %v1116_v47, 0.0  ;;  %v805_v63 = vpop.f32.mrf.mxu0  ;;  %v1125_v35 = vpop.f32.mrf.mxu1 }
 0x128   :  { %v1387_v58 = vmax.f32 %v3333_v44, %v1291_v55  ;;  %v1419_v59 = vmax.f32 %v3334_v1, %v1355_v46  ;;  %v1131_v4 = vadd.f32 %v1961_v57, %v2630_v49  ;;  %v3335_v41 = vmax.f32 %v2681_v6, 0.0 }
 0x129   :  { %1482 = vst.msk [vmem:[%s3293_s3 + $0x18] sm:$0xff] %vm1478_vm2, %v1449_v17  ;;  %v1448_v2 = vmax.f32 %v1384_v42, %v1416_v8  ;;  %v1293_v31 = vmax.f32 %v811_v45, 0.0  ;;  %v806_v55 = vadd.f32 %v2630_v49, %v805_v63  ;;  %v2972_v11 = vadd.f32 %v2630_v49, %v2724_v19  ;;  %v1868_v6 = vpop.f32.mrf.mxu0  ;;  %v1964_v61 = vpop.f32.mrf.mxu1 }
 0x12a   :  { %v1451_v5 = vmax.f32 %v1387_v58, %v1419_v59  ;;  %v1386_v54 = vmax.f32 %v3335_v41, %v1290_v20  ;;  %v3336_v42 = vmax.f32 %v2692_v13, 0.0  ;;  %v1357_v50 = vmax.f32 %v1131_v4, 0.0 }
 0x12b   :  { %1481 = vst.msk [vmem:[%s3293_s3 + $0x10] sm:$0xff] %vm1478_vm2, %v1448_v2  ;;  %v1126_v17 = vadd.f32 %v2630_v49, %v1125_v35  ;;  %v3337_v19 = vmax.f32 %v2695_v14, 0.0  ;;  %v1292_v47 = vmax.f32 %v806_v55, 0.0  ;;  %v821_v9 = vadd.f32 %v1868_v6, %v2630_v49  ;;  %v815_v20 = vpop.f32.mrf.mxu0  ;;  %v1135_v45 = vpop.f32.mrf.mxu1 }
 0x12c   :  { %v1418_v46 = vmax.f32 %v3336_v42, %v1354_v62  ;;  %1484 = vst.msk [vmem:[%s3293_s3 + $0x28] sm:$0xff] %vm1478_vm2, %v1451_v5  ;;  %v1141_v57 = vadd.f32 %v1964_v61, %v2630_v49  ;;  %v1278_v13 = vmax.f32 %v2960_v51, 0.0  ;;  %v3338_v58 = vmax.f32 %v2698_v15, 0.0 }
 0x12d   :  { %v1389_v8 = vmax.f32 %v3337_v19, %v1293_v31  ;;  %v1356_v59 = vmax.f32 %v1126_v17, 0.0  ;;  %v3339_v2 = vmax.f32 %v2701_v16, 0.0  ;;  %v1295_v4 = vmax.f32 %v821_v9, 0.0  ;;  %v1871_v31 = vpop.f32.mrf.mxu0  ;;  %v1967_v16 = vpop.f32.mrf.mxu1 }
 0x12e   :  { %v1450_v44 = vmax.f32 %v1386_v54, %v1418_v46  ;;  %v1421_v1 = vmax.f32 %v3338_v58, %v1357_v50  ;;  %v1359_v14 = vmax.f32 %v1141_v57, 0.0  ;;  %v816_v63 = vadd.f32 %v2630_v49, %v815_v20 }
 0x12f   :  { %v1388_v62 = vmax.f32 %v3339_v2, %v1292_v47  ;;  %v1342_v35 = vmax.f32 %v2972_v11, 0.0  ;;  %v3340_v15 = vmax.f32 %v2710_v21, 0.0  ;;  %v1136_v54 = vadd.f32 %v2630_v49, %v1135_v45  ;;  %v1145_v47 = vpop.f32.mrf.mxu1 }
 0x130   :  { %1483 = vst.msk [vmem:[%s3293_s3 + $0x20] sm:$0xff] %vm1478_vm2, %v1450_v44  ;;  %v1453_v5 = vmax.f32 %v1389_v8, %v1421_v1  ;;  %v3341_v55 = vmax.f32 %v2713_v22, 0.0  ;;  %v3342_v46 = vmax.f32 %v2720_v12, 0.0  ;;  %v1294_v17 = vmax.f32 %v816_v63, 0.0  ;;  %v825_v8 = vpop.f32.mrf.mxu0 }
 0x131   :  { %v1420_v41 = vmax.f32 %v3340_v15, %v1356_v59  ;;  %v831_v6 = vadd.f32 %v1871_v31, %v2630_v49  ;;  %v3010_v61 = vadd.f32 %v2746_v10, %v2630_v49  ;;  %v1358_v19 = vmax.f32 %v1136_v54, 0.0  ;;  %v1970_v2 = vpop.f32.mrf.mxu1 }
 0x132   :  { %v1391_v42 = vmax.f32 %v3341_v55, %v1295_v4  ;;  %v1423_v50 = vmax.f32 %v3342_v46, %v1359_v14  ;;  %1486 = vst.msk [vmem:[%s3293_s3 + $0x38] sm:$0xff] %vm1478_vm2, %v1453_v5  ;;  %v1151_v22 = vadd.f32 %v1967_v16, %v2630_v49  ;;  %v3343_v9 = vmax.f32 %v2728_v26, 0.0  ;;  %v1874_v26 = vpop.f32.mrf.mxu0 }
 0x133   :  { %v1452_v21 = vmax.f32 %v1388_v62, %v1420_v41  ;;  %v1297_v44 = vmax.f32 %v831_v6, 0.0  ;;  %v826_v58 = vadd.f32 %v2630_v49, %v825_v8  ;;  %v3022_v10 = vadd.f32 %v2748_v30, %v2630_v49  ;;  %v1155_v16 = vpop.f32.mrf.mxu1 }
 0x134   :  { %v1455_v12 = vmax.f32 %v1391_v42, %v1423_v50  ;;  %v1390_v57 = vmax.f32 %v3343_v9, %v1294_v17  ;;  %v3344_v1 = vmax.f32 %v2732_v27, 0.0  ;;  %v1361_v20 = vmax.f32 %v1151_v22, 0.0  ;;  %v835_v31 = vpop.f32.mrf.mxu0 }
 0x135   :  { %1485 = vst.msk [vmem:[%s3293_s3 + $0x30] sm:$0xff] %vm1478_vm2, %v1452_v21  ;;  %v1146_v45 = vadd.f32 %v2630_v49, %v1145_v47  ;;  %v3345_v30 = vmax.f32 %v2736_v24, 0.0  ;;  %v1296_v4 = vmax.f32 %v826_v58, 0.0  ;;  %v841_v14 = vadd.f32 %v1874_v26, %v2630_v49 }
 0x136   :  { %v1422_v59 = vmax.f32 %v3344_v1, %v1358_v19  ;;  %1488 = vst.msk [vmem:[%s3293_s3 + $0x48] sm:$0xff] %vm1478_vm2, %v1455_v12  ;;  %v1161_v63 = vadd.f32 %v1970_v2, %v2630_v49  ;;  %v1281_v27 = vmax.f32 %v3010_v61, 0.0  ;;  %v3346_v15 = vmax.f32 %v2740_v28, 0.0  ;;  %v1877_v22 = vpop.f32.mrf.mxu0 }
 0x137   :  { %v1393_v62 = vmax.f32 %v3345_v30, %v1297_v44  ;;  %v1360_v54 = vmax.f32 %v1146_v45, 0.0  ;;  %v3347_v55 = vmax.f32 %v2754_v32, 0.0  ;;  %v1299_v46 = vmax.f32 %v841_v14, 0.0  ;;  %v1973_v32 = vpop.f32.mrf.mxu1  ;;  %v3351_v45 = vld [vmem:[#allocation2_spill] sm:$0xff] }
 0x138   :  { %v1454_v5 = vmax.f32 %v1390_v57, %v1422_v59  ;;  %v1425_v41 = vmax.f32 %v3346_v15, %v1361_v20  ;;  %v1363_v24 = vmax.f32 %v1161_v63, 0.0  ;;  %v836_v50 = vadd.f32 %v2630_v49, %v835_v31  ;;  %v845_v59 = vpop.f32.mrf.mxu0 }
 0x139   :  { %v1392_v42 = vmax.f32 %v3347_v55, %v1296_v4  ;;  %v1345_v17 = vmax.f32 %v3022_v10, 0.0  ;;  %v3348_v28 = vmax.f32 %v2758_v25, 0.0  ;;  %v1156_v19 = vadd.f32 %v2630_v49, %v1155_v16  ;;  %v1165_v20 = vpop.f32.mrf.mxu1 }
 0x13a   :  { %1487 = vst.msk [vmem:[%s3293_s3 + $0x40] sm:$0xff] %vm1478_vm2, %v1454_v5  ;;  %v1457_v6 = vmax.f32 %v1393_v62, %v1425_v41  ;;  %v3349_v8 = vmax.f32 %v2763_v29, 0.0  ;;  %v3350_v12 = vmax.f32 %v2767_v23, 0.0  ;;  %v1298_v57 = vmax.f32 %v836_v50, 0.0  ;;  %v1880_v41 = vpop.f32.mrf.mxu0 }
 0x13b   :  { %v1424_v21 = vmax.f32 %v3348_v28, %v1360_v54  ;;  %v851_v44 = vadd.f32 %v1877_v22, %v2630_v49  ;;  %v3060_v58 = vadd.f32 %v2630_v49, %v2773_v33  ;;  %v1362_v1 = vmax.f32 %v1156_v19, 0.0  ;;  %v3353_v33 = vld [vmem:[#allocation3_spill] sm:$0xff]  ;;  %v1976_v54 = vpop.f32.mrf.mxu1 }
 0x13c   :  { %v1395_v47 = vmax.f32 %v3349_v8, %v1299_v46  ;;  %v1427_v9 = vmax.f32 %v3350_v12, %v1363_v24  ;;  %1490 = vst.msk [vmem:[%s3293_s3 + $0x58] sm:$0xff] %vm1478_vm2, %v1457_v6  ;;  %v1171_v29 = vadd.f32 %v1973_v32, %v2630_v49  ;;  %v3352_v26 = vmax.f32 %v3351_v45, 0.0 }
 0x13d   :  { %v1456_v25 = vmax.f32 %v1392_v42, %v1424_v21  ;;  %v1301_v30 = vmax.f32 %v851_v44, 0.0  ;;  %v846_v62 = vadd.f32 %v2630_v49, %v845_v59  ;;  %v3072_v4 = vadd.f32 %v2630_v49, %v3353_v33  ;;  %v855_v21 = vpop.f32.mrf.mxu0  ;;  %v1175_v19 = vpop.f32.mrf.mxu1 }
 0x13e   :  { %v1459_v23 = vmax.f32 %v1395_v47, %v1427_v9  ;;  %v1394_v2 = vmax.f32 %v3352_v26, %v1298_v57  ;;  %v3354_v14 = vmax.f32 %v2783_v36, 0.0  ;;  %v1365_v5 = vmax.f32 %v1171_v29, 0.0  ;;  %v3361_v26 = vld [vmem:[#allocation4_spill] sm:$0xff] }
 0x13f   :  { %1489 = vst.msk [vmem:[%s3293_s3 + $0x50] sm:$0xff] %vm1478_vm2, %v1456_v25  ;;  %v1166_v15 = vadd.f32 %v2630_v49, %v1165_v20  ;;  %v3355_v31 = vmax.f32 %v2787_v37, 0.0  ;;  %v1300_v55 = vmax.f32 %v846_v62, 0.0  ;;  %v861_v42 = vadd.f32 %v1880_v41, %v2630_v49  ;;  %v1883_v25 = vpop.f32.mrf.mxu0 }
 0x140   :  { %v1426_v63 = vmax.f32 %v3354_v14, %v1362_v1  ;;  %1492 = vst.msk [vmem:[%s3293_s3 + $0x68] sm:$0xff] %vm1478_vm2, %v1459_v23  ;;  %v1181_v46 = vadd.f32 %v1976_v54, %v2630_v49  ;;  %v1280_v36 = vmax.f32 %v3060_v58, 0.0  ;;  %v3356_v50 = vmax.f32 %v2791_v0, 0.0  ;;  %v3362_v14 = vld [vmem:[#allocation8_spill] sm:$0xff]  ;;  %v3364_v54 = vld [vmem:[#allocation5_spill] sm:$0xff] }
 0x141   :  { %v1397_v16 = vmax.f32 %v3355_v31, %v1301_v30  ;;  %v1364_v28 = vmax.f32 %v1166_v15, 0.0  ;;  %v3357_v22 = vmax.f32 %v2795_v34, 0.0  ;;  %v1303_v8 = vmax.f32 %v861_v42, 0.0  ;;  %v1979_v34 = vpop.f32.mrf.mxu1  ;;  %v865_v62 = vpop.f32.mrf.mxu0 }
 0x142   :  { %v1458_v24 = vmax.f32 %v1394_v2, %v1426_v63  ;;  %v1429_v6 = vmax.f32 %v3356_v50, %v1365_v5  ;;  %v1367_v37 = vmax.f32 %v1181_v46, 0.0  ;;  %v856_v47 = vadd.f32 %v2630_v49, %v855_v21 }
 0x143   :  { %v1396_v32 = vmax.f32 %v3357_v22, %v1300_v55  ;;  %v1344_v12 = vmax.f32 %v3072_v4, 0.0  ;;  %v3358_v0 = vmax.f32 %v2805_v39, 0.0  ;;  %v1176_v44 = vadd.f32 %v2630_v49, %v1175_v19  ;;  %v1185_v33 = vpop.f32.mrf.mxu1  ;;  %v1886_v50 = vpop.f32.mrf.mxu0 }
 0x144   :  { %1491 = vst.msk [vmem:[%s3293_s3 + $0x60] sm:$0xff] %vm1478_vm2, %v1458_v24  ;;  %v1461_v9 = vmax.f32 %v1397_v16, %v1429_v6  ;;  %v3359_v1 = vmax.f32 %v2809_v40, 0.0  ;;  %v3360_v59 = vmax.f32 %v2816_v3, 0.0  ;;  %v1302_v23 = vmax.f32 %v856_v47, 0.0  ;;  %v3365_v16 = vld [vmem:[#allocation9_spill] sm:$0xff] }
 0x145   :  { %v1428_v57 = vmax.f32 %v3358_v0, %v1364_v28  ;;  %v871_v45 = vadd.f32 %v1883_v25, %v2630_v49  ;;  %v3110_v2 = vadd.f32 %v3361_v26, %v2630_v49  ;;  %v1366_v30 = vmax.f32 %v1176_v44, 0.0  ;;  %v1982_v6 = vpop.f32.mrf.mxu1  ;;  %v3367_v28 = vld [vmem:[#allocation10_spill] sm:$0xff]  ;;  %v875_v25 = vpop.f32.mrf.mxu0 }
 0x146   :  { %v1399_v29 = vmax.f32 %v3359_v1, %v1303_v8  ;;  %v1431_v20 = vmax.f32 %v3360_v59, %v1367_v37  ;;  %1494 = vst.msk [vmem:[%s3293_s3 + $0x78] sm:$0xff] %vm1478_vm2, %v1461_v9  ;;  %v1191_v40 = vadd.f32 %v1979_v34, %v2630_v49  ;;  %v3363_v63 = vmax.f32 %v3362_v14, 0.0  ;;  %v3369_v9 = vld [vmem:[#allocation11_spill] sm:$0xff] }
 0x147   :  { %v1460_v39 = vmax.f32 %v1396_v32, %v1428_v57  ;;  %v1305_v15 = vmax.f32 %v871_v45, 0.0  ;;  %v866_v41 = vadd.f32 %v2630_v49, %v865_v62  ;;  %v3122_v31 = vadd.f32 %v3364_v54, %v2630_v49  ;;  %v1195_v34 = vpop.f32.mrf.mxu1 }
 0x148   :  { %v1463_v3 = vmax.f32 %v1399_v29, %v1431_v20  ;;  %v1398_v5 = vmax.f32 %v3363_v63, %v1302_v23  ;;  %v3366_v55 = vmax.f32 %v3365_v16, 0.0  ;;  %v1369_v46 = vmax.f32 %v1191_v40, 0.0 }
 0x149   :  { %1493 = vst.msk [vmem:[%s3293_s3 + $0x70] sm:$0xff] %vm1478_vm2, %v1460_v39  ;;  %v1186_v24 = vadd.f32 %v2630_v49, %v1185_v33  ;;  %v3368_v21 = vmax.f32 %v3367_v28, 0.0  ;;  %v1304_v22 = vmax.f32 %v866_v41, 0.0  ;;  %v881_v32 = vadd.f32 %v1886_v50, %v2630_v49  ;;  %v3372_v39 = vld [vmem:[#allocation14_spill] sm:$0xff]  ;;  %v1889_v33 = vpop.f32.mrf.mxu0 }
 0x14a   :  { %v1430_v42 = vmax.f32 %v3366_v55, %v1366_v30  ;;  %1496 = vst.msk [vmem:[%s3293_s3 + $0x88] sm:$0xff] %vm1478_vm2, %v1463_v3  ;;  %v1201_v8 = vadd.f32 %v1982_v6, %v2630_v49  ;;  %v1283_v37 = vmax.f32 %v3110_v2, 0.0  ;;  %v3370_v0 = vmax.f32 %v3369_v9, 0.0  ;;  %v3374_v3 = vld [vmem:[#allocation15_spill] sm:$0xff]  ;;  %v3378_v55 = vld [vmem:[#allocation6_spill] sm:$0xff] }
 0x14b   :  { %v1401_v19 = vmax.f32 %v3368_v21, %v1305_v15  ;;  %v1368_v44 = vmax.f32 %v1186_v24, 0.0  ;;  %v3371_v1 = vmax.f32 %v2850_v48, 0.0  ;;  %v1307_v59 = vmax.f32 %v881_v32, 0.0  ;;  %v1985_v48 = vpop.f32.mrf.mxu1  ;;  %v885_v6 = vpop.f32.mrf.mxu0  ;;  %v3381_v9 = vld [vmem:[#allocation7_spill] sm:$0xff] }
 0x14c   :  { %v1462_v47 = vmax.f32 %v1398_v5, %v1430_v42  ;;  %v1433_v57 = vmax.f32 %v3370_v0, %v1369_v46  ;;  %v1371_v20 = vmax.f32 %v1201_v8, 0.0  ;;  %v876_v23 = vadd.f32 %v2630_v49, %v875_v25  ;;  %v3376_v5 = vld [vmem:[#allocation16_spill] sm:$0xff] }
 0x14d   :  { %v1400_v29 = vmax.f32 %v3371_v1, %v1304_v22  ;;  %v1347_v45 = vmax.f32 %v3122_v31, 0.0  ;;  %v3373_v30 = vmax.f32 %v3372_v39, 0.0  ;;  %v1196_v62 = vadd.f32 %v2630_v49, %v1195_v34  ;;  %v1205_v28 = vpop.f32.mrf.mxu1  ;;  %v1892_v1 = vpop.f32.mrf.mxu0 }
 0x14e   :  { %1495 = vst.msk [vmem:[%s3293_s3 + $0x80] sm:$0xff] %vm1478_vm2, %v1462_v47  ;;  %v1465_v26 = vmax.f32 %v1401_v19, %v1433_v57  ;;  %v3375_v14 = vmax.f32 %v3374_v3, 0.0  ;;  %v3377_v15 = vmax.f32 %v3376_v5, 0.0  ;;  %v1306_v54 = vmax.f32 %v876_v23, 0.0  ;;  %v3379_v19 = vld [vmem:[#allocation17_spill] sm:$0xff] }
 0x14f   :  { %v1432_v40 = vmax.f32 %v3373_v30, %v1368_v44  ;;  %v891_v16 = vadd.f32 %v1889_v33, %v2630_v49  ;;  %v3160_v42 = vadd.f32 %v2630_v49, %v3378_v55  ;;  %v1370_v24 = vmax.f32 %v1196_v62, 0.0  ;;  %v895_v3 = vpop.f32.mrf.mxu0 }
 0x150   :  { %v1403_v63 = vmax.f32 %v3375_v14, %v1307_v59  ;;  %v1435_v41 = vmax.f32 %v3377_v15, %v1371_v20  ;;  %1498 = vst.msk [vmem:[%s3293_s3 + $0x98] sm:$0xff] %vm1478_vm2, %v1465_v26  ;;  %v1211_v50 = vadd.f32 %v1985_v48, %v2630_v49  ;;  %v3380_v22 = vmax.f32 %v3379_v19, 0.0 }
 0x151   :  { %v1464_v46 = vmax.f32 %v1400_v29, %v1432_v40  ;;  %v1309_v8 = vmax.f32 %v891_v16, 0.0  ;;  %v886_v47 = vadd.f32 %v2630_v49, %v885_v6  ;;  %v3172_v0 = vadd.f32 %v2630_v49, %v3381_v9  ;;  %v1988_v29 = vpop.f32.mrf.mxu1  ;;  %v3384_v40 = vld [vmem:[#allocation20_spill] sm:$0xff] }
 0x152   :  { %v1467_v21 = vmax.f32 %v1403_v63, %v1435_v41  ;;  %v1402_v32 = vmax.f32 %v3380_v22, %v1306_v54  ;;  %v3382_v57 = vmax.f32 %v2879_v53, 0.0  ;;  %v1373_v25 = vmax.f32 %v1211_v50, 0.0  ;;  %v3386_v63 = vld [vmem:[#allocation21_spill] sm:$0xff]  ;;  %v1895_v50 = vpop.f32.mrf.mxu0 }
 0x153   :  { %1497 = vst.msk [vmem:[%s3293_s3 + $0x90] sm:$0xff] %vm1478_vm2, %v1464_v46  ;;  %v1206_v34 = vadd.f32 %v2630_v49, %v1205_v28  ;;  %v3383_v59 = vmax.f32 %v2883_v56, 0.0  ;;  %v1308_v23 = vmax.f32 %v886_v47, 0.0  ;;  %v901_v26 = vadd.f32 %v1892_v1, %v2630_v49  ;;  %v1215_v14 = vpop.f32.mrf.mxu1 }
 0x154   :  { %v1434_v44 = vmax.f32 %v3382_v57, %v1370_v24  ;;  %1500 = vst.msk [vmem:[%s3293_s3 + $0xa8] sm:$0xff] %vm1478_vm2, %v1467_v21  ;;  %v1221_v39 = vadd.f32 %v1988_v29, %v2630_v49  ;;  %v1282_v53 = vmax.f32 %v3160_v42, 0.0  ;;  %v3385_v62 = vmax.f32 %v3384_v40, 0.0 }
 0x155   :  { %v1405_v20 = vmax.f32 %v3383_v59, %v1309_v8  ;;  %v1372_v48 = vmax.f32 %v1206_v34, 0.0  ;;  %v3387_v5 = vmax.f32 %v3386_v63, 0.0  ;;  %v1311_v41 = vmax.f32 %v901_v26, 0.0  ;;  %v1991_v6 = vpop.f32.mrf.mxu1 }
 0x156   :  { %v1466_v30 = vmax.f32 %v1402_v32, %v1434_v44  ;;  %v1437_v33 = vmax.f32 %v3385_v62, %v1373_v25  ;;  %v1375_v56 = vmax.f32 %v1221_v39, 0.0  ;;  %v896_v54 = vadd.f32 %v2630_v49, %v895_v3  ;;  %v3388_v32 = vld [vmem:[#allocation12_spill] sm:$0xff]  ;;  %v3389_v44 = vld [vmem:[#allocation13_spill] sm:$0xff]  ;;  %v3390_v3 = vld [vmem:[#allocation18_spill] sm:$0xff] }
 0x157   :  { %v1404_v15 = vmax.f32 %v3387_v5, %v1308_v23  ;;  %v1346_v16 = vmax.f32 %v3172_v0, 0.0  ;;  %v1436_v46 = vmax.f32 %v1340_v43, %v1372_v48  ;;  %v1216_v24 = vadd.f32 %v2630_v49, %v1215_v14  ;;  %v1225_v47 = vpop.f32.mrf.mxu1 }
 0x158   :  { %1499 = vst.msk [vmem:[%s3293_s3 + $0xa0] sm:$0xff] %vm1478_vm2, %v1466_v30  ;;  %v1469_v55 = vmax.f32 %v1405_v20, %v1437_v33  ;;  %v1407_v28 = vmax.f32 %v1279_v18, %v1311_v41  ;;  %v1439_v21 = vmax.f32 %v1343_v60, %v1375_v56  ;;  %v1310_v19 = vmax.f32 %v896_v54, 0.0  ;;  %v905_v18 = vpop.f32.mrf.mxu0  ;;  %v3391_v54 = vld [vmem:[#allocation19_spill] sm:$0xff] }
 0x159   :  { %v911_v22 = vadd.f32 %v1895_v50, %v2630_v49  ;;  %v3210_v8 = vadd.f32 %v3388_v32, %v2630_v49  ;;  %v1468_v7 = vmax.f32 %v1404_v15, %v1436_v46  ;;  %v1374_v43 = vmax.f32 %v1216_v24, 0.0  ;;  %v1994_v51 = vpop.f32.mrf.mxu1 }
 0x15a   :  { %1502 = vst.msk [vmem:[%s3293_s3 + $0xb8] sm:$0xff] %vm1478_vm2, %v1469_v55  ;;  %v1231_v52 = vadd.f32 %v1991_v6, %v2630_v49  ;;  %v1471_v38 = vmax.f32 %v1407_v28, %v1439_v21  ;;  %v1406_v60 = vmax.f32 %v1278_v13, %v1310_v19  ;;  %v906_v57 = vadd.f32 %v2630_v49, %v905_v18  ;;  %v1898_v59 = vpop.f32.mrf.mxu0 }
 0x15b   :  { %v1313_v9 = vmax.f32 %v911_v22, 0.0  ;;  %v1091_v25 = vadd.f32 %v3389_v44, %v2630_v49  ;;  %1501 = vst.msk [vmem:[%s3293_s3 + $0xb0] sm:$0xff] %vm1478_vm2, %v1468_v7  ;;  %v1438_v34 = vmax.f32 %v1342_v35, %v1374_v43  ;;  %v1226_v29 = vadd.f32 %v2630_v49, %v1225_v47  ;;  %v1235_v62 = vpop.f32.mrf.mxu1 }
 0x15c   :  { %v1377_v1 = vmax.f32 %v1231_v52, 0.0  ;;  %1504 = vst.msk [vmem:[%s3293_s3 + $0xc8] sm:$0xff] %vm1478_vm2, %v1471_v38  ;;  %v1312_v20 = vmax.f32 %v906_v57, 0.0  ;;  %v921_v23 = vadd.f32 %v1898_v59, %v2630_v49  ;;  %v1241_v26 = vadd.f32 %v1994_v51, %v2630_v49  ;;  %v915_v40 = vpop.f32.mrf.mxu0 }
 0x15d   :  { %v1409_v13 = vmax.f32 %v1281_v27, %v1313_v9  ;;  %v1285_v11 = vmax.f32 %v3210_v8, 0.0  ;;  %v1470_v35 = vmax.f32 %v1406_v60, %v1438_v34  ;;  %v1376_v30 = vmax.f32 %v1226_v29, 0.0 }
 0x15e   :  { %v1441_v39 = vmax.f32 %v1345_v17, %v1377_v1  ;;  %v1408_v33 = vmax.f32 %v1280_v36, %v1312_v20  ;;  %v1315_v48 = vmax.f32 %v921_v23, 0.0  ;;  %v1379_v61 = vmax.f32 %v1241_v26, 0.0  ;;  %v1901_v58 = vpop.f32.mrf.mxu0  ;;  %v1997_v36 = vpop.f32.mrf.mxu1 }
 0x15f   :  { %v916_v27 = vadd.f32 %v2630_v49, %v915_v40  ;;  %v766_v14 = vadd.f32 %v2630_v49, %v3390_v3  ;;  %1503 = vst.msk [vmem:[%s3293_s3 + $0xc0] sm:$0xff] %vm1478_vm2, %v1470_v35  ;;  %v1440_v17 = vmax.f32 %v1344_v12, %v1376_v30  ;;  %v1236_v63 = vadd.f32 %v2630_v49, %v1235_v62 }
 0x160   :  { %v1473_v10 = vmax.f32 %v1409_v13, %v1441_v39  ;;  %v1411_v5 = vmax.f32 %v1283_v37, %v1315_v48  ;;  %v1443_v15 = vmax.f32 %v1347_v45, %v1379_v61  ;;  %v931_v56 = vadd.f32 %v1901_v58, %v2630_v49  ;;  %v925_v2 = vpop.f32.mrf.mxu0  ;;  %v1245_v37 = vpop.f32.mrf.mxu1 }
 0x161   :  { %v1314_v41 = vmax.f32 %v916_v27, 0.0  ;;  %v1086_v55 = vadd.f32 %v2630_v49, %v3391_v54  ;;  %v1472_v4 = vmax.f32 %v1408_v33, %v1440_v17  ;;  %v1378_v12 = vmax.f32 %v1236_v63, 0.0 }
 0x162   :  { %1506 = vst.msk [vmem:[%s3293_s3 + $0xd8] sm:$0xff] %vm1478_vm2, %v1473_v10  ;;  %v1251_v46 = vadd.f32 %v1997_v36, %v2630_v49  ;;  %v1475_v24 = vmax.f32 %v1411_v5, %v1443_v15  ;;  %v1317_v45 = vmax.f32 %v931_v56, 0.0  ;;  %v926_v50 = vadd.f32 %v2630_v49, %v925_v2 }
 0x163   :  { %v1410_v31 = vmax.f32 %v1282_v53, %v1314_v41  ;;  %v1349_v6 = vmax.f32 %v1091_v25, 0.0  ;;  %1505 = vst.msk [vmem:[%s3293_s3 + $0xd0] sm:$0xff] %vm1478_vm2, %v1472_v4  ;;  %v1442_v28 = vmax.f32 %v1346_v16, %v1378_v12  ;;  %v1246_v19 = vadd.f32 %v2630_v49, %v1245_v37 }
 0x164   :  { %v1381_v21 = vmax.f32 %v1251_v46, 0.0  ;;  %v1284_v22 = vmax.f32 %v766_v14, 0.0  ;;  %1508 = vst.msk [vmem:[%s3293_s3 + $0xe8] sm:$0xff] %vm1478_vm2, %v1475_v24  ;;  %v1413_v42 = vmax.f32 %v1285_v11, %v1317_v45  ;;  %v1316_v53 = vmax.f32 %v926_v50, 0.0 }
 0x165   :  { %v1348_v32 = vmax.f32 %v1086_v55, 0.0  ;;  %v1474_v8 = vmax.f32 %v1410_v31, %v1442_v28  ;;  %v1380_v43 = vmax.f32 %v1246_v19, 0.0 }
 0x166   :  { %v1445_v7 = vmax.f32 %v1349_v6, %v1381_v21  ;;  %v1412_v52 = vmax.f32 %v1284_v22, %v1316_v53 }
 0x167   :  { %1507 = vst.msk [vmem:[%s3293_s3 + $0xe0] sm:$0xff] %vm1478_vm2, %v1474_v8  ;;  %v1444_v49 = vmax.f32 %v1348_v32, %v1380_v43 }
 0x168   :  { %v1477_v0 = vmax.f32 %v1413_v42, %v1445_v7 }
 0x169   :  { %v1476_v16 = vmax.f32 %v1412_v52, %v1444_v49 }
 0x16a   :  { %1510 = vst.msk [vmem:[%s3293_s3 + $0xf8] sm:$0xff] %vm1478_vm2, %v1477_v0 }
 0x16b   :  { %1509 = vst.msk [vmem:[%s3293_s3 + $0xf0] sm:$0xff] %vm1478_vm2, %v1476_v16 }

// kernel: forward.3
= control target key start
LH: loop header
LB: loop body
LE: loop exit
PB: predicated region body
PF: predicated region fallthrough
CT: control target
= control target key end

     0   :  { %vm2471_vm0 = vmmov 0   ;;  %vm296_vm1 = vcmask 261120   ;;  %vm611_vm2 = vcmask 1041408   ;;  %vm607_vm3 = vcmask 15360   ;;  %s2472_s28 = smov 2   ;;  %s3834_s7 = inlined_call_operand.vmem [shape: f32[512,32], index: 7, kind: input, shape index: {}]   ;;  %s3835_s0 = inlined_call_operand.vmem [shape: f32[4,512], index: 0, kind: input, shape index: {}]   ;;  %s3836_s9 = inlined_call_operand.vmem [shape: f32[32,32], index: 9, kind: input, shape index: {}]   ;;  %s3837_s11 = inlined_call_operand.vmem [shape: f32[32,4], index: 11, kind: input, shape index: {}]   ;;  %s3838_s8 = inlined_call_operand.vmem [shape: f32[1,32], index: 8, kind: input, shape index: {}]   ;;  %s3839_s14 = inlined_call_operand.vmem [shape: f32[2,128], index: 14, kind: input, shape index: {}]   ;;  %s3840_s13 = inlined_call_operand.vmem [shape: f32[512,128], index: 13, kind: input, shape index: {}]   ;;  %s3841_s1 = inlined_call_operand.vmem [shape: f32[2,2], index: 1, kind: input, shape index: {}]   ;;  %s3842_s2 = inlined_call_operand.vmem [shape: f32[4,2], index: 2, kind: input, shape index: {}]   ;;  %s3843_s10 = inlined_call_operand.vmem [shape: f32[1,32], index: 10, kind: input, shape index: {}]   ;;  %s3844_s16 = inlined_call_operand.vmem [shape: f32[128,128], index: 16, kind: input, shape index: {}]   ;;  %s3845_s12 = inlined_call_operand.vmem [shape: f32[1,4], index: 12, kind: input, shape index: {}]   ;;  %s3846_s15 = inlined_call_operand.vmem [shape: f32[1,128], index: 15, kind: input, shape index: {}]   ;;  %s3847_s18 = inlined_call_operand.vmem [shape: f32[128,4], index: 18, kind: input, shape index: {}]   ;;  %s3848_s5 = inlined_call_operand.vmem [shape: f32[1,2], index: 5, kind: input, shape index: {}]   ;;  %s3849_s6 = inlined_call_operand.vmem [shape: f32[1,2], index: 6, kind: input, shape index: {}]   ;;  %s3850_s17 = inlined_call_operand.vmem [shape: f32[1,128], index: 17, kind: input, shape index: {}]   ;;  %s3851_s19 = inlined_call_operand.vmem [shape: f32[1,4], index: 19, kind: input, shape index: {}]   ;;  %s3852_s4 = inlined_call_operand.vmem [shape: f32[2,1], index: 4, kind: input, shape index: {}]   ;;  %s3853_s3 = inlined_call_operand.vmem [shape: f32[2,1], index: 3, kind: input, shape index: {}]   ;;  %s3854_s20 = inlined_call_operand.vmem [shape: f32[1,4], index: 20, kind: output, shape index: {}]  }
   0x1   :  { %3965 = sst [smem:[#allocation57_spill]] %s3834_s7  ;;  %vm502_vm4 = vcmask 11264   ;;  %vm1737_vm5 = vcmask 1024   ;;  %vm1746_vm6 = vcmask 0   ;;  %vm1749_vm7 = vcmask 9224  }
   0x2   :  { %3966 = sst [smem:[#allocation58_spill]] %s3835_s0  ;;  %vm1758_vm8 = vcmask 8200   ;;  %vm1773_vm9 = vcmask 16400   ;;  %vm1786_vm10 = vcmask 24600  }
   0x3   :  { %3967 = sst [smem:[#allocation59_spill]] %s3836_s9  ;;  %s2473_s9 = smov 126  }
   0x4   :  { %3968 = sst [smem:[#allocation60_spill]] %s3837_s11 }
   0x5   :  { %3969 = sst [smem:[#allocation61_spill]] %s3838_s8 }
   0x6   :  { %s3970_s23 = sld [smem:[#allocation57_spill]] }
   0x7   :  { %s3971_s24 = sld [smem:[#allocation58_spill]] }
   0x8   :  { %s3974_s29 = sld [smem:[#allocation59_spill]] }
   0x9   :  { %s3975_s11 = sld [smem:[#allocation60_spill]] }
   0xc   :  { %v98_v0 = vld [vmem:[%s3970_s23 + $0xf8] sm:$0xff]  ;;  %v97_v4 = vld [vmem:[%s3970_s23 + $0xf0] sm:$0xff]  ;;  %v96_v8 = vld [vmem:[%s3970_s23 + $0xe8] sm:$0xff] }
   0xd   :  { %v130_v1 = vld [vmem:[%s3970_s23 + $0x1f8] sm:$0xff]  ;;  %1809 = vmatprep.subr.mxu0 %v98_v0  ;;  %v129_v5 = vld [vmem:[%s3970_s23 + $0x1f0] sm:$0xff]  ;;  %v128_v9 = vld [vmem:[%s3970_s23 + $0x1e8] sm:$0xff] }
   0xe   :  { %v82_v2 = vld [vmem:[%s3970_s23 + $0x78] sm:$0xff]  ;;  %1844 = vmatprep.subr.mxu1 %v130_v1  ;;  %v81_v6 = vld [vmem:[%s3970_s23 + $0x70] sm:$0xff]  ;;  %v80_v10 = vld [vmem:[%s3970_s23 + $0x68] sm:$0xff] }
   0xf   :  { %v114_v3 = vld [vmem:[%s3970_s23 + $0x178] sm:$0xff]  ;;  %1810 = vmatpush3.msra.mxu0 %v82_v2  ;;  %v113_v7 = vld [vmem:[%s3970_s23 + $0x170] sm:$0xff]  ;;  %v112_v11 = vld [vmem:[%s3970_s23 + $0x168] sm:$0xff] }
  0x10   :  { %1845 = vmatpush3.msra.mxu1 %v114_v3  ;;  %1811 = vmatprep.subr.mxu0 %v97_v4  ;;  %v95_v12 = vld [vmem:[%s3970_s23 + $0xe0] sm:$0xff]  ;;  %v94_v16 = vld [vmem:[%s3970_s23 + $0xd8] sm:$0xff]  ;;  %v93_v20 = vld [vmem:[%s3970_s23 + $0xd0] sm:$0xff]  ;;  %v3859_v4 = vmov 0.0  }
  0x11   :  { %1846 = vmatprep.subr.mxu1 %v129_v5  ;;  %1812 = vmatpush3.msra.mxu0 %v81_v6  ;;  %v127_v13 = vld [vmem:[%s3970_s23 + $0x1e0] sm:$0xff]  ;;  %v126_v17 = vld [vmem:[%s3970_s23 + $0x1d8] sm:$0xff]  ;;  %v125_v21 = vld [vmem:[%s3970_s23 + $0x1d0] sm:$0xff] }
  0x12   :  { %1847 = vmatpush3.msra.mxu1 %v113_v7  ;;  %1813 = vmatprep.subr.mxu0 %v96_v8  ;;  %v79_v14 = vld [vmem:[%s3970_s23 + $0x60] sm:$0xff]  ;;  %v78_v18 = vld [vmem:[%s3970_s23 + $0x58] sm:$0xff]  ;;  %v77_v22 = vld [vmem:[%s3970_s23 + $0x50] sm:$0xff] }
  0x13   :  { %1848 = vmatprep.subr.mxu1 %v128_v9  ;;  %v111_v15 = vld [vmem:[%s3970_s23 + $0x160] sm:$0xff]  ;;  %1814 = vmatpush3.msra.mxu0 %v80_v10  ;;  %v110_v19 = vld [vmem:[%s3970_s23 + $0x158] sm:$0xff]  ;;  %v109_v23 = vld [vmem:[%s3970_s23 + $0x150] sm:$0xff] }
  0x14   :  { %1849 = vmatpush3.msra.mxu1 %v112_v11  ;;  %1815 = vmatprep.subr.mxu0 %v95_v12  ;;  %v92_v24 = vld [vmem:[%s3970_s23 + $0xc8] sm:$0xff]  ;;  %v91_v28 = vld [vmem:[%s3970_s23 + $0xc0] sm:$0xff]  ;;  %v90_v32 = vld [vmem:[%s3970_s23 + $0xb8] sm:$0xff] }
  0x15   :  { %1850 = vmatprep.subr.mxu1 %v127_v13  ;;  %1816 = vmatpush3.msra.mxu0 %v79_v14  ;;  %v124_v25 = vld [vmem:[%s3970_s23 + $0x1c8] sm:$0xff]  ;;  %v123_v29 = vld [vmem:[%s3970_s23 + $0x1c0] sm:$0xff]  ;;  %v122_v33 = vld [vmem:[%s3970_s23 + $0x1b8] sm:$0xff] }
  0x16   :  { %1851 = vmatpush3.msra.mxu1 %v111_v15  ;;  %1817 = vmatprep.subr.mxu0 %v94_v16  ;;  %v76_v26 = vld [vmem:[%s3970_s23 + $0x48] sm:$0xff]  ;;  %v75_v30 = vld [vmem:[%s3970_s23 + $0x40] sm:$0xff]  ;;  %v74_v34 = vld [vmem:[%s3970_s23 + $0x38] sm:$0xff] }
  0x17   :  { %1852 = vmatprep.subr.mxu1 %v126_v17  ;;  %1818 = vmatpush3.msra.mxu0 %v78_v18  ;;  %v108_v27 = vld [vmem:[%s3970_s23 + $0x148] sm:$0xff]  ;;  %v107_v31 = vld [vmem:[%s3970_s23 + $0x140] sm:$0xff]  ;;  %v106_v35 = vld [vmem:[%s3970_s23 + $0x138] sm:$0xff] }
  0x18   :  { %1853 = vmatpush3.msra.mxu1 %v110_v19  ;;  %1819 = vmatprep.subr.mxu0 %v93_v20  ;;  %v89_v36 = vld [vmem:[%s3970_s23 + $0xb0] sm:$0xff]  ;;  %v88_v40 = vld [vmem:[%s3970_s23 + $0xa8] sm:$0xff]  ;;  %v87_v44 = vld [vmem:[%s3970_s23 + $0xa0] sm:$0xff] }
  0x19   :  { %1854 = vmatprep.subr.mxu1 %v125_v21  ;;  %1820 = vmatpush3.msra.mxu0 %v77_v22  ;;  %v121_v37 = vld [vmem:[%s3970_s23 + $0x1b0] sm:$0xff]  ;;  %v120_v41 = vld [vmem:[%s3970_s23 + $0x1a8] sm:$0xff]  ;;  %v119_v45 = vld [vmem:[%s3970_s23 + $0x1a0] sm:$0xff] }
  0x1a   :  { %1855 = vmatpush3.msra.mxu1 %v109_v23  ;;  %1821 = vmatprep.subr.mxu0 %v92_v24  ;;  %v73_v38 = vld [vmem:[%s3970_s23 + $0x30] sm:$0xff]  ;;  %v72_v42 = vld [vmem:[%s3970_s23 + $0x28] sm:$0xff]  ;;  %v71_v46 = vld [vmem:[%s3970_s23 + $0x20] sm:$0xff] }
  0x1b   :  { %1856 = vmatprep.subr.mxu1 %v124_v25  ;;  %1822 = vmatpush3.msra.mxu0 %v76_v26  ;;  %v105_v39 = vld [vmem:[%s3970_s23 + $0x130] sm:$0xff]  ;;  %v104_v43 = vld [vmem:[%s3970_s23 + $0x128] sm:$0xff]  ;;  %v103_v47 = vld [vmem:[%s3970_s23 + $0x120] sm:$0xff] }
  0x1c   :  { %1857 = vmatpush3.msra.mxu1 %v108_v27  ;;  %1823 = vmatprep.subr.mxu0 %v91_v28  ;;  %v86_v48 = vld [vmem:[%s3970_s23 + $0x98] sm:$0xff]  ;;  %v85_v52 = vld [vmem:[%s3970_s23 + $0x90] sm:$0xff]  ;;  %v2752_v56 = vld [vmem:[%s3971_s24] sm:$0xff] }
  0x1d   :  { %1858 = vmatprep.subr.mxu1 %v123_v29  ;;  %1824 = vmatpush3.msra.mxu0 %v75_v30  ;;  %v118_v49 = vld [vmem:[%s3970_s23 + $0x198] sm:$0xff]  ;;  %v117_v53 = vld [vmem:[%s3970_s23 + $0x190] sm:$0xff]  ;;  %3972 = vst [vmem:[#allocation2_spill] sm:$0xff] %v2752_v56  ;;  %v84_v57 = vld [vmem:[%s3970_s23 + $0x88] sm:$0xff]  ;;  %v2779_v0 = vcombine.high %v2752_v56, %v2752_v56 }
  0x1e   :  { %1859 = vmatpush3.msra.mxu1 %v107_v31  ;;  %1825 = vmatprep.subr.mxu0 %v90_v32  ;;  %v70_v50 = vld [vmem:[%s3970_s23 + $0x18] sm:$0xff]  ;;  %v69_v54 = vld [vmem:[%s3970_s23 + $0x10] sm:$0xff]  ;;  %v116_v58 = vld [vmem:[%s3970_s23 + $0x188] sm:$0xff] }
  0x1f   :  { %1860 = vmatprep.subr.mxu1 %v122_v33  ;;  %1826 = vmatpush3.msra.mxu0 %v74_v34  ;;  %v102_v51 = vld [vmem:[%s3970_s23 + $0x118] sm:$0xff]  ;;  %v101_v55 = vld [vmem:[%s3970_s23 + $0x110] sm:$0xff]  ;;  %v2763_v59 = vld [vmem:[%s3971_s24 + $0x8] sm:$0xff]  ;;  %3973 = vst [vmem:[#allocation3_spill] sm:$0xff] %v2779_v0 }
  0x20   :  { %1861 = vmatpush3.msra.mxu1 %v106_v35  ;;  %1827 = vmatprep.subr.mxu0 %v89_v36  ;;  %v68_v60 = vld [vmem:[%s3970_s23 + $0x8] sm:$0xff]  ;;  %v83_v62 = vld [vmem:[%s3970_s23 + $0x80] sm:$0xff]  ;;  %v2786_v2 = vcombine.high %v2763_v59, %v2763_v59  ;;  %v288_v5 = vld [vmem:[%s3974_s29 + $0x18] sm:$0xff] }
  0x21   :  { %1862 = vmatprep.subr.mxu1 %v121_v37  ;;  %1828 = vmatpush3.msra.mxu0 %v73_v38  ;;  %v100_v61 = vld [vmem:[%s3970_s23 + $0x108] sm:$0xff]  ;;  %v115_v63 = vld [vmem:[%s3970_s23 + $0x180] sm:$0xff]  ;;  %v287_v6 = vld [vmem:[%s3974_s29 + $0x10] sm:$0xff] }
  0x22   :  { %1863 = vmatpush3.msra.mxu1 %v105_v39  ;;  %1829 = vmatprep.subr.mxu0 %v88_v40  ;;  %v67_v1 = vld [vmem:[%s3970_s23] sm:$0xff]  ;;  %v286_v7 = vld [vmem:[%s3974_s29 + $0x8] sm:$0xff]  ;;  %v374_v9 = vld [vmem:[%s3975_s11 + $0x18] sm:$0xff] }
  0x23   :  { %1864 = vmatprep.subr.mxu1 %v120_v41  ;;  %1830 = vmatpush3.msra.mxu0 %v72_v42  ;;  %v99_v3 = vld [vmem:[%s3970_s23 + $0x100] sm:$0xff]  ;;  %v373_v10 = vld [vmem:[%s3975_s11 + $0x10] sm:$0xff]  ;;  %v372_v21 = vld [vmem:[%s3975_s11 + $0x8] sm:$0xff] }
  0x24   :  { %1865 = vmatpush3.msra.mxu1 %v104_v43  ;;  %1831 = vmatprep.subr.mxu0 %v87_v44  ;;  %v285_v8 = vld [vmem:[%s3974_s29] sm:$0xff]  ;;  %s3976_s29 = sld [smem:[#allocation61_spill]]  ;;  %v2848_v24 = vld [vmem:[%s3840_s13 + $0xf8] sm:$0xff]  ;;  %v2870_v28 = vld [vmem:[%s3840_s13 + $0x1f0] sm:$0xff] }
  0x25   :  { %1866 = vmatprep.subr.mxu1 %v119_v45  ;;  %1832 = vmatpush3.msra.mxu0 %v71_v46  ;;  %v371_v22 = vld [vmem:[%s3975_s11] sm:$0xff]  ;;  %v2853_v25 = vld [vmem:[%s3840_s13 + $0x1f8] sm:$0xff]  ;;  %v2877_v29 = vld [vmem:[%s3840_s13 + $0x170] sm:$0xff] }
  0x26   :  { %1867 = vmatpush3.msra.mxu1 %v103_v47  ;;  %1833 = vmatprep.subr.mxu0 %v86_v48  ;;  %v2841_v23 = vld [vmem:[%s3839_s14] sm:$0x3]  ;;  %3978 = vst [vmem:[#allocation5_spill] sm:$0xff] %v2853_v25  ;;  %v2864_v27 = vld [vmem:[%s3840_s13 + $0x178] sm:$0xff]  ;;  %v2883_v30 = vld [vmem:[%s3840_s13 + $0x1e8] sm:$0xff] }
  0x27   :  { %1868 = vmatprep.subr.mxu1 %v118_v49  ;;  %1834 = vmatpush3.msra.mxu0 %v70_v50  ;;  %3977 = vst [vmem:[#allocation4_spill] sm:$0xff] %v2841_v23  ;;  %v606_v26 = vld [vmem:[%s3841_s1] sm:$0x3]  ;;  %v2889_v31 = vld [vmem:[%s3840_s13 + $0x168] sm:$0xff]  ;;  %v2907_v34 = vld [vmem:[%s3840_s13 + $0x1d8] sm:$0xff] }
  0x28   :  { %1869 = vmatpush3.msra.mxu1 %v102_v51  ;;  %1835 = vmatprep.subr.mxu0 %v85_v52  ;;  %v2895_v32 = vld [vmem:[%s3840_s13 + $0x1e0] sm:$0xff]  ;;  %v2913_v35 = vld [vmem:[%s3840_s13 + $0x158] sm:$0xff]  ;;  %v2919_v36 = vld [vmem:[%s3840_s13 + $0x1d0] sm:$0xff] }
  0x29   :  { %1870 = vmatprep.subr.mxu1 %v117_v53  ;;  %1836 = vmatpush3.msra.mxu0 %v69_v54  ;;  %v2901_v33 = vld [vmem:[%s3840_s13 + $0x160] sm:$0xff]  ;;  %v2925_v37 = vld [vmem:[%s3840_s13 + $0x150] sm:$0xff]  ;;  %v2931_v38 = vld [vmem:[%s3840_s13 + $0x1c8] sm:$0xff] }
  0x2a   :  { %1871 = vmatpush3.msra.mxu1 %v101_v55  ;;  %1837 = vmatprep.subr.mxu0 %v84_v57  ;;  %v1792_v13 = vld [vmem:[%s3976_s29] ss:$0 sm:$0xff]  ;;  %v2937_v39 = vld [vmem:[%s3840_s13 + $0x148] sm:$0xff]  ;;  %v2955_v42 = vld [vmem:[%s3840_s13 + $0x1b8] sm:$0xff] }
  0x2b   :  { %1872 = vmatprep.subr.mxu1 %v116_v58  ;;  %1838 = vmatpush3.msra.mxu0 %v68_v60  ;;  %v2943_v40 = vld [vmem:[%s3840_s13 + $0x1c0] sm:$0xff]  ;;  %v2961_v43 = vld [vmem:[%s3840_s13 + $0x138] sm:$0xff]  ;;  %v2967_v44 = vld [vmem:[%s3840_s13 + $0x1b0] sm:$0xff] }
  0x2c   :  { %1873 = vmatpush3.msra.mxu1 %v100_v61  ;;  %1839 = vmatprep.subr.mxu0 %v83_v62  ;;  %v2949_v41 = vld [vmem:[%s3840_s13 + $0x140] sm:$0xff]  ;;  %v2973_v45 = vld [vmem:[%s3840_s13 + $0x130] sm:$0xff]  ;;  %v2979_v46 = vld [vmem:[%s3840_s13 + $0x1a8] sm:$0xff] }
  0x2d   :  { %1874 = vmatprep.subr.mxu1 %v115_v63  ;;  %1840 = vmatpush3.msra.mxu0 %v67_v1  ;;  %v2985_v47 = vld [vmem:[%s3840_s13 + $0x128] sm:$0xff]  ;;  %v2991_v48 = vld [vmem:[%s3840_s13 + $0x1a0] sm:$0xff]  ;;  %v3003_v50 = vld [vmem:[%s3840_s13 + $0x198] sm:$0xff] }
  0x2e   :  { %208 = vmatprep.mubr.f32.mxu0 %v2779_v0  ;;  %1875 = vmatpush3.msra.mxu1 %v99_v3  ;;  %v2997_v49 = vld [vmem:[%s3840_s13 + $0x120] sm:$0xff]  ;;  %v3009_v51 = vld [vmem:[%s3840_s13 + $0x118] sm:$0xff]  ;;  %v3015_v52 = vld [vmem:[%s3840_s13 + $0x190] sm:$0xff] }
  0x2f   :  { %278 = vmatprep.mubr.f32.mxu1 %v2786_v2  ;;  %209 = vmatmul.mubr.f32.vlgmr.msra.gmra.mxu0 %v2752_v56  ;;  %v3021_v53 = vld [vmem:[%s3840_s13 + $0x110] sm:$0xff]  ;;  %v3027_v54 = vld [vmem:[%s3840_s13 + $0x188] sm:$0xff]  ;;  %v3039_v57 = vld [vmem:[%s3840_s13 + $0x180] sm:$0xff] }
  0x30   :  { %279 = vmatmul.mubr.f32.vlgmr.msra.gmra.mxu1 %v2763_v59  ;;  %2207 = vmatprep.subr.mxu0 %v3859_v4  ;;  %v3033_v55 = vld [vmem:[%s3840_s13 + $0x108] sm:$0xff]  ;;  %v3045_v58 = vld [vmem:[%s3840_s13 + $0x100] sm:$0xff] }
  0x31   :  { %2218 = vmatprep.subr.mxu1 %v3859_v4  ;;  %2208 = vmatpush3.msra.mxu0 %v288_v5  ;;  %v3053_v60 = vld [vmem:[%s3842_s2] sm:$0xf]  ;;  %v3065_v5 = vld [vmem:[%s3840_s13 + $0x78] sm:$0xff] }
  0x32   :  { %2209 = vmatprep.subr.mxu0 %v3859_v4  ;;  %2215 = vmatprep.mubr.msk.f32.mxu0 %vm2471_vm0, %v3859_v4  ;;  %v1793_v61 = vld [vmem:[%s3843_s10] ss:$0 sm:$0xff]  ;;  %3979 = vst [vmem:[#allocation6_spill] sm:$0xff] %v3065_v5 }
  0x33   :  { %2210 = vmatpush3.msra.mxu0 %v287_v6  ;;  %2226 = vmatprep.mubr.msk.f32.mxu1 %vm2471_vm0, %v3859_v4  ;;  %v3070_v6 = vld [vmem:[%s3840_s13 + $0xf0] sm:$0xff] }
  0x34   :  { %2211 = vmatprep.subr.mxu0 %v3859_v4  ;;  %2219 = vmatpush3.msra.mxu1 %v374_v9  ;;  %3980 = vst [vmem:[#allocation7_spill] sm:$0xff] %v3070_v6  ;;  %v3089_v9 = vld [vmem:[%s3840_s13 + $0x68] sm:$0xff] }
  0x35   :  { %2212 = vmatpush3.msra.mxu0 %v286_v7  ;;  %2220 = vmatprep.subr.mxu1 %v3859_v4  ;;  %v3076_v7 = vld [vmem:[%s3840_s13 + $0x70] sm:$0xff]  ;;  %3983 = vst [vmem:[#allocation10_spill] sm:$0xff] %v3089_v9 }
  0x36   :  { %2213 = vmatprep.subr.mxu0 %v3859_v4  ;;  %2221 = vmatpush3.msra.mxu1 %v373_v10  ;;  %3981 = vst [vmem:[#allocation8_spill] sm:$0xff] %v3076_v7  ;;  %v3095_v10 = vld [vmem:[%s3840_s13 + $0xe0] sm:$0xff] }
  0x37   :  { %2214 = vmatpush3.msra.mxu0 %v285_v8  ;;  %2222 = vmatprep.subr.mxu1 %v3859_v4  ;;  %v3082_v8 = vld [vmem:[%s3840_s13 + $0xe8] sm:$0xff]  ;;  %3984 = vst [vmem:[#allocation11_spill] sm:$0xff] %v3095_v10 }
  0x38   :  { %2229 = vmatprep.subr.mxu0 %v3859_v4  ;;  %2223 = vmatpush3.msra.mxu1 %v372_v21  ;;  %3982 = vst [vmem:[#allocation9_spill] sm:$0xff] %v3082_v8  ;;  %v3161_v21 = vld [vmem:[%s3840_s13 + $0x38] sm:$0xff] }
  0x39   :  { %2224 = vmatprep.subr.mxu1 %v3859_v4  ;;  %461 = vrot.lane.b32.xlu0 %v3053_v60, %s2472_s28  ;;  %3995 = vst [vmem:[#allocation22_spill] sm:$0xff] %v3161_v21 }
  0x3a   :  { %2225 = vmatpush3.msra.mxu1 %v371_v22  ;;  %v3167_v22 = vld [vmem:[%s3840_s13 + $0xb0] sm:$0xff] }
  0x3b   :  { %1891 = vmatprep.subr.mxu1 %v2848_v24  ;;  %3996 = vst [vmem:[#allocation23_spill] sm:$0xff] %v3167_v22 }
  0xef   :  { %v1841_v11 = vpop.f32.mrf.mxu0 }
  0xf0   :  { %v1876_v12 = vpop.f32.mrf.mxu1 }
  0xf1   :  { %v1842_v14 = vpop.f32.mrf.mxu0 }
  0xf2   :  { %v1877_v15 = vpop.f32.mrf.mxu1  ;;  %v1843_v16 = vadd.f32 %v1842_v14, %v1841_v11  ;;  %v3101_v11 = vld [vmem:[%s3840_s13 + $0x60] sm:$0xff]  ;;  %v3119_v14 = vld [vmem:[%s3840_s13 + $0xd0] sm:$0xff] }
  0xf3   :  { %v1878_v18 = vadd.f32 %v1877_v15, %v1876_v12  ;;  %3985 = vst [vmem:[#allocation12_spill] sm:$0xff] %v3101_v11  ;;  %v3107_v12 = vld [vmem:[%s3840_s13 + $0xd8] sm:$0xff]  ;;  %3988 = vst [vmem:[#allocation15_spill] sm:$0xff] %v3119_v14  ;;  %v3125_v15 = vld [vmem:[%s3840_s13 + $0x50] sm:$0xff] }
  0xf4   :  { %v211_v17 = vadd.f32 %v1843_v16, %v1792_v13  ;;  %3986 = vst [vmem:[#allocation13_spill] sm:$0xff] %v3107_v12  ;;  %v3113_v13 = vld [vmem:[%s3840_s13 + $0x58] sm:$0xff]  ;;  %3989 = vst [vmem:[#allocation16_spill] sm:$0xff] %v3125_v15  ;;  %v3131_v16 = vld [vmem:[%s3840_s13 + $0xc8] sm:$0xff] }
  0xf5   :  { %3987 = vst [vmem:[#allocation14_spill] sm:$0xff] %v3113_v13  ;;  %3990 = vst [vmem:[#allocation17_spill] sm:$0xff] %v3131_v16 }
  0xf6   :  { %v281_v19 = vadd.f32 %v1878_v18, %v211_v17  ;;  %v3137_v17 = vld [vmem:[%s3840_s13 + $0x48] sm:$0xff]  ;;  %v3143_v18 = vld [vmem:[%s3840_s13 + $0xc0] sm:$0xff] }
  0xf7   :  { %3991 = vst [vmem:[#allocation18_spill] sm:$0xff] %v3137_v17  ;;  %3992 = vst [vmem:[#allocation19_spill] sm:$0xff] %v3143_v18 }
  0xf8   :  { %v284_v20 = vmax.f32 %v281_v19, 0.0  ;;  %v3149_v19 = vld [vmem:[%s3840_s13 + $0x40] sm:$0xff] }
  0xf9   :  { %3993 = vst [vmem:[#allocation20_spill] sm:$0xff] %v3149_v19 }
  0xfa   :  { %2216 = vmatmul.mubr.msk.f32.vlgmr.msra.gmra.mxu0 %vm296_vm1, %v284_v20  ;;  %v3155_v20 = vld [vmem:[%s3840_s13 + $0xb8] sm:$0xff] }
  0xfb   :  { %2231 = vmatprep.mubr.msk.f32.mxu0 %vm2471_vm0, %v3859_v4  ;;  %2230 = vmatpush3.msk.msra.mxu0 %vm611_vm2, %v2841_v23  ;;  %3994 = vst [vmem:[#allocation21_spill] sm:$0xff] %v3155_v20 }
  0xfc   :  { %1926 = vmatprep.subr.mxu0 %v2853_v25 }
  0xfe   :  { %2232 = vmatmul.mubr.msk.f32.vlgmr.msra.gmra.mxu0 %vm607_vm3, %v606_v26  ;;  %v3173_v26 = vld [vmem:[%s3840_s13 + $0x30] sm:$0xff] }
  0xff   :  { %1927 = vmatpush3.msra.mxu0 %v2864_v27  ;;  %819 = vmatprep.mubr.f32.mxu0 %v2786_v2  ;;  %3997 = vst [vmem:[#allocation24_spill] sm:$0xff] %v3173_v26 }
 0x100   :  { %1928 = vmatprep.subr.mxu0 %v2870_v28 }
 0x101   :  { %1929 = vmatpush3.msra.mxu0 %v2877_v29 }
 0x102   :  { %1930 = vmatprep.subr.mxu0 %v2883_v30 }
 0x103   :  { %1931 = vmatpush3.msra.mxu0 %v2889_v31 }
 0x104   :  { %1932 = vmatprep.subr.mxu0 %v2895_v32 }
 0x105   :  { %1933 = vmatpush3.msra.mxu0 %v2901_v33 }
 0x106   :  { %1934 = vmatprep.subr.mxu0 %v2907_v34 }
 0x107   :  { %1935 = vmatpush3.msra.mxu0 %v2913_v35 }
 0x108   :  { %1936 = vmatprep.subr.mxu0 %v2919_v36 }
 0x109   :  { %1937 = vmatpush3.msra.mxu0 %v2925_v37 }
 0x10a   :  { %1938 = vmatprep.subr.mxu0 %v2931_v38 }
 0x10b   :  { %1939 = vmatpush3.msra.mxu0 %v2937_v39 }
 0x10c   :  { %1940 = vmatprep.subr.mxu0 %v2943_v40 }
 0x10d   :  { %1941 = vmatpush3.msra.mxu0 %v2949_v41 }
 0x10e   :  { %1942 = vmatprep.subr.mxu0 %v2955_v42 }
 0x10f   :  { %1943 = vmatpush3.msra.mxu0 %v2961_v43 }
 0x110   :  { %1944 = vmatprep.subr.mxu0 %v2967_v44 }
 0x111   :  { %1945 = vmatpush3.msra.mxu0 %v2973_v45 }
 0x112   :  { %1946 = vmatprep.subr.mxu0 %v2979_v46 }
 0x113   :  { %1947 = vmatpush3.msra.mxu0 %v2985_v47 }
 0x114   :  { %1948 = vmatprep.subr.mxu0 %v2991_v48 }
 0x115   :  { %1949 = vmatpush3.msra.mxu0 %v2997_v49 }
 0x116   :  { %1950 = vmatprep.subr.mxu0 %v3003_v50 }
 0x117   :  { %1951 = vmatpush3.msra.mxu0 %v3009_v51 }
 0x118   :  { %1952 = vmatprep.subr.mxu0 %v3015_v52 }
 0x119   :  { %1953 = vmatpush3.msra.mxu0 %v3021_v53 }
 0x11a   :  { %1954 = vmatprep.subr.mxu0 %v3027_v54 }
 0x11b   :  { %1955 = vmatpush3.msra.mxu0 %v3033_v55 }
 0x11c   :  { %1956 = vmatprep.subr.mxu0 %v3039_v57 }
 0x11d   :  { %1957 = vmatpush3.msra.mxu0 %v3045_v58 }
 0x11e   :  { %820 = vmatmul.mubr.f32.vlgmr.msra.gmra.mxu0 %v2763_v59  ;;  %2269 = vmatprep.subr.mxu0 %v3859_v4 }
 0x11f   :  { %2301 = vmatprep.mubr.msk.f32.mxu0 %vm2471_vm0, %v3859_v4  ;;  %v3209_v4 = vld [vmem:[%s3840_s13 + $0x18] sm:$0xff] }
 0x120   :  { %4003 = vst [vmem:[#allocation30_spill] sm:$0xff] %v3209_v4 }
 0x1ba   :  { %v366_v62 = vpop.f32.mrf.mxu0 }
 0x1bb   :  { %v367_v63 = vadd.f32 %v1793_v61, %v366_v62  ;;  %v3179_v61 = vld [vmem:[%s3840_s13 + $0xa8] sm:$0xff] }
 0x1bc   :  { %v2217_v1 = vpop.f32.mrf.mxu0  ;;  %3998 = vst [vmem:[#allocation25_spill] sm:$0xff] %v3179_v61  ;;  %v3185_v62 = vld [vmem:[%s3840_s13 + $0x28] sm:$0xff] }
 0x1bd   :  { %v370_v3 = vmax.f32 %v367_v63, 0.0  ;;  %3999 = vst [vmem:[#allocation26_spill] sm:$0xff] %v3185_v62  ;;  %v3191_v63 = vld [vmem:[%s3840_s13 + $0xa0] sm:$0xff] }
 0x1be   :  { %4000 = vst [vmem:[#allocation27_spill] sm:$0xff] %v3191_v63  ;;  %v3197_v1 = vld [vmem:[%s3840_s13 + $0x20] sm:$0xff] }
 0x1bf   :  { %2227 = vmatmul.mubr.msk.f32.vlgmr.msra.gmra.mxu1 %vm296_vm1, %v370_v3  ;;  %4001 = vst [vmem:[#allocation28_spill] sm:$0xff] %v3197_v1  ;;  %v3203_v3 = vld [vmem:[%s3840_s13 + $0x98] sm:$0xff] }
 0x1c0   :  { %1892 = vmatpush3.msra.mxu1 %v3065_v5  ;;  %749 = vmatprep.mubr.f32.mxu1 %v2779_v0  ;;  %4002 = vst [vmem:[#allocation29_spill] sm:$0xff] %v3203_v3 }
 0x1c1   :  { %1893 = vmatprep.subr.mxu1 %v3070_v6 }
 0x1c2   :  { %1894 = vmatpush3.msra.mxu1 %v3076_v7 }
 0x1c3   :  { %1895 = vmatprep.subr.mxu1 %v3082_v8 }
 0x1c4   :  { %1896 = vmatpush3.msra.mxu1 %v3089_v9 }
 0x1c5   :  { %1897 = vmatprep.subr.mxu1 %v3095_v10  ;;  %v1798_v10 = vld [vmem:[%s3849_s6] ss:$0 sm:$0xff] }
 0x1c6   :  { %1898 = vmatpush3.msra.mxu1 %v3101_v11 }
 0x1c7   :  { %1899 = vmatprep.subr.mxu1 %v3107_v12  ;;  %v1797_v12 = vld [vmem:[%s3848_s5] ss:$0 sm:$0xff] }
 0x1c8   :  { %1900 = vmatpush3.msra.mxu1 %v3113_v13 }
 0x1c9   :  { %1901 = vmatprep.subr.mxu1 %v3119_v14 }
 0x1ca   :  { %1902 = vmatpush3.msra.mxu1 %v3125_v15 }
 0x1cb   :  { %1903 = vmatprep.subr.mxu1 %v3131_v16 }
 0x1cc   :  { %1904 = vmatpush3.msra.mxu1 %v3137_v17 }
 0x1cd   :  { %1905 = vmatprep.subr.mxu1 %v3143_v18 }
 0x1ce   :  { %1906 = vmatpush3.msra.mxu1 %v3149_v19 }
 0x1cf   :  { %1907 = vmatprep.subr.mxu1 %v3155_v20  ;;  %v462_v20 = vpop.permute.xlu0 %461 }
 0x1d0   :  { %1908 = vmatpush3.msra.mxu1 %v3161_v21 }
 0x1d1   :  { %1909 = vmatprep.subr.mxu1 %v3167_v22 }
 0x1d2   :  { %1910 = vmatpush3.msra.mxu1 %v3173_v26  ;;  %v3259_v26 = vld [vmem:[%s3844_s16 + $0x78] sm:$0xff] }
 0x1d3   :  { %1911 = vmatprep.subr.mxu1 %v3179_v61  ;;  %v3215_v61 = vld [vmem:[%s3840_s13 + $0x90] sm:$0xff]  ;;  %4011 = vst [vmem:[#allocation37_spill] sm:$0xff] %v3259_v26 }
 0x1d4   :  { %1912 = vmatpush3.msra.mxu1 %v3185_v62  ;;  %4004 = vst [vmem:[#allocation31_spill] sm:$0xff] %v3215_v61  ;;  %v3221_v62 = vld [vmem:[%s3840_s13 + $0x10] sm:$0xff] }
 0x1d5   :  { %1913 = vmatprep.subr.mxu1 %v3191_v63  ;;  %4005 = vst [vmem:[#allocation32_spill] sm:$0xff] %v3221_v62  ;;  %v3227_v63 = vld [vmem:[%s3840_s13 + $0x88] sm:$0xff] }
 0x1d6   :  { %1914 = vmatpush3.msra.mxu1 %v3197_v1  ;;  %4006 = vst [vmem:[#allocation33_spill] sm:$0xff] %v3227_v63  ;;  %v3233_v1 = vld [vmem:[%s3840_s13 + $0x8] sm:$0xff] }
 0x1d7   :  { %1915 = vmatprep.subr.mxu1 %v3203_v3  ;;  %4007 = vst [vmem:[#allocation34_spill] sm:$0xff] %v3233_v1  ;;  %v3239_v3 = vld [vmem:[%s3840_s13 + $0x80] sm:$0xff] }
 0x1d8   :  { %1916 = vmatpush3.msra.mxu1 %v3209_v4  ;;  %4008 = vst [vmem:[#allocation35_spill] sm:$0xff] %v3239_v3  ;;  %v3245_v4 = vld [vmem:[%s3840_s13] sm:$0xff] }
 0x1d9   :  { %1917 = vmatprep.subr.mxu1 %v3215_v61  ;;  %4009 = vst [vmem:[#allocation36_spill] sm:$0xff] %v3245_v4  ;;  %v3254_v61 = vpop.f32.mrf.mxu0 }
 0x1da   :  { %1918 = vmatpush3.msra.mxu1 %v3221_v62  ;;  %v4010_v62 = vmov 0.0  }
 0x1db   :  { %1919 = vmatprep.subr.mxu1 %v3227_v63  ;;  %v2233_v63 = vpop.f32.mrf.mxu0 }
 0x1dc   :  { %1920 = vmatpush3.msra.mxu1 %v3233_v1  ;;  %v3278_v63 = vld [vmem:[%s3844_s16 + $0x60] sm:$0xff] }
 0x1dd   :  { %1921 = vmatprep.subr.mxu1 %v3239_v3  ;;  %v3264_v3 = vld [vmem:[%s3844_s16 + $0x70] sm:$0xff]  ;;  %4014 = vst [vmem:[#allocation40_spill] sm:$0xff] %v3278_v63 }
 0x1de   :  { %1922 = vmatpush3.msra.mxu1 %v3245_v4  ;;  %4012 = vst [vmem:[#allocation38_spill] sm:$0xff] %v3264_v3  ;;  %v1958_v18 = vpop.f32.mrf.mxu0 }
 0x1df   :  { %750 = vmatmul.mubr.f32.vlgmr.msra.gmra.mxu1 %v2752_v56  ;;  %2234 = vmatprep.subr.mxu1 %v4010_v62  ;;  %v3271_v56 = vld [vmem:[%s3844_s16 + $0x68] sm:$0xff] }
 0x1e0   :  { %2266 = vmatprep.mubr.msk.f32.mxu1 %vm2471_vm0, %v4010_v62  ;;  %2235 = vmatpush3.msra.mxu1 %v3259_v26  ;;  %4013 = vst [vmem:[#allocation39_spill] sm:$0xff] %v3271_v56  ;;  %v3285_v26 = vld [vmem:[%s3844_s16 + $0x58] sm:$0xff]  ;;  %v1959_v15 = vpop.f32.mrf.mxu0 }
 0x1e1   :  { %2236 = vmatprep.subr.mxu1 %v4010_v62  ;;  %4015 = vst [vmem:[#allocation41_spill] sm:$0xff] %v3285_v26 }
 0x1e2   :  { %2237 = vmatpush3.msra.mxu1 %v3264_v3  ;;  %v3294_v3 = vld [vmem:[%s3844_s16 + $0x50] sm:$0xff] }
 0x1e3   :  { %2238 = vmatprep.subr.mxu1 %v4010_v62  ;;  %4016 = vst [vmem:[#allocation42_spill] sm:$0xff] %v3294_v3 }
 0x1e4   :  { %2239 = vmatpush3.msra.mxu1 %v3271_v56  ;;  %v3299_v56 = vld [vmem:[%s3844_s16 + $0x48] sm:$0xff] }
 0x1e5   :  { %2240 = vmatprep.subr.mxu1 %v4010_v62  ;;  %4017 = vst [vmem:[#allocation43_spill] sm:$0xff] %v3299_v56 }
 0x1e6   :  { %2241 = vmatpush3.msra.mxu1 %v3278_v63  ;;  %v3313_v63 = vld [vmem:[%s3844_s16 + $0x38] sm:$0xff] }
 0x1e7   :  { %2242 = vmatprep.subr.mxu1 %v4010_v62  ;;  %4019 = vst [vmem:[#allocation45_spill] sm:$0xff] %v3313_v63 }
 0x1e8   :  { %2243 = vmatpush3.msra.mxu1 %v3285_v26  ;;  %v3306_v26 = vld [vmem:[%s3844_s16 + $0x40] sm:$0xff] }
 0x1e9   :  { %2244 = vmatprep.subr.mxu1 %v4010_v62  ;;  %4018 = vst [vmem:[#allocation44_spill] sm:$0xff] %v3306_v26 }
 0x1ea   :  { %2245 = vmatpush3.msra.mxu1 %v3294_v3  ;;  %v3322_v3 = vld [vmem:[%s3844_s16 + $0x30] sm:$0xff] }
 0x1eb   :  { %2246 = vmatprep.subr.mxu1 %v4010_v62  ;;  %4020 = vst [vmem:[#allocation46_spill] sm:$0xff] %v3322_v3 }
 0x1ec   :  { %2247 = vmatpush3.msra.mxu1 %v3299_v56  ;;  %v3329_v56 = vld [vmem:[%s3844_s16 + $0x28] sm:$0xff] }
 0x1ed   :  { %2248 = vmatprep.subr.mxu1 %v4010_v62  ;;  %4021 = vst [vmem:[#allocation47_spill] sm:$0xff] %v3329_v56 }
 0x1ee   :  { %2249 = vmatpush3.msra.mxu1 %v3306_v26 }
 0x1ef   :  { %2250 = vmatprep.subr.mxu1 %v4010_v62 }
 0x1f0   :  { %2251 = vmatpush3.msra.mxu1 %v3313_v63  ;;  %v3336_v63 = vld [vmem:[%s3844_s16 + $0x20] sm:$0xff] }
 0x1f1   :  { %2252 = vmatprep.subr.mxu1 %v4010_v62  ;;  %4022 = vst [vmem:[#allocation48_spill] sm:$0xff] %v3336_v63 }
 0x1f2   :  { %2253 = vmatpush3.msra.mxu1 %v3322_v3  ;;  %v3343_v3 = vld [vmem:[%s3844_s16 + $0x18] sm:$0xff] }
 0x1f3   :  { %2254 = vmatprep.subr.mxu1 %v4010_v62  ;;  %4023 = vst [vmem:[#allocation49_spill] sm:$0xff] %v3343_v3 }
 0x1f4   :  { %2255 = vmatpush3.msra.mxu1 %v3329_v56  ;;  %v3350_v56 = vld [vmem:[%s3844_s16 + $0x10] sm:$0xff] }
 0x1f5   :  { %2256 = vmatprep.subr.mxu1 %v4010_v62  ;;  %4024 = vst [vmem:[#allocation50_spill] sm:$0xff] %v3350_v56 }
 0x1f6   :  { %2257 = vmatpush3.msra.mxu1 %v3336_v63  ;;  %v3357_v63 = vld [vmem:[%s3844_s16 + $0x8] sm:$0xff] }
 0x1f7   :  { %2258 = vmatprep.subr.mxu1 %v4010_v62  ;;  %4025 = vst [vmem:[#allocation51_spill] sm:$0xff] %v3357_v63 }
 0x1f8   :  { %2259 = vmatpush3.msra.mxu1 %v3343_v3  ;;  %v3364_v3 = vld [vmem:[%s3844_s16] sm:$0xff]  ;;  %s2474_s16 = smov 127  }
 0x1f9   :  { %2260 = vmatprep.subr.mxu1 %v4010_v62  ;;  %4026 = vst [vmem:[#allocation52_spill] sm:$0xff] %v3364_v3 }
 0x1fa   :  { %2261 = vmatpush3.msra.mxu1 %v3350_v56  ;;  %v1795_v56 = vld [vmem:[%s3845_s12] ss:$0 sm:$0xff] }
 0x1fb   :  { %2262 = vmatprep.subr.mxu1 %v4010_v62 }
 0x1fc   :  { %2263 = vmatpush3.msra.mxu1 %v3357_v63 }
 0x1fd   :  { %2264 = vmatprep.subr.mxu1 %v4010_v62 }
 0x1fe   :  { %2265 = vmatpush3.msra.mxu1 %v3364_v3 }
 0x1ff   :  { %2304 = vmatprep.subr.mxu1 %v4010_v62 }
 0x27f   :  { %v451_v26 = vpop.f32.mrf.mxu1 }
 0x280   :  { %v3371_v4 = vadd.f32 %v1795_v56, %v451_v26 }
 0x281   :  { %v2228_v1 = vpop.f32.mrf.mxu1 }
 0x282   :  { %v455_v63 = vmax.f32 %v3371_v4, -20.0  ;;  %v1960_v1 = vadd.f32 %v1959_v15, %v1958_v18  ;;  %v3391_v15 = vld [vmem:[%s3847_s18 + $0x78] sm:$0xff] }
 0x283   :  { %2270 = vmatpush3.msra.mxu0 %v3391_v15  ;;  %v3417_v18 = vld [vmem:[%s3847_s18 + $0x58] sm:$0xff] }
 0x284   :  { %v456_v22 = vmin.f32 %v455_v63, 2.0  ;;  %v3380_v63 = vld [vmem:[%s3846_s15] ss:$0 sm:$0xff]  ;;  %2271 = vmatprep.subr.mxu0 %v4010_v62 }
 0x285   :  { %4027 = vst [vmem:[#allocation53_spill] sm:$0xff] %v3380_v63 }
 0x286   :  { %490 = vrot.lane.b32.xlu1 %v456_v22, %s2473_s9  ;;  %v457_v21 = vmul.f32 1.442695, %v456_v22 }
 0x288   :  { %2462 = vpow2.f32 %v457_v21 }
 0x295   :  { %v2463_v3 = vpop.eup %2462 }
 0x296   :  { %v464_v19 = vmul.f32 %v2463_v3, %v462_v20  ;;  %v3431_v20 = vld [vmem:[%s3847_s18 + $0x48] sm:$0xff]  ;;  %v3445_v3 = vld [vmem:[%s3847_s18 + $0x38] sm:$0xff] }
 0x298   :  { %466 = vrot.lane.b32.xlu0 %v464_v19, %s2473_s9  ;;  %v3424_v19 = vld [vmem:[%s3847_s18 + $0x50] sm:$0xff] }
 0x29f   :  { %v1923_v17 = vpop.f32.mrf.mxu1 }
 0x2a1   :  { %v1924_v16 = vpop.f32.mrf.mxu1 }
 0x2a2   :  { %v1925_v56 = vadd.f32 %v1924_v16, %v1923_v17  ;;  %v3396_v16 = vld [vmem:[%s3847_s18 + $0x70] sm:$0xff]  ;;  %v3410_v17 = vld [vmem:[%s3847_s18 + $0x60] sm:$0xff] }
 0x2a3   :  { %2272 = vmatpush3.msra.mxu0 %v3396_v16 }
 0x2a4   :  { %v752_v26 = vadd.f32 %v1925_v56, %v3254_v61  ;;  %2273 = vmatprep.subr.mxu0 %v4010_v62  ;;  %v3438_v61 = vld [vmem:[%s3847_s18 + $0x40] sm:$0xff]  ;;  %v3452_v56 = vld [vmem:[%s3847_s18 + $0x30] sm:$0xff] }
 0x2a6   :  { %v822_v22 = vadd.f32 %v1960_v1, %v752_v26  ;;  %v3459_v26 = vld [vmem:[%s3847_s18 + $0x28] sm:$0xff]  ;;  %v3466_v1 = vld [vmem:[%s3847_s18 + $0x20] sm:$0xff] }
 0x2a8   :  { %v831_v21 = vadd.f32 %v3380_v63, %v822_v22  ;;  %v3473_v22 = vld [vmem:[%s3847_s18 + $0x18] sm:$0xff] }
 0x2aa   :  { %v832_v14 = vmax.f32 %v831_v21, 0.0  ;;  %v3480_v21 = vld [vmem:[%s3847_s18 + $0x10] sm:$0xff] }
 0x2ac   :  { %2267 = vmatmul.mubr.f32.vlgmr.msra.gmra.mxu1 %v832_v14  ;;  %v3403_v14 = vld [vmem:[%s3847_s18 + $0x68] sm:$0xff] }
 0x2ad   :  { %2305 = vmatpush3.msk.msra.mxu1 %vm611_vm2, %v2841_v23  ;;  %2306 = vmatprep.mubr.msk.f32.mxu1 %vm2471_vm0, %v4010_v62  ;;  %v3496_v23 = vld [vmem:[%s3847_s18] sm:$0xff] }
 0x2ae   :  { %2032 = vmatprep.subr.mxu1 %v2853_v25  ;;  %2274 = vmatpush3.msra.mxu0 %v3403_v14  ;;  %v3489_v25 = vld [vmem:[%s3847_s18 + $0x8] sm:$0xff]  ;;  %4029 = vst [vmem:[#allocation55_spill] sm:$0xff] %v3496_v23 }
 0x2af   :  { %2275 = vmatprep.subr.mxu0 %v4010_v62  ;;  %4028 = vst [vmem:[#allocation54_spill] sm:$0xff] %v3489_v25 }
 0x2b0   :  { %2276 = vmatpush3.msra.mxu0 %v3410_v17 }
 0x2b1   :  { %2277 = vmatprep.subr.mxu0 %v4010_v62 }
 0x2b2   :  { %2278 = vmatpush3.msra.mxu0 %v3417_v18 }
 0x2b3   :  { %2279 = vmatprep.subr.mxu0 %v4010_v62 }
 0x2b4   :  { %2280 = vmatpush3.msra.mxu0 %v3424_v19 }
 0x2b5   :  { %2281 = vmatprep.subr.mxu0 %v4010_v62 }
 0x2b6   :  { %2282 = vmatpush3.msra.mxu0 %v3431_v20 }
 0x2b7   :  { %2283 = vmatprep.subr.mxu0 %v4010_v62 }
 0x2b8   :  { %2284 = vmatpush3.msra.mxu0 %v3438_v61 }
 0x2b9   :  { %2285 = vmatprep.subr.mxu0 %v4010_v62 }
 0x2ba   :  { %2286 = vmatpush3.msra.mxu0 %v3445_v3 }
 0x2bb   :  { %2287 = vmatprep.subr.mxu0 %v4010_v62 }
 0x2bc   :  { %2288 = vmatpush3.msra.mxu0 %v3452_v56 }
 0x2bd   :  { %2289 = vmatprep.subr.mxu0 %v4010_v62 }
 0x2be   :  { %2290 = vmatpush3.msra.mxu0 %v3459_v26 }
 0x2bf   :  { %2291 = vmatprep.subr.mxu0 %v4010_v62 }
 0x2c0   :  { %2292 = vmatpush3.msra.mxu0 %v3466_v1 }
 0x2c1   :  { %2293 = vmatprep.subr.mxu0 %v4010_v62 }
 0x2c2   :  { %2294 = vmatpush3.msra.mxu0 %v3473_v22 }
 0x2c3   :  { %2295 = vmatprep.subr.mxu0 %v4010_v62 }
 0x2c4   :  { %2296 = vmatpush3.msra.mxu0 %v3480_v21 }
 0x2c5   :  { %2297 = vmatprep.subr.mxu0 %v4010_v62 }
 0x2c6   :  { %2298 = vmatpush3.msra.mxu0 %v3489_v25 }
 0x2c7   :  { %2299 = vmatprep.subr.mxu0 %v4010_v62 }
 0x2c8   :  { %2300 = vmatpush3.msra.mxu0 %v3496_v23 }
 0x2c9   :  { %1997 = vmatprep.subr.mxu0 %v2848_v24 }
 0x30a   :  { %v467_v63 = vpop.permute.xlu0 %466 }
 0x30b   :  { %v469_v13 = vadd.f32 %v467_v63, %v3371_v4 }
 0x30d   :  { %2464 = vtanh.f32 %v469_v13 }
 0x31a   :  { %v2465_v11 = vpop.eup %2464 }
 0x31b   :  { %v479_v9 = vmul.f32 %v2465_v11, %v1797_v12  ;;  %v495_v8 = vmul.f32 %v2465_v11, %v2465_v11 }
 0x31d   :  { %v3507_v7 = vadd.f32 %v1798_v10, %v479_v9  ;;  %v496_v6 = vsub.f32 1.0, %v495_v8  ;;  %v487_v8 = vmul.f32 -0.5, %v3053_v60 }
 0x31f   :  { %2307 = vmatmul.mubr.msk.f32.vlgmr.msra.gmra.mxu1 %vm607_vm3, %v3507_v7  ;;  %v497_v0 = vmul.f32 %v1797_v12, %v496_v6  ;;  %v491_v6 = vpop.permute.xlu1 %490 }
 0x320   :  { %2033 = vmatpush3.msra.mxu1 %v2864_v27  ;;  %1193 = vmatprep.mubr.f32.mxu1 %v2786_v2 }
 0x321   :  { %v498_v4 = vadd.f32 1e-06, %v497_v0  ;;  %2034 = vmatprep.subr.mxu1 %v2870_v28  ;;  %v488_v0 = vmul.f32 %v487_v8, %v3053_v60 }
 0x322   :  { %2035 = vmatpush3.msra.mxu1 %v2877_v29 }
 0x323   :  { %2466 = vlog2.f32 %v498_v4  ;;  %2036 = vmatprep.subr.mxu1 %v2883_v30  ;;  %v493_v9 = vsub.f32 %v488_v0, %v491_v6  ;;  %v4031_v6 = vld [vmem:[#allocation3_spill] sm:$0xff] }
 0x324   :  { %2037 = vmatpush3.msra.mxu1 %v2889_v31 }
 0x325   :  { %2038 = vmatprep.subr.mxu1 %v2895_v32  ;;  %v1799_v60 = vadd.f32 -0.9189385, %v493_v9  ;;  %v4032_v9 = vld [vmem:[#allocation7_spill] sm:$0xff] }
 0x326   :  { %2039 = vmatpush3.msra.mxu1 %v2901_v33 }
 0x327   :  { %2040 = vmatprep.subr.mxu1 %v2907_v34 }
 0x328   :  { %2041 = vmatpush3.msra.mxu1 %v2913_v35 }
 0x329   :  { %2042 = vmatprep.subr.mxu1 %v2919_v36 }
 0x32a   :  { %2043 = vmatpush3.msra.mxu1 %v2925_v37 }
 0x32b   :  { %2044 = vmatprep.subr.mxu1 %v2931_v38 }
 0x32c   :  { %2045 = vmatpush3.msra.mxu1 %v2937_v39 }
 0x32d   :  { %2046 = vmatprep.subr.mxu1 %v2943_v40 }
 0x32e   :  { %2047 = vmatpush3.msra.mxu1 %v2949_v41 }
 0x32f   :  { %2048 = vmatprep.subr.mxu1 %v2955_v42 }
 0x330   :  { %v2467_v10 = vpop.eup %2466  ;;  %2049 = vmatpush3.msra.mxu1 %v2961_v43 }
 0x331   :  { %v500_v11 = vmul.f32 0.6931472, %v2467_v10  ;;  %2050 = vmatprep.subr.mxu1 %v2967_v44  ;;  %v4033_v10 = vld [vmem:[#allocation8_spill] sm:$0xff] }
 0x332   :  { %2051 = vmatpush3.msra.mxu1 %v2973_v45 }
 0x333   :  { %v501_v12 = vsub.f32 %v1799_v60, %v500_v11  ;;  %2052 = vmatprep.subr.mxu1 %v2979_v46  ;;  %v4035_v60 = vld [vmem:[#allocation10_spill] sm:$0xff]  ;;  %v4036_v11 = vld [vmem:[#allocation11_spill] sm:$0xff] }
 0x334   :  { %2053 = vmatpush3.msra.mxu1 %v2985_v47 }
 0x335   :  { %v503_v13 = vsel %vm502_vm4, %v501_v12, 0.0  ;;  %2054 = vmatprep.subr.mxu1 %v2991_v48  ;;  %v4037_v12 = vld [vmem:[#allocation12_spill] sm:$0xff] }
 0x336   :  { %504 = vadd.xlane.f32.xlu1 %v503_v13  ;;  %2055 = vmatpush3.msra.mxu1 %v2997_v49  ;;  %v4038_v13 = vld [vmem:[#allocation13_spill] sm:$0xff] }
 0x337   :  { %2056 = vmatprep.subr.mxu1 %v3003_v50 }
 0x338   :  { %2057 = vmatpush3.msra.mxu1 %v3009_v51 }
 0x339   :  { %2058 = vmatprep.subr.mxu1 %v3015_v52 }
 0x33a   :  { %2059 = vmatpush3.msra.mxu1 %v3021_v53 }
 0x33b   :  { %2060 = vmatprep.subr.mxu1 %v3027_v54 }
 0x33c   :  { %2061 = vmatpush3.msra.mxu1 %v3033_v55 }
 0x33d   :  { %2062 = vmatprep.subr.mxu1 %v3039_v57 }
 0x33e   :  { %2063 = vmatpush3.msra.mxu1 %v3045_v58 }
 0x33f   :  { %1194 = vmatmul.mubr.f32.vlgmr.msra.gmra.mxu1 %v2763_v59  ;;  %2344 = vmatprep.subr.mxu1 %v4010_v62  ;;  %v3584_v59 = vld [vmem:[%s3850_s17] ss:$0 sm:$0xff] }
 0x340   :  { %2345 = vmatpush3.msra.mxu1 %v3391_v15  ;;  %2376 = vmatprep.mubr.msk.f32.mxu1 %vm2471_vm0, %v4010_v62  ;;  %4030 = vst [vmem:[#allocation56_spill] sm:$0xff] %v3584_v59 }
 0x341   :  { %2346 = vmatprep.subr.mxu1 %v4010_v62 }
 0x342   :  { %2347 = vmatpush3.msra.mxu1 %v3396_v16 }
 0x343   :  { %2348 = vmatprep.subr.mxu1 %v4010_v62 }
 0x344   :  { %2349 = vmatpush3.msra.mxu1 %v3403_v14 }
 0x345   :  { %2350 = vmatprep.subr.mxu1 %v4010_v62 }
 0x346   :  { %2351 = vmatpush3.msra.mxu1 %v3410_v17 }
 0x347   :  { %2352 = vmatprep.subr.mxu1 %v4010_v62 }
 0x348   :  { %2353 = vmatpush3.msra.mxu1 %v3417_v18 }
 0x349   :  { %2354 = vmatprep.subr.mxu1 %v4010_v62 }
 0x34a   :  { %2355 = vmatpush3.msra.mxu1 %v3424_v19 }
 0x34b   :  { %2356 = vmatprep.subr.mxu1 %v4010_v62 }
 0x34c   :  { %2357 = vmatpush3.msra.mxu1 %v3431_v20 }
 0x34d   :  { %2358 = vmatprep.subr.mxu1 %v4010_v62 }
 0x34e   :  { %2359 = vmatpush3.msra.mxu1 %v3438_v61 }
 0x34f   :  { %2360 = vmatprep.subr.mxu1 %v4010_v62 }
 0x350   :  { %2361 = vmatpush3.msra.mxu1 %v3445_v3 }
 0x351   :  { %2362 = vmatprep.subr.mxu1 %v4010_v62 }
 0x352   :  { %2363 = vmatpush3.msra.mxu1 %v3452_v56 }
 0x353   :  { %2364 = vmatprep.subr.mxu1 %v4010_v62 }
 0x354   :  { %2365 = vmatpush3.msra.mxu1 %v3459_v26 }
 0x355   :  { %2366 = vmatprep.subr.mxu1 %v4010_v62 }
 0x356   :  { %2367 = vmatpush3.msra.mxu1 %v3466_v1 }
 0x357   :  { %2368 = vmatprep.subr.mxu1 %v4010_v62 }
 0x358   :  { %2369 = vmatpush3.msra.mxu1 %v3473_v22 }
 0x359   :  { %2370 = vmatprep.subr.mxu1 %v4010_v62 }
 0x35a   :  { %2371 = vmatpush3.msra.mxu1 %v3480_v21 }
 0x35b   :  { %2372 = vmatprep.subr.mxu1 %v4010_v62 }
 0x35c   :  { %2373 = vmatpush3.msra.mxu1 %v3489_v25 }
 0x35d   :  { %2374 = vmatprep.subr.mxu1 %v4010_v62 }
 0x35e   :  { %2375 = vmatpush3.msra.mxu1 %v3496_v23 }
 0x35f   :  { %2103 = vmatprep.subr.mxu1 %v2848_v24  ;;  %v4034_v24 = vld [vmem:[#allocation9_spill] sm:$0xff] }
 0x36c   :  { %v905_v63 = vpop.f32.mrf.mxu1 }
 0x36d   :  { %v906_v4 = vadd.f32 %v3584_v59, %v905_v63  ;;  %v4039_v63 = vld [vmem:[#allocation14_spill] sm:$0xff] }
 0x36e   :  { %v2268_v8 = vpop.f32.mrf.mxu1 }
 0x36f   :  { %v909_v0 = vmax.f32 %v906_v4, 0.0  ;;  %v4040_v4 = vld [vmem:[#allocation15_spill] sm:$0xff]  ;;  %v4041_v8 = vld [vmem:[#allocation16_spill] sm:$0xff] }
 0x371   :  { %2302 = vmatmul.mubr.f32.vlgmr.msra.gmra.mxu0 %v909_v0  ;;  %v4042_v0 = vld [vmem:[#allocation17_spill] sm:$0xff] }
 0x372   :  { %1998 = vmatpush3.msra.mxu0 %v3065_v5  ;;  %1123 = vmatprep.mubr.f32.mxu0 %v4031_v6 }
 0x373   :  { %1999 = vmatprep.subr.mxu0 %v4032_v9  ;;  %v4043_v9 = vld [vmem:[#allocation18_spill] sm:$0xff] }
 0x374   :  { %2000 = vmatpush3.msra.mxu0 %v4033_v10  ;;  %v4044_v10 = vld [vmem:[#allocation19_spill] sm:$0xff] }
 0x375   :  { %2001 = vmatprep.subr.mxu0 %v4034_v24  ;;  %v4045_v24 = vld [vmem:[#allocation20_spill] sm:$0xff] }
 0x376   :  { %2002 = vmatpush3.msra.mxu0 %v4035_v60  ;;  %v4046_v60 = vld [vmem:[#allocation21_spill] sm:$0xff] }
 0x377   :  { %2003 = vmatprep.subr.mxu0 %v4036_v11  ;;  %v4047_v11 = vld [vmem:[#allocation22_spill] sm:$0xff] }
 0x378   :  { %2004 = vmatpush3.msra.mxu0 %v4037_v12  ;;  %v4048_v12 = vld [vmem:[#allocation23_spill] sm:$0xff] }
 0x379   :  { %2005 = vmatprep.subr.mxu0 %v4038_v13  ;;  %v4049_v13 = vld [vmem:[#allocation24_spill] sm:$0xff] }
 0x37a   :  { %2006 = vmatpush3.msra.mxu0 %v4039_v63  ;;  %v4050_v63 = vld [vmem:[#allocation25_spill] sm:$0xff] }
 0x37b   :  { %2007 = vmatprep.subr.mxu0 %v4040_v4  ;;  %v4051_v4 = vld [vmem:[#allocation26_spill] sm:$0xff] }
 0x37c   :  { %2008 = vmatpush3.msra.mxu0 %v4041_v8  ;;  %v4052_v8 = vld [vmem:[#allocation27_spill] sm:$0xff] }
 0x37d   :  { %2009 = vmatprep.subr.mxu0 %v4042_v0  ;;  %v4053_v0 = vld [vmem:[#allocation28_spill] sm:$0xff] }
 0x37e   :  { %2010 = vmatpush3.msra.mxu0 %v4043_v9  ;;  %v4054_v9 = vld [vmem:[#allocation29_spill] sm:$0xff] }
 0x37f   :  { %2011 = vmatprep.subr.mxu0 %v4044_v10  ;;  %v4055_v10 = vld [vmem:[#allocation30_spill] sm:$0xff] }
 0x380   :  { %2012 = vmatpush3.msra.mxu0 %v4045_v24  ;;  %v4056_v24 = vld [vmem:[#allocation31_spill] sm:$0xff] }
 0x381   :  { %2013 = vmatprep.subr.mxu0 %v4046_v60  ;;  %v4057_v60 = vld [vmem:[#allocation32_spill] sm:$0xff] }
 0x382   :  { %2014 = vmatpush3.msra.mxu0 %v4047_v11  ;;  %v4058_v11 = vld [vmem:[#allocation33_spill] sm:$0xff] }
 0x383   :  { %2015 = vmatprep.subr.mxu0 %v4048_v12  ;;  %v4059_v12 = vld [vmem:[#allocation34_spill] sm:$0xff] }
 0x384   :  { %2016 = vmatpush3.msra.mxu0 %v4049_v13  ;;  %v4060_v13 = vld [vmem:[#allocation35_spill] sm:$0xff] }
 0x385   :  { %2017 = vmatprep.subr.mxu0 %v4050_v63  ;;  %v4061_v63 = vld [vmem:[#allocation36_spill] sm:$0xff] }
 0x386   :  { %2018 = vmatpush3.msra.mxu0 %v4051_v4  ;;  %v4062_v4 = vld [vmem:[#allocation2_spill] sm:$0xff] }
 0x387   :  { %2019 = vmatprep.subr.mxu0 %v4052_v8 }
 0x388   :  { %2020 = vmatpush3.msra.mxu0 %v4053_v0  ;;  %v4063_v0 = vld [vmem:[#allocation37_spill] sm:$0xff] }
 0x389   :  { %2021 = vmatprep.subr.mxu0 %v4054_v9 }
 0x38a   :  { %2022 = vmatpush3.msra.mxu0 %v4055_v10 }
 0x38b   :  { %2023 = vmatprep.subr.mxu0 %v4056_v24 }
 0x38c   :  { %2024 = vmatpush3.msra.mxu0 %v4057_v60  ;;  %v4064_v60 = vld [vmem:[#allocation38_spill] sm:$0xff] }
 0x38d   :  { %2025 = vmatprep.subr.mxu0 %v4058_v11 }
 0x38e   :  { %2026 = vmatpush3.msra.mxu0 %v4059_v12  ;;  %v4065_v12 = vld [vmem:[#allocation39_spill] sm:$0xff] }
 0x38f   :  { %2027 = vmatprep.subr.mxu0 %v4060_v13  ;;  %v4069_v13 = vld [vmem:[#allocation43_spill] sm:$0xff] }
 0x390   :  { %2028 = vmatpush3.msra.mxu0 %v4061_v63  ;;  %v4066_v63 = vld [vmem:[#allocation40_spill] sm:$0xff] }
 0x391   :  { %1124 = vmatmul.mubr.f32.vlgmr.msra.gmra.mxu0 %v4062_v4  ;;  %2309 = vmatprep.subr.mxu0 %v4010_v62  ;;  %v4067_v4 = vld [vmem:[#allocation41_spill] sm:$0xff] }
 0x392   :  { %2310 = vmatpush3.msra.mxu0 %v4063_v0  ;;  %2341 = vmatprep.mubr.msk.f32.mxu0 %vm2471_vm0, %v4010_v62  ;;  %v4068_v0 = vld [vmem:[#allocation42_spill] sm:$0xff] }
 0x393   :  { %2311 = vmatprep.subr.mxu0 %v4010_v62 }
 0x394   :  { %2312 = vmatpush3.msra.mxu0 %v4064_v60  ;;  %v4070_v60 = vld [vmem:[#allocation44_spill] sm:$0xff] }
 0x395   :  { %2313 = vmatprep.subr.mxu0 %v4010_v62 }
 0x396   :  { %2314 = vmatpush3.msra.mxu0 %v4065_v12  ;;  %v4071_v12 = vld [vmem:[#allocation45_spill] sm:$0xff] }
 0x397   :  { %2315 = vmatprep.subr.mxu0 %v4010_v62 }
 0x398   :  { %2316 = vmatpush3.msra.mxu0 %v4066_v63  ;;  %v4072_v63 = vld [vmem:[#allocation46_spill] sm:$0xff] }
 0x399   :  { %2317 = vmatprep.subr.mxu0 %v4010_v62 }
 0x39a   :  { %2318 = vmatpush3.msra.mxu0 %v4067_v4  ;;  %v4073_v4 = vld [vmem:[#allocation47_spill] sm:$0xff] }
 0x39b   :  { %2319 = vmatprep.subr.mxu0 %v4010_v62 }
 0x39c   :  { %2320 = vmatpush3.msra.mxu0 %v4068_v0  ;;  %v4074_v0 = vld [vmem:[#allocation48_spill] sm:$0xff] }
 0x39d   :  { %2321 = vmatprep.subr.mxu0 %v4010_v62 }
 0x39e   :  { %2322 = vmatpush3.msra.mxu0 %v4069_v13  ;;  %v4075_v13 = vld [vmem:[#allocation49_spill] sm:$0xff] }
 0x39f   :  { %2323 = vmatprep.subr.mxu0 %v4010_v62 }
 0x3a0   :  { %2324 = vmatpush3.msra.mxu0 %v4070_v60  ;;  %v4076_v60 = vld [vmem:[#allocation50_spill] sm:$0xff] }
 0x3a1   :  { %2325 = vmatprep.subr.mxu0 %v4010_v62 }
 0x3a2   :  { %2326 = vmatpush3.msra.mxu0 %v4071_v12  ;;  %v4077_v12 = vld [vmem:[#allocation51_spill] sm:$0xff] }
 0x3a3   :  { %2327 = vmatprep.subr.mxu0 %v4010_v62 }
 0x3a4   :  { %2328 = vmatpush3.msra.mxu0 %v4072_v63  ;;  %v4078_v63 = vld [vmem:[#allocation52_spill] sm:$0xff] }
 0x3a5   :  { %2329 = vmatprep.subr.mxu0 %v4010_v62 }
 0x3a6   :  { %2330 = vmatpush3.msra.mxu0 %v4073_v4 }
 0x3a7   :  { %2331 = vmatprep.subr.mxu0 %v4010_v62 }
 0x3a8   :  { %2332 = vmatpush3.msra.mxu0 %v4074_v0 }
 0x3a9   :  { %2333 = vmatprep.subr.mxu0 %v4010_v62 }
 0x3aa   :  { %2334 = vmatpush3.msra.mxu0 %v4075_v13 }
 0x3ab   :  { %2335 = vmatprep.subr.mxu0 %v4010_v62 }
 0x3ac   :  { %2336 = vmatpush3.msra.mxu0 %v4076_v60 }
 0x3ad   :  { %2337 = vmatprep.subr.mxu0 %v4010_v62 }
 0x3ae   :  { %2338 = vmatpush3.msra.mxu0 %v4077_v12  ;;  %v4079_v12 = vld [vmem:[#allocation53_spill] sm:$0xff] }
 0x3af   :  { %2339 = vmatprep.subr.mxu0 %v4010_v62 }
 0x3b0   :  { %2340 = vmatpush3.msra.mxu0 %v4078_v63  ;;  %v4080_v63 = vld [vmem:[#allocation4_spill] sm:$0xff] }
 0x3b1   :  { %2379 = vmatprep.subr.mxu0 %v4010_v62 }
 0x3df   :  { %v1055_v4 = vpop.f32.mrf.mxu1 }
 0x3e1   :  { %v2308_v0 = vpop.f32.mrf.mxu1 }
 0x3e2   :  { %v4081_v0 = vld [vmem:[#allocation5_spill] sm:$0xff] }
 0x3ff   :  { %v2064_v13 = vpop.f32.mrf.mxu1 }
 0x401   :  { %v2065_v8 = vpop.f32.mrf.mxu1 }
 0x402   :  { %v2066_v6 = vadd.f32 %v2065_v8, %v2064_v13  ;;  %v4125_v13 = vld [vmem:[#allocation45_spill] sm:$0xff]  ;;  %v4127_v8 = vld [vmem:[#allocation47_spill] sm:$0xff] }
 0x431   :  { %v3655_v11 = vpop.f32.mrf.mxu0 }
 0x433   :  { %v2303_v24 = vpop.f32.mrf.mxu0 }
 0x434   :  { %v1342_v24 = vrot.slane %v3507_v7, 2  ;;  %v4107_v7 = vld [vmem:[#allocation27_spill] sm:$0xff] }
 0x451   :  { %v2029_v10 = vpop.f32.mrf.mxu0 }
 0x453   :  { %v2030_v9 = vpop.f32.mrf.mxu0 }
 0x454   :  { %v2031_v60 = vadd.f32 %v2030_v9, %v2029_v10  ;;  %v4122_v9 = vld [vmem:[#allocation42_spill] sm:$0xff]  ;;  %v4123_v10 = vld [vmem:[#allocation43_spill] sm:$0xff] }
 0x456   :  { %v1126_v5 = vadd.f32 %v2031_v60, %v1055_v4  ;;  %v4124_v60 = vld [vmem:[#allocation44_spill] sm:$0xff] }
 0x457   :  { %v4128_v4 = vld [vmem:[#allocation48_spill] sm:$0xff] }
 0x458   :  { %v1196_v59 = vadd.f32 %v2066_v6, %v1126_v5  ;;  %v4106_v5 = vld [vmem:[#allocation26_spill] sm:$0xff]  ;;  %v4121_v6 = vld [vmem:[#allocation41_spill] sm:$0xff] }
 0x45a   :  { %v1199_v23 = vadd.f32 %v4079_v12, %v1196_v59  ;;  %v4120_v59 = vld [vmem:[#allocation40_spill] sm:$0xff] }
 0x45c   :  { %v1200_v25 = vmax.f32 %v1199_v23, 0.0  ;;  %v1418_v23 = vrot.slane %v2786_v2, 2  ;;  %v4082_v2 = vld [vmem:[#allocation54_spill] sm:$0xff] }
 0x45e   :  { %2342 = vmatmul.mubr.f32.vlgmr.msra.gmra.mxu0 %v1200_v25  ;;  %v2468_v25 = vld [vmem:[%s3971_s24 + $0x8] sm:$0xff] }
 0x45f   :  { %2380 = vmatpush3.msk.msra.mxu0 %vm611_vm2, %v4080_v63  ;;  %2381 = vmatprep.mubr.msk.f32.mxu0 %vm2471_vm0, %v4010_v62  ;;  %v4126_v63 = vld [vmem:[#allocation46_spill] sm:$0xff] }
 0x460   :  { %2138 = vmatprep.subr.mxu0 %v4081_v0  ;;  %v4130_v0 = vld [vmem:[#allocation50_spill] sm:$0xff] }
 0x462   :  { %2382 = vmatmul.mubr.msk.f32.vlgmr.msra.gmra.mxu0 %vm607_vm3, %v1342_v24  ;;  %v4129_v24 = vld [vmem:[#allocation49_spill] sm:$0xff] }
 0x463   :  { %2139 = vmatpush3.msra.mxu0 %v2864_v27  ;;  %v1417_v27 = vrot.slane %v2468_v25, 2  ;;  %1557 = vmatprep.mubr.f32.mxu0 %v1418_v23  ;;  %v4131_v23 = vld [vmem:[#allocation51_spill] sm:$0xff]  ;;  %v4132_v25 = vld [vmem:[#allocation52_spill] sm:$0xff] }
 0x464   :  { %2140 = vmatprep.subr.mxu0 %v2870_v28  ;;  %v4083_v28 = vld [vmem:[#allocation55_spill] sm:$0xff] }
 0x465   :  { %2141 = vmatpush3.msra.mxu0 %v2877_v29 }
 0x466   :  { %2142 = vmatprep.subr.mxu0 %v2883_v30  ;;  %v4084_v30 = vld [vmem:[#allocation56_spill] sm:$0xff] }
 0x467   :  { %2143 = vmatpush3.msra.mxu0 %v2889_v31 }
 0x468   :  { %2144 = vmatprep.subr.mxu0 %v2895_v32 }
 0x469   :  { %2145 = vmatpush3.msra.mxu0 %v2901_v33  ;;  %v4085_v33 = vld [vmem:[#allocation3_spill] sm:$0xff] }
 0x46a   :  { %2146 = vmatprep.subr.mxu0 %v2907_v34  ;;  %v1416_v34 = vrot.slane %v4085_v33, 2 }
 0x46b   :  { %2147 = vmatpush3.msra.mxu0 %v2913_v35 }
 0x46c   :  { %2148 = vmatprep.subr.mxu0 %v2919_v36 }
 0x46d   :  { %2149 = vmatpush3.msra.mxu0 %v2925_v37  ;;  %v4086_v37 = vld [vmem:[#allocation6_spill] sm:$0xff] }
 0x46e   :  { %2150 = vmatprep.subr.mxu0 %v2931_v38 }
 0x46f   :  { %2151 = vmatpush3.msra.mxu0 %v2937_v39  ;;  %v4087_v39 = vld [vmem:[#allocation7_spill] sm:$0xff] }
 0x470   :  { %2152 = vmatprep.subr.mxu0 %v2943_v40  ;;  %v4088_v40 = vld [vmem:[#allocation8_spill] sm:$0xff] }
 0x471   :  { %2153 = vmatpush3.msra.mxu0 %v2949_v41  ;;  %v4089_v41 = vld [vmem:[#allocation9_spill] sm:$0xff] }
 0x472   :  { %2154 = vmatprep.subr.mxu0 %v2955_v42  ;;  %v4090_v42 = vld [vmem:[#allocation10_spill] sm:$0xff] }
 0x473   :  { %2155 = vmatpush3.msra.mxu0 %v2961_v43  ;;  %v4091_v43 = vld [vmem:[#allocation11_spill] sm:$0xff] }
 0x474   :  { %2156 = vmatprep.subr.mxu0 %v2967_v44  ;;  %v4092_v44 = vld [vmem:[#allocation12_spill] sm:$0xff] }
 0x475   :  { %2157 = vmatpush3.msra.mxu0 %v2973_v45  ;;  %v4093_v45 = vld [vmem:[#allocation13_spill] sm:$0xff] }
 0x476   :  { %2158 = vmatprep.subr.mxu0 %v2979_v46  ;;  %v4094_v46 = vld [vmem:[#allocation14_spill] sm:$0xff] }
 0x477   :  { %2159 = vmatpush3.msra.mxu0 %v2985_v47  ;;  %v4095_v47 = vld [vmem:[#allocation15_spill] sm:$0xff] }
 0x478   :  { %2160 = vmatprep.subr.mxu0 %v2991_v48  ;;  %v4096_v48 = vld [vmem:[#allocation16_spill] sm:$0xff] }
 0x479   :  { %2161 = vmatpush3.msra.mxu0 %v2997_v49  ;;  %v4097_v49 = vld [vmem:[#allocation17_spill] sm:$0xff] }
 0x47a   :  { %2162 = vmatprep.subr.mxu0 %v3003_v50  ;;  %v4098_v50 = vld [vmem:[#allocation18_spill] sm:$0xff] }
 0x47b   :  { %2163 = vmatpush3.msra.mxu0 %v3009_v51  ;;  %v4099_v51 = vld [vmem:[#allocation19_spill] sm:$0xff] }
 0x47c   :  { %2164 = vmatprep.subr.mxu0 %v3015_v52  ;;  %v4100_v52 = vld [vmem:[#allocation20_spill] sm:$0xff] }
 0x47d   :  { %2165 = vmatpush3.msra.mxu0 %v3021_v53  ;;  %v4101_v53 = vld [vmem:[#allocation21_spill] sm:$0xff] }
 0x47e   :  { %2166 = vmatprep.subr.mxu0 %v3027_v54  ;;  %v4102_v54 = vld [vmem:[#allocation22_spill] sm:$0xff] }
 0x47f   :  { %2167 = vmatpush3.msra.mxu0 %v3033_v55  ;;  %v4103_v55 = vld [vmem:[#allocation23_spill] sm:$0xff] }
 0x480   :  { %2168 = vmatprep.subr.mxu0 %v3039_v57  ;;  %v4104_v57 = vld [vmem:[#allocation24_spill] sm:$0xff] }
 0x481   :  { %2169 = vmatpush3.msra.mxu0 %v3045_v58  ;;  %v4105_v58 = vld [vmem:[#allocation25_spill] sm:$0xff] }
 0x482   :  { %2419 = vmatprep.subr.mxu0 %v4010_v62  ;;  %1558 = vmatmul.mubr.f32.vlgmr.msra.gmra.mxu0 %v1417_v27 }
 0x483   :  { %2420 = vmatpush3.msra.mxu0 %v3391_v15  ;;  %2451 = vmatprep.mubr.msk.f32.mxu0 %vm2471_vm0, %v4010_v62  ;;  %v4108_v15 = vld [vmem:[#allocation28_spill] sm:$0xff] }
 0x484   :  { %2421 = vmatprep.subr.mxu0 %v4010_v62 }
 0x485   :  { %2422 = vmatpush3.msra.mxu0 %v3396_v16  ;;  %v4109_v16 = vld [vmem:[#allocation29_spill] sm:$0xff] }
 0x486   :  { %2423 = vmatprep.subr.mxu0 %v4010_v62 }
 0x487   :  { %2424 = vmatpush3.msra.mxu0 %v3403_v14  ;;  %v4110_v14 = vld [vmem:[#allocation30_spill] sm:$0xff] }
 0x488   :  { %2425 = vmatprep.subr.mxu0 %v4010_v62 }
 0x489   :  { %2426 = vmatpush3.msra.mxu0 %v3410_v17  ;;  %v4111_v17 = vld [vmem:[#allocation31_spill] sm:$0xff] }
 0x48a   :  { %2427 = vmatprep.subr.mxu0 %v4010_v62 }
 0x48b   :  { %2428 = vmatpush3.msra.mxu0 %v3417_v18  ;;  %v4112_v18 = vld [vmem:[#allocation32_spill] sm:$0xff] }
 0x48c   :  { %2429 = vmatprep.subr.mxu0 %v4010_v62 }
 0x48d   :  { %2430 = vmatpush3.msra.mxu0 %v3424_v19  ;;  %v4113_v19 = vld [vmem:[#allocation33_spill] sm:$0xff] }
 0x48e   :  { %2431 = vmatprep.subr.mxu0 %v4010_v62 }
 0x48f   :  { %2432 = vmatpush3.msra.mxu0 %v3431_v20  ;;  %v2469_v20 = vld [vmem:[%s3971_s24] sm:$0xff] }
 0x490   :  { %2433 = vmatprep.subr.mxu0 %v4010_v62 }
 0x491   :  { %2434 = vmatpush3.msra.mxu0 %v3438_v61  ;;  %v1415_v61 = vrot.slane %v2469_v20, 2 }
 0x492   :  { %2435 = vmatprep.subr.mxu0 %v4010_v62 }
 0x493   :  { %2436 = vmatpush3.msra.mxu0 %v3445_v3  ;;  %v4114_v3 = vld [vmem:[#allocation34_spill] sm:$0xff] }
 0x494   :  { %2437 = vmatprep.subr.mxu0 %v4010_v62 }
 0x495   :  { %2438 = vmatpush3.msra.mxu0 %v3452_v56  ;;  %v4115_v56 = vld [vmem:[#allocation35_spill] sm:$0xff] }
 0x496   :  { %2439 = vmatprep.subr.mxu0 %v4010_v62 }
 0x497   :  { %2440 = vmatpush3.msra.mxu0 %v3459_v26  ;;  %v4116_v26 = vld [vmem:[#allocation36_spill] sm:$0xff] }
 0x498   :  { %2441 = vmatprep.subr.mxu0 %v4010_v62 }
 0x499   :  { %2442 = vmatpush3.msra.mxu0 %v3466_v1  ;;  %v4117_v1 = vld [vmem:[#allocation37_spill] sm:$0xff] }
 0x49a   :  { %2443 = vmatprep.subr.mxu0 %v4010_v62 }
 0x49b   :  { %2444 = vmatpush3.msra.mxu0 %v3473_v22  ;;  %v4118_v22 = vld [vmem:[#allocation38_spill] sm:$0xff] }
 0x49c   :  { %2445 = vmatprep.subr.mxu0 %v4010_v62 }
 0x49d   :  { %2446 = vmatpush3.msra.mxu0 %v3480_v21  ;;  %v4119_v21 = vld [vmem:[#allocation39_spill] sm:$0xff] }
 0x49e   :  { %2447 = vmatprep.subr.mxu0 %v4010_v62 }
 0x49f   :  { %2448 = vmatpush3.msra.mxu0 %v4082_v2 }
 0x4a0   :  { %2449 = vmatprep.subr.mxu0 %v4010_v62 }
 0x4a1   :  { %2450 = vmatpush3.msra.mxu0 %v4083_v28 }
 0x51e   :  { %v1267_v29 = vpop.f32.mrf.mxu0 }
 0x51f   :  { %v1268_v31 = vadd.f32 %v4084_v30, %v1267_v29 }
 0x520   :  { %v2343_v32 = vpop.f32.mrf.mxu0 }
 0x521   :  { %v1271_v35 = vmax.f32 %v1268_v31, 0.0 }
 0x522   :  { %v3736_v36 = vpop.f32.mrf.mxu0 }
 0x523   :  { %2377 = vmatmul.mubr.f32.vlgmr.msra.gmra.mxu1 %v1271_v35 }
 0x524   :  { %2104 = vmatpush3.msra.mxu1 %v4086_v37  ;;  %v2383_v38 = vpop.f32.mrf.mxu0  ;;  %1487 = vmatprep.mubr.f32.mxu1 %v1416_v34 }
 0x525   :  { %2105 = vmatprep.subr.mxu1 %v4087_v39 }
 0x526   :  { %2106 = vmatpush3.msra.mxu1 %v4088_v40 }
 0x527   :  { %2107 = vmatprep.subr.mxu1 %v4089_v41 }
 0x528   :  { %2108 = vmatpush3.msra.mxu1 %v4090_v42 }
 0x529   :  { %2109 = vmatprep.subr.mxu1 %v4091_v43  ;;  %v1804_v43 = vld [vmem:[%s3851_s19] ss:$0 sm:$0xff] }
 0x52a   :  { %2110 = vmatpush3.msra.mxu1 %v4092_v44 }
 0x52b   :  { %2111 = vmatprep.subr.mxu1 %v4093_v45 }
 0x52c   :  { %2112 = vmatpush3.msra.mxu1 %v4094_v46 }
 0x52d   :  { %2113 = vmatprep.subr.mxu1 %v4095_v47 }
 0x52e   :  { %2114 = vmatpush3.msra.mxu1 %v4096_v48 }
 0x52f   :  { %2115 = vmatprep.subr.mxu1 %v4097_v49 }
 0x530   :  { %2116 = vmatpush3.msra.mxu1 %v4098_v50 }
 0x531   :  { %2117 = vmatprep.subr.mxu1 %v4099_v51  ;;  %v1717_v51 = vld [vmem:[%s3852_s4] sm:$0x3] }
 0x532   :  { %2118 = vmatpush3.msra.mxu1 %v4100_v52  ;;  %v1718_v52 = vmul.f32 0.99, %v1717_v51 }
 0x533   :  { %2119 = vmatprep.subr.mxu1 %v4101_v53  ;;  %v1716_v53 = vld [vmem:[%s3853_s3] sm:$0x3] }
 0x534   :  { %2120 = vmatpush3.msra.mxu1 %v4102_v54 }
 0x535   :  { %2121 = vmatprep.subr.mxu1 %v4103_v55 }
 0x536   :  { %2122 = vmatpush3.msra.mxu1 %v4104_v57  ;;  %v983_v57 = vadd.f32 %v1804_v43, %v3655_v11 }
 0x537   :  { %2123 = vmatprep.subr.mxu1 %v4105_v58 }
 0x538   :  { %2124 = vmatpush3.msra.mxu1 %v4106_v5 }
 0x539   :  { %2125 = vmatprep.subr.mxu1 %v4107_v7 }
 0x53a   :  { %2126 = vmatpush3.msra.mxu1 %v4108_v15 }
 0x53b   :  { %2127 = vmatprep.subr.mxu1 %v4109_v16 }
 0x53c   :  { %2128 = vmatpush3.msra.mxu1 %v4110_v14 }
 0x53d   :  { %2129 = vmatprep.subr.mxu1 %v4111_v17 }
 0x53e   :  { %2130 = vmatpush3.msra.mxu1 %v4112_v18 }
 0x53f   :  { %2131 = vmatprep.subr.mxu1 %v4113_v19 }
 0x540   :  { %2132 = vmatpush3.msra.mxu1 %v4114_v3 }
 0x541   :  { %2133 = vmatprep.subr.mxu1 %v4115_v56 }
 0x542   :  { %2134 = vmatpush3.msra.mxu1 %v4116_v26  ;;  %v2170_v28 = vpop.f32.mrf.mxu0 }
 0x543   :  { %1488 = vmatmul.mubr.f32.vlgmr.msra.gmra.mxu1 %v1415_v61  ;;  %2384 = vmatprep.subr.mxu1 %v4010_v62 }
 0x544   :  { %2385 = vmatpush3.msra.mxu1 %v4117_v1  ;;  %2416 = vmatprep.mubr.msk.f32.mxu1 %vm2471_vm0, %v4010_v62  ;;  %v2171_v32 = vpop.f32.mrf.mxu0 }
 0x545   :  { %2386 = vmatprep.subr.mxu1 %v4010_v62  ;;  %v2172_v35 = vadd.f32 %v2171_v32, %v2170_v28 }
 0x546   :  { %2387 = vmatpush3.msra.mxu1 %v4118_v22 }
 0x547   :  { %2388 = vmatprep.subr.mxu1 %v4010_v62 }
 0x548   :  { %2389 = vmatpush3.msra.mxu1 %v4119_v21 }
 0x549   :  { %2390 = vmatprep.subr.mxu1 %v4010_v62 }
 0x54a   :  { %2391 = vmatpush3.msra.mxu1 %v4120_v59 }
 0x54b   :  { %2392 = vmatprep.subr.mxu1 %v4010_v62 }
 0x54c   :  { %2393 = vmatpush3.msra.mxu1 %v4121_v6 }
 0x54d   :  { %2394 = vmatprep.subr.mxu1 %v4010_v62 }
 0x54e   :  { %2395 = vmatpush3.msra.mxu1 %v4122_v9 }
 0x54f   :  { %2396 = vmatprep.subr.mxu1 %v4010_v62 }
 0x550   :  { %2397 = vmatpush3.msra.mxu1 %v4123_v10 }
 0x551   :  { %2398 = vmatprep.subr.mxu1 %v4010_v62 }
 0x552   :  { %2399 = vmatpush3.msra.mxu1 %v4124_v60 }
 0x553   :  { %2400 = vmatprep.subr.mxu1 %v4010_v62 }
 0x554   :  { %2401 = vmatpush3.msra.mxu1 %v4125_v13 }
 0x555   :  { %2402 = vmatprep.subr.mxu1 %v4010_v62 }
 0x556   :  { %2403 = vmatpush3.msra.mxu1 %v4126_v63 }
 0x557   :  { %2404 = vmatprep.subr.mxu1 %v4010_v62 }
 0x558   :  { %2405 = vmatpush3.msra.mxu1 %v4127_v8 }
 0x559   :  { %2406 = vmatprep.subr.mxu1 %v4010_v62 }
 0x55a   :  { %2407 = vmatpush3.msra.mxu1 %v4128_v4 }
 0x55b   :  { %2408 = vmatprep.subr.mxu1 %v4010_v62 }
 0x55c   :  { %2409 = vmatpush3.msra.mxu1 %v4129_v24 }
 0x55d   :  { %2410 = vmatprep.subr.mxu1 %v4010_v62 }
 0x55e   :  { %2411 = vmatpush3.msra.mxu1 %v4130_v0 }
 0x55f   :  { %2412 = vmatprep.subr.mxu1 %v4010_v62 }
 0x560   :  { %2413 = vmatpush3.msra.mxu1 %v4131_v23 }
 0x561   :  { %2414 = vmatprep.subr.mxu1 %v4010_v62 }
 0x562   :  { %2415 = vmatpush3.msra.mxu1 %v4132_v25 }
 0x5e3   :  { %v1338_v27 = vpop.f32.mrf.mxu1 }
 0x5e5   :  { %v2378_v2 = vpop.f32.mrf.mxu1 }
 0x603   :  { %v2135_v29 = vpop.f32.mrf.mxu1 }
 0x605   :  { %v2136_v31 = vpop.f32.mrf.mxu1 }
 0x606   :  { %v2137_v33 = vadd.f32 %v2136_v31, %v2135_v29 }
 0x608   :  { %v1490_v34 = vadd.f32 %v2137_v33, %v3736_v36  ;;  %v505_v36 = vpop.xlane.xlu1 %504 }
 0x609   :  { %v1711_v47 = vmul.f32 0.2, %v505_v36  ;;  %v1775_v60 = vadd.f32 -2.0, %v505_v36 }
 0x60a   :  { %v1560_v37 = vadd.f32 %v2172_v35, %v1490_v34 }
 0x60b   :  { %v1713_v48 = vrot.slane %v1711_v47, 2  ;;  %v1776_v13 = vmul.f32 0.0, %v1775_v60 }
 0x60c   :  { %v1563_v38 = vadd.f32 %v4079_v12, %v1560_v37 }
 0x60d   :  { %v1777_v63 = vsel %vm611_vm2, %v1776_v13, 0.0 }
 0x60e   :  { %v1564_v39 = vmax.f32 %v1563_v38, 0.0  ;;  %v1778_v8 = vrot.slane %v1777_v63, 4 }
 0x610   :  { %2417 = vmatmul.mubr.f32.vlgmr.msra.gmra.mxu1 %v1564_v39  ;;  %v1779_v4 = vadd.f32 %v1778_v8, %v1777_v63 }
 0x612   :  { %v1780_v24 = vrot.slane %v1779_v4, 2 }
 0x6d0   :  { %v1631_v40 = vpop.f32.mrf.mxu1 }
 0x6d1   :  { %v1632_v62 = vadd.f32 %v4084_v30, %v1631_v40  ;;  %v1339_v30 = vadd.f32 %v1804_v43, %v1338_v27  ;;  %v1781_v27 = vadd.f32 %v1780_v24, %v1779_v4 }
 0x6d2   :  { %v2418_v41 = vpop.f32.mrf.mxu1 }
 0x6d3   :  { %v1635_v42 = vmax.f32 %v1632_v62, 0.0  ;;  %v1782_v29 = vrot.slane %v1781_v27, 1 }
 0x6d5   :  { %2452 = vmatmul.mubr.f32.vlgmr.msra.gmra.mxu0 %v1635_v42  ;;  %v1783_v33 = vadd.f32 %v1782_v29, %v1781_v27 }
 0x6d7   :  { %v1784_v37 = vsub.f32 0.0, %v1783_v33 }
 0x6d9   :  { %v1785_v62 = vmul.f32 0.5, %v1784_v37 }
 0x795   :  { %v1702_v44 = vpop.f32.mrf.mxu0 }
 0x796   :  { %v1703_v45 = vadd.f32 %v1804_v43, %v1702_v44 }
 0x797   :  { %v2453_v46 = vpop.f32.mrf.mxu0 }
 0x798   :  { %1707 = vrot.lane.b32.xlu0 %v1703_v45, %s2474_s16 }
 0x80a   :  { %v1708_v12 = vpop.permute.xlu0 %1707 }
 0x80b   :  { %v1710_v49 = vmin.f32 %v1703_v45, %v1708_v12 }
 0x80d   :  { %v1715_v50 = vsub.f32 %v1710_v49, %v1713_v48 }
 0x80f   :  { %1720 = vrot.lane.b32.xlu0 %v1715_v50, %s2473_s9  ;;  %s2475_s9 = smov 1  }
 0x813   :  { %1732 = vrot.lane.b32.xlu0 %v1339_v30, %s2474_s16 }
 0x881   :  { %v1721_v54 = vpop.permute.xlu0 %1720 }
 0x882   :  { %v1723_v55 = vmul.f32 %v1721_v54, %v1718_v52 }
 0x884   :  { %v1724_v58 = vadd.f32 %v1723_v55, %v1716_v53 }
 0x885   :  { %v1733_v5 = vpop.permute.xlu0 %1732 }
 0x886   :  { %v1725_v7 = vsub.f32 %v983_v57, %v1724_v58  ;;  %v1735_v15 = vmin.f32 %v1339_v30, %v1733_v5  ;;  %1727 = vrot.lane.b32.xlu0 %v1724_v58, %s2475_s9 }
 0x888   :  { %v1736_v16 = vmul.f32 %v1725_v7, %v1725_v7  ;;  %v1760_v14 = vsub.f32 %v1711_v47, %v1735_v15 }
 0x88a   :  { %v1738_v17 = vsel %vm1737_vm5, %v1736_v16, 0.0  ;;  %v1761_v18 = vsel %vm1737_vm5, %v1760_v14, 0.0 }
 0x88b   :  { %v1739_v19 = vrot.slane %v1738_v17, 4  ;;  %v1762_v20 = vrot.slane %v1761_v18, 4 }
 0x88d   :  { %v1740_v61 = vadd.f32 %v1739_v19, %v1738_v17  ;;  %v1763_v3 = vadd.f32 %v1762_v20, %v1761_v18 }
 0x88f   :  { %v1741_v56 = vrot.slane %v1740_v61, 2  ;;  %v1764_v26 = vrot.slane %v1763_v3, 2 }
 0x891   :  { %v1742_v1 = vadd.f32 %v1741_v56, %v1740_v61  ;;  %v1765_v22 = vadd.f32 %v1764_v26, %v1763_v3 }
 0x893   :  { %v1743_v11 = vrot.slane %v1742_v1, 1  ;;  %v1766_v21 = vrot.slane %v1765_v22, 1 }
 0x895   :  { %v1744_v59 = vadd.f32 %v1743_v11, %v1742_v1  ;;  %v1767_v6 = vadd.f32 %v1766_v21, %v1765_v22 }
 0x897   :  { %v1745_v9 = vmul.f32 50.0, %v1744_v59  ;;  %v1768_v10 = vmul.f32 50.0, %v1767_v6 }
 0x899   :  { %1770 = vrot.lane.b32.xlu0 %v1768_v10, %s2472_s28  ;;  %1747 = vst.msk [vmem:[%s3854_s20] sm:$0x1] %vm1746_vm6, %v1745_v9 }
 0x8f8   :  { %v1728_v0 = vpop.permute.xlu0 %1727 }
 0x8f9   :  { %v1730_v23 = vsub.f32 %v983_v57, %v1728_v0 }
 0x8fb   :  { %v1748_v25 = vmul.f32 %v1730_v23, %v1730_v23 }
 0x8fd   :  { %v1750_v2 = vsel %vm1749_vm7, %v1748_v25, 0.0 }
 0x8fe   :  { %v1751_v28 = vrot.slane %v1750_v2, 4 }
 0x900   :  { %v1752_v31 = vadd.f32 %v1751_v28, %v1750_v2 }
 0x902   :  { %v1753_v32 = vrot.slane %v1752_v31, 2 }
 0x904   :  { %v1754_v34 = vadd.f32 %v1753_v32, %v1752_v31 }
 0x906   :  { %v1755_v35 = vrot.slane %v1754_v34, 1 }
 0x908   :  { %v1756_v38 = vadd.f32 %v1755_v35, %v1754_v34 }
 0x90a   :  { %v1757_v39 = vmul.f32 50.0, %v1756_v38 }
 0x90b   :  { %v1771_v40 = vpop.permute.xlu0 %1770 }
 0x90c   :  { %1759 = vst.msk [vmem:[%s3854_s20] sm:$0x1] %vm1758_vm8, %v1757_v39 }
 0x90d   :  { %1774 = vst.msk [vmem:[%s3854_s20] sm:$0x1] %vm1773_vm9, %v1771_v40 }
 0x90e   :  { %1787 = vst.msk [vmem:[%s3854_s20] sm:$0x1] %vm1786_vm10, %v1785_v62 }

</bundles_post_ra>
